<compile_context>
chip_gen: v6e
topology: v6e:2x2x1
jax: 0.10.0
libtpu: 0.0.40
codegen_flags: <defaults>
</compile_context>

<pallas_src>
import functools

import jax
import jax.numpy as jnp
from jax.experimental import pallas as pl
from jax.experimental.pallas import tpu as pltpu


# ----------------------------------------------------------------------------
# Fused MPNN forward kernel (one grid step == one graph)
# ----------------------------------------------------------------------------
def _mpnn_fused_kernel(x_ref, ew_ref, src_ref, tgt_ref,
                       lin0_w_ref, lin0_b_ref,
                       enn1_w_ref, enn1_b_ref,
                       enn2_w_ref, enn2_b_ref,
                       conv_b_ref, wh_ref,
                       gru_wi_ref, gru_bi_ref, gru_bh_ref,
                       lin1_w_ref, lin1_b_ref,
                       lin2_w_ref, lin2_b_ref,
                       o_ref,
                       *, n_nodes, n_edges, dim, steps, mxu_dtype):
    f32 = jnp.float32

    def dot(a, b):
        # Optional bf16 MXU operands (v6e/v7x); accumulation stays f32.
        return jnp.dot(a.astype(mxu_dtype), b.astype(mxu_dtype),
                       preferred_element_type=f32)

    # -------------------- prologue: computed ONCE per graph -----------------
    # lin0 + ReLU  -> initial node state (== initial GRU hidden)
    x = x_ref[...]                                                     # (N, in_dim)
    hid = jnp.maximum(dot(x, lin0_w_ref[...]) + lin0_b_ref[...], 0.0)  # (N, dim)

    # Edge network: Linear(1,128) (K=1 -> broadcast multiply on VPU), ReLU,
    # Linear(128, dim*dim).  edge_weight is step-invariant.
    h1 = jnp.maximum(ew_ref[...] * enn1_w_ref[...] + enn1_b_ref[...], 0.0)   # (E, 128)
    w_flat = dot(h1, enn2_w_ref[...]) + enn2_b_ref[...]                # (E, dim*dim)

    # Restack per-edge weight matrices "d-major" so the fused message+scatter
    # becomes one matmul:  w2[d*E + e, o] = w_flat[e, d*dim + o].
    w2 = jnp.concatenate(
        [w_flat[:, d * dim:(d + 1) * dim] for d in range(dim)], axis=0)  # (dim*E, dim)

    # Gather / scatter one-hots (step-invariant).
    src = src_ref[...]                                                 # (1, E) int32
    tgt = tgt_ref[...]                                                 # (1, E) int32
    node_iota = jax.lax.broadcasted_iota(jnp.int32, (n_nodes, n_edges), 0)
    gather_t = (src == node_iota).astype(f32)                          # (N, E): src[e]==n
    scatter_oh = (tgt == node_iota).astype(f32)                        # (N, E): tgt[e]==n
    counts = jnp.sum(scatter_oh, axis=1, keepdims=True)                # (N, 1)
    scatter_mean = scatter_oh * (1.0 / jnp.maximum(counts, 1.0))       # mean folded in

    # Lane-expanded (d-major) copies, column index c = d*E + e.
    gather_exp = jnp.concatenate([gather_t] * dim, axis=1)             # (N, dim*E)
    scatter_exp = jnp.concatenate([scatter_mean] * dim, axis=1)        # (N, dim*E)

    # rep2[d', c] = 1 iff c is in block d' (i.e. d_of_c == d'); division-free.
    cc = jax.lax.broadcasted_iota(jnp.int32, (dim, dim * n_edges), 1)
    rr = jax.lax.broadcasted_iota(jnp.int32, (dim, dim * n_edges), 0)
    rep2 = ((cc >= rr * n_edges) & (cc < (rr + 1) * n_edges)).astype(f32)  # (dim, dim*E)

    conv_b = conv_b_ref[...]                                           # (1, dim)
    wh = wh_ref[...]                                                   # (dim, 4*dim) [root | Whh(r|z|n)]
    gru_wi = gru_wi_ref[...]                                           # (dim, 3*dim) [r|z|n]
    gru_bi = gru_bi_ref[...]                                           # (1, 3*dim)
    gru_bh = gru_bh_ref[...]                                           # (1, 3*dim)

    # ---------------- message-passing loop (fully VMEM-resident) ------------
    # Single-layer GRU with seq_len==1 => out == new hidden, so one carry.
    def step(_, h):
        # h_exp[n, d*E+e] = h[n, d];   x_flat[0, d*E+e] = h[src[e], d]
        h_exp = dot(h, rep2)                                           # (N, dim*E)
        x_flat = jnp.sum(gather_exp * h_exp, axis=0, keepdims=True)    # (1, dim*E)
        # fused per-edge message (x_j @ W_e) + scatter-MEAN: one K=dim*E matmul
        aggr = dot(scatter_exp * x_flat, w2)                           # (N, dim)

        # one lane-dense h-side matmul: [root-term | gh(r|z|n)]
        hw = dot(h, wh)                                                # (N, 4*dim)
        # NNConv root weight + bias, then the outer ReLU from MPNN.forward
        m = jnp.maximum(aggr + hw[:, 0:dim] + conv_b, 0.0)             # (N, dim)

        # GRU cell with packed gates (gate order r|z|n, b_hn stays inside r*()).
        gi = dot(m, gru_wi) + gru_bi                                   # (N, 3*dim)
        gh = hw[:, dim:4 * dim] + gru_bh                               # (N, 3*dim)
        r = jax.nn.sigmoid(gi[:, 0:dim] + gh[:, 0:dim])
        z = jax.nn.sigmoid(gi[:, dim:2 * dim] + gh[:, dim:2 * dim])
        n = jnp.tanh(gi[:, 2 * dim:3 * dim] + r * gh[:, 2 * dim:3 * dim])
        return (1.0 - z) * n + z * h

    out = jax.lax.fori_loop(0, steps, step, hid, unroll=True)

    # ------------------------------ readout ---------------------------------
    y = jnp.maximum(dot(out, lin1_w_ref[...]) + lin1_b_ref[...], 0.0)  # (N, dim)
    # lin2 is zero-padded to 128 lanes -> lane-dense, unmasked stores.
    o_ref[...] = (dot(y, lin2_w_ref[...]) + lin2_b_ref[...]).astype(o_ref.dtype)


# ----------------------------------------------------------------------------
# Wrapper: batched over graphs with a parallel grid
# ----------------------------------------------------------------------------
def mpnn_forward(params, x, edge_index, edge_weight, *, steps, dim,
                 mxu_dtype=jnp.float32):
    """x: (B, N, in_dim); edge_index: (B, 2, E) int; edge_weight: (B, E, 1)."""
    f32 = jnp.float32
    batch, n_nodes, in_dim = x.shape
    n_edges = edge_weight.shape[1]
    out_dim = params["lin2_w"].shape[1]
    out_pad = max(128, ((out_dim + 127) // 128) * 128)

    src = edge_index[:, 0, :].reshape(batch, 1, n_edges).astype(jnp.int32)
    tgt = edge_index[:, 1, :].reshape(batch, 1, n_edges).astype(jnp.int32)

    # Weight packing / padding (plain XLA, outside the kernel; step-invariant).
    wh_packed = jnp.concatenate([params["conv_root"], params["gru_wh"]], axis=1)  # (dim, 4*dim)
    lin2_w_p = jnp.zeros((dim, out_pad), f32).at[:, :out_dim].set(params["lin2_w"])
    lin2_b_p = jnp.zeros((1, out_pad), f32).at[:, :out_dim].set(params["lin2_b"])

    weights = (params["lin0_w"], params["lin0_b"],
               params["enn1_w"], params["enn1_b"],
               params["enn2_w"], params["enn2_b"],
               params["conv_b"], wh_packed,
               params["gru_wi"], params["gru_bi"], params["gru_bh"],
               params["lin1_w"], params["lin1_b"],
               lin2_w_p, lin2_b_p)

    # Per-graph data advances with the batch grid index; weights stay resident.
    graph_specs = [
        pl.BlockSpec((None, n_nodes, in_dim), lambda b: (b, 0, 0)),
        pl.BlockSpec((None, n_edges, 1), lambda b: (b, 0, 0)),
        pl.BlockSpec((None, 1, n_edges), lambda b: (b, 0, 0)),
        pl.BlockSpec((None, 1, n_edges), lambda b: (b, 0, 0)),
    ]
    weight_specs = [pl.BlockSpec(w.shape, lambda b: (0, 0)) for w in weights]

    kernel = functools.partial(_mpnn_fused_kernel, n_nodes=n_nodes,
                               n_edges=n_edges, dim=dim, steps=steps,
                               mxu_dtype=mxu_dtype)
    out_padded = pl.pallas_call(
        kernel,
        grid=(batch,),
        out_shape=jax.ShapeDtypeStruct((batch, n_nodes, out_pad), f32),
        in_specs=graph_specs + weight_specs,
        out_specs=pl.BlockSpec((None, n_nodes, out_pad), lambda b: (b, 0, 0)),
        compiler_params=pltpu.CompilerParams(
            dimension_semantics=("parallel",)),
    )(x.astype(f32), edge_weight.astype(f32), src, tgt, *weights)
    return out_padded[:, :, :out_dim]


# ----------------------------------------------------------------------------
# Pure-JAX reference (same parameter layout) for a correctness check
# ----------------------------------------------------------------------------
def mpnn_reference(params, x, edge_index, edge_weight, *, steps, dim):
    hp = jax.lax.Precision.HIGHEST

    def one(xg, eig, ewg):
        src, tgt = eig[0], eig[1]
        n_nodes = xg.shape[0]
        h = jax.nn.relu(jnp.dot(xg, params["lin0_w"], precision=hp) + params["lin0_b"])
        h1 = jax.nn.relu(jnp.dot(ewg, params["enn1_w"], precision=hp) + params["enn1_b"])
        w3 = (jnp.dot(h1, params["enn2_w"], precision=hp)
              + params["enn2_b"]).reshape(-1, dim, dim)
        for _ in range(steps):
            msg = jnp.einsum("ed,edo->eo", h[src], w3, precision=hp)
            summ = jnp.zeros((n_nodes, dim), jnp.float32).at[tgt].add(msg)
            cnt = jnp.zeros((n_nodes,), jnp.float32).at[tgt].add(1.0)
            aggr = summ / jnp.maximum(cnt, 1.0)[:, None]
            m = jax.nn.relu(aggr + jnp.dot(h, params["conv_root"], precision=hp)
                            + params["conv_b"])
            gi = jnp.dot(m, params["gru_wi"], precision=hp) + params["gru_bi"]
            gh = jnp.dot(h, params["gru_wh"], precision=hp) + params["gru_bh"]
            r = jax.nn.sigmoid(gi[:, :dim] + gh[:, :dim])
            z = jax.nn.sigmoid(gi[:, dim:2 * dim] + gh[:, dim:2 * dim])
            n = jnp.tanh(gi[:, 2 * dim:] + r * gh[:, 2 * dim:])
            h = (1.0 - z) * n + z * h
        y = jax.nn.relu(jnp.dot(h, params["lin1_w"], precision=hp) + params["lin1_b"])
        return jnp.dot(y, params["lin2_w"], precision=hp) + params["lin2_b"]

    return jax.vmap(one)(x, edge_index, edge_weight)


def init_params(key, in_dim, dim, out_dim, enn_hidden=128):
    # NOTE: GRU weights are stored pre-transposed for right-multiplication
    # (m @ W, shape (dim, 3*dim), gate order r|z|n). Loading real PyTorch
    # nn.GRU weights (weight_ih/hh of shape (3*dim, dim)) requires a transpose
    # into this layout.  NNConv here uses aggr='mean' to match the reference.
    names_shapes = [
        ("lin0_w", (in_dim, dim)), ("lin0_b", (1, dim)),
        ("enn1_w", (1, enn_hidden)), ("enn1_b", (1, enn_hidden)),
        ("enn2_w", (enn_hidden, dim * dim)), ("enn2_b", (1, dim * dim)),
        ("conv_root", (dim, dim)), ("conv_b", (1, dim)),
        ("gru_wi", (dim, 3 * dim)), ("gru_wh", (dim, 3 * dim)),
        ("gru_bi", (1, 3 * dim)), ("gru_bh", (1, 3 * dim)),
        ("lin1_w", (dim, dim)), ("lin1_b", (1, dim)),
        ("lin2_w", (dim, out_dim)), ("lin2_b", (1, out_dim)),
    ]
    keys = jax.random.split(key, len(names_shapes))
    return {name: 0.1 * jax.random.normal(k, shape, dtype=jnp.float32)
            for (name, shape), k in zip(names_shapes, keys)}


if __name__ == "__main__":
    # config: gnn_indim=16, mpnn_nhid=32, mpnn_step_mp=3, gnn_outdim=8
    BATCH = 4
    N_NODES, N_EDGES = 8, 16
    IN_DIM, DIM, OUT_DIM = 16, 32, 8
    STEPS = 3

    key = jax.random.PRNGKey(0)
    k_x, k_src, k_tgt, k_ew, k_params = jax.random.split(key, 5)

    x = jax.random.normal(k_x, (BATCH, N_NODES, IN_DIM), dtype=jnp.float32)
    edge_index = jnp.stack([
        jax.random.randint(k_src, (BATCH, N_EDGES), 0, N_NODES, dtype=jnp.int32),
        jax.random.randint(k_tgt, (BATCH, N_EDGES), 0, N_NODES, dtype=jnp.int32),
    ], axis=1)                                                  # (B, 2, E)
    edge_weight = jax.random.uniform(k_ew, (BATCH, N_EDGES, 1), dtype=jnp.float32)

    params = init_params(k_params, IN_DIM, DIM, OUT_DIM)

    fwd = jax.jit(functools.partial(mpnn_forward, steps=STEPS, dim=DIM))
    out = jax.block_until_ready(fwd(params, x, edge_index, edge_weight))

    assert out.shape == (BATCH, N_NODES, OUT_DIM), out.shape
    assert bool(jnp.all(jnp.isfinite(out)))

    ref = jax.block_until_ready(
        mpnn_reference(params, x, edge_index, edge_weight, steps=STEPS, dim=DIM))
    assert jnp.allclose(out, ref, atol=5e-3, rtol=5e-3), \
        float(jnp.max(jnp.abs(out - ref)))

    print("KERNEL_OK")
</pallas_src>

<mosaic_0001>
module attributes {stable_mosaic.version = 11 : i64} {
  func.func @_mpnn_fused_kernel(%arg0: i32, %arg1: memref<1x8x16xf32, #tpu.memory_space<vmem>>, %arg2: memref<1x16x1xf32, #tpu.memory_space<vmem>>, %arg3: memref<1x1x16xi32, #tpu.memory_space<vmem>>, %arg4: memref<1x1x16xi32, #tpu.memory_space<vmem>>, %arg5: memref<16x32xf32, #tpu.memory_space<vmem>>, %arg6: memref<1x32xf32, #tpu.memory_space<vmem>>, %arg7: memref<1x128xf32, #tpu.memory_space<vmem>>, %arg8: memref<1x128xf32, #tpu.memory_space<vmem>>, %arg9: memref<128x1024xf32, #tpu.memory_space<vmem>>, %arg10: memref<1x1024xf32, #tpu.memory_space<vmem>>, %arg11: memref<1x32xf32, #tpu.memory_space<vmem>>, %arg12: memref<32x128xf32, #tpu.memory_space<vmem>>, %arg13: memref<32x96xf32, #tpu.memory_space<vmem>>, %arg14: memref<1x96xf32, #tpu.memory_space<vmem>>, %arg15: memref<1x96xf32, #tpu.memory_space<vmem>>, %arg16: memref<32x32xf32, #tpu.memory_space<vmem>>, %arg17: memref<1x32xf32, #tpu.memory_space<vmem>>, %arg18: memref<32x128xf32, #tpu.memory_space<vmem>>, %arg19: memref<1x128xf32, #tpu.memory_space<vmem>>, %arg20: memref<1x8x128xf32, #tpu.memory_space<vmem>>) attributes {dimension_semantics = [#tpu.dimension_semantics<parallel>], iteration_bounds = array<i64: 4>, scalar_prefetch = 0 : i64, scratch_operands = 0 : i64, tpu.core_type = #tpu.core_type<tc>, window_params = [{transform_indices = @transform_0, window_bounds = array<i64: 1, 8, 16>}, {transform_indices = @transform_1, window_bounds = array<i64: 1, 16, 1>}, {transform_indices = @transform_2, window_bounds = array<i64: 1, 1, 16>}, {transform_indices = @transform_3, window_bounds = array<i64: 1, 1, 16>}, {pipeline_mode = #tpu.pipeline_mode<synchronous>, transform_indices = @transform_4, window_bounds = array<i64: 16, 32>}, {pipeline_mode = #tpu.pipeline_mode<synchronous>, transform_indices = @transform_5, window_bounds = array<i64: 1, 32>}, {pipeline_mode = #tpu.pipeline_mode<synchronous>, transform_indices = @transform_6, window_bounds = array<i64: 1, 128>}, {pipeline_mode = #tpu.pipeline_mode<synchronous>, transform_indices = @transform_7, window_bounds = array<i64: 1, 128>}, {pipeline_mode = #tpu.pipeline_mode<synchronous>, transform_indices = @transform_8, window_bounds = array<i64: 128, 1024>}, {pipeline_mode = #tpu.pipeline_mode<synchronous>, transform_indices = @transform_9, window_bounds = array<i64: 1, 1024>}, {pipeline_mode = #tpu.pipeline_mode<synchronous>, transform_indices = @transform_10, window_bounds = array<i64: 1, 32>}, {pipeline_mode = #tpu.pipeline_mode<synchronous>, transform_indices = @transform_11, window_bounds = array<i64: 32, 128>}, {pipeline_mode = #tpu.pipeline_mode<synchronous>, transform_indices = @transform_12, window_bounds = array<i64: 32, 96>}, {pipeline_mode = #tpu.pipeline_mode<synchronous>, transform_indices = @transform_13, window_bounds = array<i64: 1, 96>}, {pipeline_mode = #tpu.pipeline_mode<synchronous>, transform_indices = @transform_14, window_bounds = array<i64: 1, 96>}, {pipeline_mode = #tpu.pipeline_mode<synchronous>, transform_indices = @transform_15, window_bounds = array<i64: 32, 32>}, {pipeline_mode = #tpu.pipeline_mode<synchronous>, transform_indices = @transform_16, window_bounds = array<i64: 1, 32>}, {pipeline_mode = #tpu.pipeline_mode<synchronous>, transform_indices = @transform_17, window_bounds = array<i64: 32, 128>}, {pipeline_mode = #tpu.pipeline_mode<synchronous>, transform_indices = @transform_18, window_bounds = array<i64: 1, 128>}, {transform_indices = @transform_19, window_bounds = array<i64: 1, 8, 128>}]} {
    %c0 = arith.constant 0 : index
    %c0_0 = arith.constant 0 : index
    %c0_1 = arith.constant 0 : index
    %0 = vector.load %arg1[%c0, %c0_0, %c0_1] : memref<1x8x16xf32, #tpu.memory_space<vmem>>, vector<1x8x16xf32>
    %1 = vector.shape_cast %0 : vector<1x8x16xf32> to vector<8x16xf32>
    %c0_2 = arith.constant 0 : index
    %c0_3 = arith.constant 0 : index
    %2 = vector.load %arg5[%c0_2, %c0_3] : memref<16x32xf32, #tpu.memory_space<vmem>>, vector<16x32xf32>
    %cst = arith.constant dense<0.000000e+00> : vector<8x32xf32>
    %3 = tpu.matmul %1, %2, %cst {dimension_numbers = #tpu.dot_dimension_numbers<[1], [0], [0], [1], [0, 0, 1, 1], [], []>} : vector<8x16xf32>, vector<16x32xf32>, vector<8x32xf32> -> vector<8x32xf32>
    %c0_4 = arith.constant 0 : index
    %c0_5 = arith.constant 0 : index
    %4 = vector.load %arg6[%c0_4, %c0_5] : memref<1x32xf32, #tpu.memory_space<vmem>>, vector<1x32xf32>
    %5 = vector.broadcast %4 : vector<1x32xf32> to vector<8x32xf32>
    %6 = arith.addf %3, %5 : vector<8x32xf32>
    %cst_6 = arith.constant 0.000000e+00 : f32
    %7 = vector.broadcast %cst_6 : f32 to vector<8x32xf32>
    %8 = arith.maximumf %6, %7 : vector<8x32xf32>
    %c0_7 = arith.constant 0 : index
    %c0_8 = arith.constant 0 : index
    %c0_9 = arith.constant 0 : index
    %9 = vector.load %arg2[%c0_7, %c0_8, %c0_9] : memref<1x16x1xf32, #tpu.memory_space<vmem>>, vector<1x16x1xf32>
    %10 = vector.shape_cast %9 : vector<1x16x1xf32> to vector<16x1xf32>
    %c0_10 = arith.constant 0 : index
    %c0_11 = arith.constant 0 : index
    %11 = vector.load %arg7[%c0_10, %c0_11] : memref<1x128xf32, #tpu.memory_space<vmem>>, vector<1x128xf32>
    %12 = vector.broadcast %10 : vector<16x1xf32> to vector<16x128xf32>
    %13 = vector.broadcast %11 : vector<1x128xf32> to vector<16x128xf32>
    %14 = arith.mulf %12, %13 : vector<16x128xf32>
    %c0_12 = arith.constant 0 : index
    %c0_13 = arith.constant 0 : index
    %15 = vector.load %arg8[%c0_12, %c0_13] : memref<1x128xf32, #tpu.memory_space<vmem>>, vector<1x128xf32>
    %16 = vector.broadcast %15 : vector<1x128xf32> to vector<16x128xf32>
    %17 = arith.addf %14, %16 : vector<16x128xf32>
    %cst_14 = arith.constant 0.000000e+00 : f32
    %18 = vector.broadcast %cst_14 : f32 to vector<16x128xf32>
    %19 = arith.maximumf %17, %18 : vector<16x128xf32>
    %c0_15 = arith.constant 0 : index
    %c0_16 = arith.constant 0 : index
    %20 = vector.load %arg9[%c0_15, %c0_16] : memref<128x1024xf32, #tpu.memory_space<vmem>>, vector<128x1024xf32>
    %cst_17 = arith.constant dense<0.000000e+00> : vector<16x1024xf32>
    %21 = tpu.matmul %19, %20, %cst_17 {dimension_numbers = #tpu.dot_dimension_numbers<[1], [0], [0], [1], [0, 0, 1, 1], [], []>} : vector<16x128xf32>, vector<128x1024xf32>, vector<16x1024xf32> -> vector<16x1024xf32>
    %c0_18 = arith.constant 0 : index
    %c0_19 = arith.constant 0 : index
    %22 = vector.load %arg10[%c0_18, %c0_19] : memref<1x1024xf32, #tpu.memory_space<vmem>>, vector<1x1024xf32>
    %23 = vector.broadcast %22 : vector<1x1024xf32> to vector<16x1024xf32>
    %24 = arith.addf %21, %23 : vector<16x1024xf32>
    %25 = vector.extract_strided_slice %24 {offsets = [0, 0], sizes = [16, 32], strides = [1, 1]} : vector<16x1024xf32> to vector<16x32xf32>
    %26 = vector.extract_strided_slice %24 {offsets = [0, 32], sizes = [16, 32], strides = [1, 1]} : vector<16x1024xf32> to vector<16x32xf32>
    %27 = vector.extract_strided_slice %24 {offsets = [0, 64], sizes = [16, 32], strides = [1, 1]} : vector<16x1024xf32> to vector<16x32xf32>
    %28 = vector.extract_strided_slice %24 {offsets = [0, 96], sizes = [16, 32], strides = [1, 1]} : vector<16x1024xf32> to vector<16x32xf32>
    %29 = vector.extract_strided_slice %24 {offsets = [0, 128], sizes = [16, 32], strides = [1, 1]} : vector<16x1024xf32> to vector<16x32xf32>
    %30 = vector.extract_strided_slice %24 {offsets = [0, 160], sizes = [16, 32], strides = [1, 1]} : vector<16x1024xf32> to vector<16x32xf32>
    %31 = vector.extract_strided_slice %24 {offsets = [0, 192], sizes = [16, 32], strides = [1, 1]} : vector<16x1024xf32> to vector<16x32xf32>
    %32 = vector.extract_strided_slice %24 {offsets = [0, 224], sizes = [16, 32], strides = [1, 1]} : vector<16x1024xf32> to vector<16x32xf32>
    %33 = vector.extract_strided_slice %24 {offsets = [0, 256], sizes = [16, 32], strides = [1, 1]} : vector<16x1024xf32> to vector<16x32xf32>
    %34 = vector.extract_strided_slice %24 {offsets = [0, 288], sizes = [16, 32], strides = [1, 1]} : vector<16x1024xf32> to vector<16x32xf32>
    %35 = vector.extract_strided_slice %24 {offsets = [0, 320], sizes = [16, 32], strides = [1, 1]} : vector<16x1024xf32> to vector<16x32xf32>
    %36 = vector.extract_strided_slice %24 {offsets = [0, 352], sizes = [16, 32], strides = [1, 1]} : vector<16x1024xf32> to vector<16x32xf32>
    %37 = vector.extract_strided_slice %24 {offsets = [0, 384], sizes = [16, 32], strides = [1, 1]} : vector<16x1024xf32> to vector<16x32xf32>
    %38 = vector.extract_strided_slice %24 {offsets = [0, 416], sizes = [16, 32], strides = [1, 1]} : vector<16x1024xf32> to vector<16x32xf32>
    %39 = vector.extract_strided_slice %24 {offsets = [0, 448], sizes = [16, 32], strides = [1, 1]} : vector<16x1024xf32> to vector<16x32xf32>
    %40 = vector.extract_strided_slice %24 {offsets = [0, 480], sizes = [16, 32], strides = [1, 1]} : vector<16x1024xf32> to vector<16x32xf32>
    %41 = vector.extract_strided_slice %24 {offsets = [0, 512], sizes = [16, 32], strides = [1, 1]} : vector<16x1024xf32> to vector<16x32xf32>
    %42 = vector.extract_strided_slice %24 {offsets = [0, 544], sizes = [16, 32], strides = [1, 1]} : vector<16x1024xf32> to vector<16x32xf32>
    %43 = vector.extract_strided_slice %24 {offsets = [0, 576], sizes = [16, 32], strides = [1, 1]} : vector<16x1024xf32> to vector<16x32xf32>
    %44 = vector.extract_strided_slice %24 {offsets = [0, 608], sizes = [16, 32], strides = [1, 1]} : vector<16x1024xf32> to vector<16x32xf32>
    %45 = vector.extract_strided_slice %24 {offsets = [0, 640], sizes = [16, 32], strides = [1, 1]} : vector<16x1024xf32> to vector<16x32xf32>
    %46 = vector.extract_strided_slice %24 {offsets = [0, 672], sizes = [16, 32], strides = [1, 1]} : vector<16x1024xf32> to vector<16x32xf32>
    %47 = vector.extract_strided_slice %24 {offsets = [0, 704], sizes = [16, 32], strides = [1, 1]} : vector<16x1024xf32> to vector<16x32xf32>
    %48 = vector.extract_strided_slice %24 {offsets = [0, 736], sizes = [16, 32], strides = [1, 1]} : vector<16x1024xf32> to vector<16x32xf32>
    %49 = vector.extract_strided_slice %24 {offsets = [0, 768], sizes = [16, 32], strides = [1, 1]} : vector<16x1024xf32> to vector<16x32xf32>
    %50 = vector.extract_strided_slice %24 {offsets = [0, 800], sizes = [16, 32], strides = [1, 1]} : vector<16x1024xf32> to vector<16x32xf32>
    %51 = vector.extract_strided_slice %24 {offsets = [0, 832], sizes = [16, 32], strides = [1, 1]} : vector<16x1024xf32> to vector<16x32xf32>
    %52 = vector.extract_strided_slice %24 {offsets = [0, 864], sizes = [16, 32], strides = [1, 1]} : vector<16x1024xf32> to vector<16x32xf32>
    %53 = vector.extract_strided_slice %24 {offsets = [0, 896], sizes = [16, 32], strides = [1, 1]} : vector<16x1024xf32> to vector<16x32xf32>
    %54 = vector.extract_strided_slice %24 {offsets = [0, 928], sizes = [16, 32], strides = [1, 1]} : vector<16x1024xf32> to vector<16x32xf32>
    %55 = vector.extract_strided_slice %24 {offsets = [0, 960], sizes = [16, 32], strides = [1, 1]} : vector<16x1024xf32> to vector<16x32xf32>
    %56 = vector.extract_strided_slice %24 {offsets = [0, 992], sizes = [16, 32], strides = [1, 1]} : vector<16x1024xf32> to vector<16x32xf32>
    %57 = tpu.concatenate %25, %26, %27, %28, %29, %30, %31, %32, %33, %34, %35, %36, %37, %38, %39, %40 in 0 : vector<16x32xf32>, vector<16x32xf32>, vector<16x32xf32>, vector<16x32xf32>, vector<16x32xf32>, vector<16x32xf32>, vector<16x32xf32>, vector<16x32xf32>, vector<16x32xf32>, vector<16x32xf32>, vector<16x32xf32>, vector<16x32xf32>, vector<16x32xf32>, vector<16x32xf32>, vector<16x32xf32>, vector<16x32xf32> -> vector<256x32xf32>
    %58 = tpu.concatenate %41, %42, %43, %44, %45, %46, %47, %48, %49, %50, %51, %52, %53, %54, %55, %56 in 0 : vector<16x32xf32>, vector<16x32xf32>, vector<16x32xf32>, vector<16x32xf32>, vector<16x32xf32>, vector<16x32xf32>, vector<16x32xf32>, vector<16x32xf32>, vector<16x32xf32>, vector<16x32xf32>, vector<16x32xf32>, vector<16x32xf32>, vector<16x32xf32>, vector<16x32xf32>, vector<16x32xf32>, vector<16x32xf32> -> vector<256x32xf32>
    %59 = tpu.concatenate %57, %58 in 0 : vector<256x32xf32>, vector<256x32xf32> -> vector<512x32xf32>
    %c0_20 = arith.constant 0 : index
    %c0_21 = arith.constant 0 : index
    %c0_22 = arith.constant 0 : index
    %60 = vector.load %arg3[%c0_20, %c0_21, %c0_22] : memref<1x1x16xi32, #tpu.memory_space<vmem>>, vector<1x1x16xi32>
    %61 = vector.shape_cast %60 : vector<1x1x16xi32> to vector<1x16xi32>
    %c0_23 = arith.constant 0 : index
    %c0_24 = arith.constant 0 : index
    %c0_25 = arith.constant 0 : index
    %62 = vector.load %arg4[%c0_23, %c0_24, %c0_25] : memref<1x1x16xi32, #tpu.memory_space<vmem>>, vector<1x1x16xi32>
    %63 = vector.shape_cast %62 : vector<1x1x16xi32> to vector<1x16xi32>
    %64 = tpu.iota {dimensions = array<i32: 0>} : vector<8x16xi32>
    %65 = vector.broadcast %61 : vector<1x16xi32> to vector<8x16xi32>
    %66 = arith.cmpi eq, %65, %64 : vector<8x16xi32>
    %67 = arith.extui %66 : vector<8x16xi1> to vector<8x16xi32>
    %68 = arith.sitofp %67 : vector<8x16xi32> to vector<8x16xf32>
    %69 = vector.broadcast %63 : vector<1x16xi32> to vector<8x16xi32>
    %70 = arith.cmpi eq, %69, %64 : vector<8x16xi32>
    %71 = arith.extui %70 : vector<8x16xi1> to vector<8x16xi32>
    %72 = arith.sitofp %71 : vector<8x16xi32> to vector<8x16xf32>
    %cst_26 = arith.constant dense<0.000000e+00> : vector<8xf32>
    %73 = vector.multi_reduction <add>, %72, %cst_26 [1] : vector<8x16xf32> to vector<8xf32>
    %74 = vector.shape_cast %73 : vector<8xf32> to vector<8x1xf32>
    %cst_27 = arith.constant 1.000000e+00 : f32
    %75 = vector.broadcast %cst_27 : f32 to vector<8x1xf32>
    %76 = arith.maximumf %74, %75 : vector<8x1xf32>
    %cst_28 = arith.constant 1.000000e+00 : f32
    %77 = vector.broadcast %cst_28 : f32 to vector<8x1xf32>
    %78 = arith.divf %77, %76 : vector<8x1xf32>
    %79 = vector.broadcast %78 : vector<8x1xf32> to vector<8x16xf32>
    %80 = arith.mulf %72, %79 : vector<8x16xf32>
    %81 = tpu.concatenate %68, %68, %68, %68, %68, %68, %68, %68, %68, %68, %68, %68, %68, %68, %68, %68 in 1 : vector<8x16xf32>, vector<8x16xf32>, vector<8x16xf32>, vector<8x16xf32>, vector<8x16xf32>, vector<8x16xf32>, vector<8x16xf32>, vector<8x16xf32>, vector<8x16xf32>, vector<8x16xf32>, vector<8x16xf32>, vector<8x16xf32>, vector<8x16xf32>, vector<8x16xf32>, vector<8x16xf32>, vector<8x16xf32> -> vector<8x256xf32>
    %82 = tpu.concatenate %68, %68, %68, %68, %68, %68, %68, %68, %68, %68, %68, %68, %68, %68, %68, %68 in 1 : vector<8x16xf32>, vector<8x16xf32>, vector<8x16xf32>, vector<8x16xf32>, vector<8x16xf32>, vector<8x16xf32>, vector<8x16xf32>, vector<8x16xf32>, vector<8x16xf32>, vector<8x16xf32>, vector<8x16xf32>, vector<8x16xf32>, vector<8x16xf32>, vector<8x16xf32>, vector<8x16xf32>, vector<8x16xf32> -> vector<8x256xf32>
    %83 = tpu.concatenate %81, %82 in 1 : vector<8x256xf32>, vector<8x256xf32> -> vector<8x512xf32>
    %84 = tpu.concatenate %80, %80, %80, %80, %80, %80, %80, %80, %80, %80, %80, %80, %80, %80, %80, %80 in 1 : vector<8x16xf32>, vector<8x16xf32>, vector<8x16xf32>, vector<8x16xf32>, vector<8x16xf32>, vector<8x16xf32>, vector<8x16xf32>, vector<8x16xf32>, vector<8x16xf32>, vector<8x16xf32>, vector<8x16xf32>, vector<8x16xf32>, vector<8x16xf32>, vector<8x16xf32>, vector<8x16xf32>, vector<8x16xf32> -> vector<8x256xf32>
    %85 = tpu.concatenate %80, %80, %80, %80, %80, %80, %80, %80, %80, %80, %80, %80, %80, %80, %80, %80 in 1 : vector<8x16xf32>, vector<8x16xf32>, vector<8x16xf32>, vector<8x16xf32>, vector<8x16xf32>, vector<8x16xf32>, vector<8x16xf32>, vector<8x16xf32>, vector<8x16xf32>, vector<8x16xf32>, vector<8x16xf32>, vector<8x16xf32>, vector<8x16xf32>, vector<8x16xf32>, vector<8x16xf32>, vector<8x16xf32> -> vector<8x256xf32>
    %86 = tpu.concatenate %84, %85 in 1 : vector<8x256xf32>, vector<8x256xf32> -> vector<8x512xf32>
    %87 = tpu.iota {dimensions = array<i32: 1>} : vector<32x512xi32>
    %88 = tpu.iota {dimensions = array<i32: 0>} : vector<32x512xi32>
    %c16_i32 = arith.constant 16 : i32
    %89 = vector.broadcast %c16_i32 : i32 to vector<32x512xi32>
    %90 = arith.muli %88, %89 : vector<32x512xi32>
    %91 = arith.cmpi sge, %87, %90 : vector<32x512xi32>
    %c1_i32 = arith.constant 1 : i32
    %92 = vector.broadcast %c1_i32 : i32 to vector<32x512xi32>
    %93 = arith.addi %88, %92 : vector<32x512xi32>
    %c16_i32_29 = arith.constant 16 : i32
    %94 = vector.broadcast %c16_i32_29 : i32 to vector<32x512xi32>
    %95 = arith.muli %93, %94 : vector<32x512xi32>
    %96 = arith.cmpi slt, %87, %95 : vector<32x512xi32>
    %97 = arith.andi %91, %96 : vector<32x512xi1>
    %98 = arith.extui %97 : vector<32x512xi1> to vector<32x512xi32>
    %99 = arith.sitofp %98 : vector<32x512xi32> to vector<32x512xf32>
    %c0_30 = arith.constant 0 : index
    %c0_31 = arith.constant 0 : index
    %100 = vector.load %arg11[%c0_30, %c0_31] : memref<1x32xf32, #tpu.memory_space<vmem>>, vector<1x32xf32>
    %c0_32 = arith.constant 0 : index
    %c0_33 = arith.constant 0 : index
    %101 = vector.load %arg12[%c0_32, %c0_33] : memref<32x128xf32, #tpu.memory_space<vmem>>, vector<32x128xf32>
    %c0_34 = arith.constant 0 : index
    %c0_35 = arith.constant 0 : index
    %102 = vector.load %arg13[%c0_34, %c0_35] : memref<32x96xf32, #tpu.memory_space<vmem>>, vector<32x96xf32>
    %c0_36 = arith.constant 0 : index
    %c0_37 = arith.constant 0 : index
    %103 = vector.load %arg14[%c0_36, %c0_37] : memref<1x96xf32, #tpu.memory_space<vmem>>, vector<1x96xf32>
    %c0_38 = arith.constant 0 : index
    %c0_39 = arith.constant 0 : index
    %104 = vector.load %arg15[%c0_38, %c0_39] : memref<1x96xf32, #tpu.memory_space<vmem>>, vector<1x96xf32>
    %c0_i32 = arith.constant 0 : i32
    %cst_40 = arith.constant dense<0.000000e+00> : vector<8x512xf32>
    %105 = tpu.matmul %8, %99, %cst_40 {dimension_numbers = #tpu.dot_dimension_numbers<[1], [0], [0], [1], [0, 0, 1, 1], [], []>} : vector<8x32xf32>, vector<32x512xf32>, vector<8x512xf32> -> vector<8x512xf32>
    %106 = arith.mulf %83, %105 : vector<8x512xf32>
    %cst_41 = arith.constant dense<0.000000e+00> : vector<512xf32>
    %107 = vector.multi_reduction <add>, %106, %cst_41 [0] : vector<8x512xf32> to vector<512xf32>
    %108 = vector.shape_cast %107 : vector<512xf32> to vector<1x512xf32>
    %109 = vector.broadcast %108 : vector<1x512xf32> to vector<8x512xf32>
    %110 = arith.mulf %86, %109 : vector<8x512xf32>
    %cst_42 = arith.constant dense<0.000000e+00> : vector<8x32xf32>
    %111 = tpu.matmul %110, %59, %cst_42 {dimension_numbers = #tpu.dot_dimension_numbers<[1], [0], [0], [1], [0, 0, 1, 1], [], []>} : vector<8x512xf32>, vector<512x32xf32>, vector<8x32xf32> -> vector<8x32xf32>
    %cst_43 = arith.constant dense<0.000000e+00> : vector<8x128xf32>
    %112 = tpu.matmul %8, %101, %cst_43 {dimension_numbers = #tpu.dot_dimension_numbers<[1], [0], [0], [1], [0, 0, 1, 1], [], []>} : vector<8x32xf32>, vector<32x128xf32>, vector<8x128xf32> -> vector<8x128xf32>
    %113 = vector.extract_strided_slice %112 {offsets = [0, 0], sizes = [8, 32], strides = [1, 1]} : vector<8x128xf32> to vector<8x32xf32>
    %114 = arith.addf %111, %113 : vector<8x32xf32>
    %115 = vector.broadcast %100 : vector<1x32xf32> to vector<8x32xf32>
    %116 = arith.addf %114, %115 : vector<8x32xf32>
    %cst_44 = arith.constant 0.000000e+00 : f32
    %117 = vector.broadcast %cst_44 : f32 to vector<8x32xf32>
    %118 = arith.maximumf %116, %117 : vector<8x32xf32>
    %cst_45 = arith.constant dense<0.000000e+00> : vector<8x96xf32>
    %119 = tpu.matmul %118, %102, %cst_45 {dimension_numbers = #tpu.dot_dimension_numbers<[1], [0], [0], [1], [0, 0, 1, 1], [], []>} : vector<8x32xf32>, vector<32x96xf32>, vector<8x96xf32> -> vector<8x96xf32>
    %120 = vector.broadcast %103 : vector<1x96xf32> to vector<8x96xf32>
    %121 = arith.addf %119, %120 : vector<8x96xf32>
    %122 = vector.extract_strided_slice %112 {offsets = [0, 32], sizes = [8, 96], strides = [1, 1]} : vector<8x128xf32> to vector<8x96xf32>
    %123 = vector.broadcast %104 : vector<1x96xf32> to vector<8x96xf32>
    %124 = arith.addf %122, %123 : vector<8x96xf32>
    %125 = vector.extract_strided_slice %121 {offsets = [0, 0], sizes = [8, 32], strides = [1, 1]} : vector<8x96xf32> to vector<8x32xf32>
    %126 = vector.extract_strided_slice %124 {offsets = [0, 0], sizes = [8, 32], strides = [1, 1]} : vector<8x96xf32> to vector<8x32xf32>
    %127 = arith.addf %125, %126 : vector<8x32xf32>
    %128 = arith.negf %127 : vector<8x32xf32>
    %129 = math.exp %128 : vector<8x32xf32>
    %cst_46 = arith.constant 1.000000e+00 : f32
    %130 = vector.broadcast %cst_46 : f32 to vector<8x32xf32>
    %131 = arith.addf %130, %129 : vector<8x32xf32>
    %132 = arith.divf %130, %131 : vector<8x32xf32>
    %133 = vector.extract_strided_slice %121 {offsets = [0, 32], sizes = [8, 32], strides = [1, 1]} : vector<8x96xf32> to vector<8x32xf32>
    %134 = vector.extract_strided_slice %124 {offsets = [0, 32], sizes = [8, 32], strides = [1, 1]} : vector<8x96xf32> to vector<8x32xf32>
    %135 = arith.addf %133, %134 : vector<8x32xf32>
    %136 = arith.negf %135 : vector<8x32xf32>
    %137 = math.exp %136 : vector<8x32xf32>
    %cst_47 = arith.constant 1.000000e+00 : f32
    %138 = vector.broadcast %cst_47 : f32 to vector<8x32xf32>
    %139 = arith.addf %138, %137 : vector<8x32xf32>
    %140 = arith.divf %138, %139 : vector<8x32xf32>
    %141 = vector.extract_strided_slice %121 {offsets = [0, 64], sizes = [8, 32], strides = [1, 1]} : vector<8x96xf32> to vector<8x32xf32>
    %142 = vector.extract_strided_slice %124 {offsets = [0, 64], sizes = [8, 32], strides = [1, 1]} : vector<8x96xf32> to vector<8x32xf32>
    %143 = arith.mulf %132, %142 : vector<8x32xf32>
    %144 = arith.addf %141, %143 : vector<8x32xf32>
    %145 = math.tanh %144 : vector<8x32xf32>
    %cst_48 = arith.constant 1.000000e+00 : f32
    %146 = vector.broadcast %cst_48 : f32 to vector<8x32xf32>
    %147 = arith.subf %146, %140 : vector<8x32xf32>
    %148 = arith.mulf %147, %145 : vector<8x32xf32>
    %149 = arith.mulf %140, %8 : vector<8x32xf32>
    %150 = arith.addf %148, %149 : vector<8x32xf32>
    %c1_i32_49 = arith.constant 1 : i32
    %cst_50 = arith.constant dense<0.000000e+00> : vector<8x512xf32>
    %151 = tpu.matmul %150, %99, %cst_50 {dimension_numbers = #tpu.dot_dimension_numbers<[1], [0], [0], [1], [0, 0, 1, 1], [], []>} : vector<8x32xf32>, vector<32x512xf32>, vector<8x512xf32> -> vector<8x512xf32>
    %152 = arith.mulf %83, %151 : vector<8x512xf32>
    %cst_51 = arith.constant dense<0.000000e+00> : vector<512xf32>
    %153 = vector.multi_reduction <add>, %152, %cst_51 [0] : vector<8x512xf32> to vector<512xf32>
    %154 = vector.shape_cast %153 : vector<512xf32> to vector<1x512xf32>
    %155 = vector.broadcast %154 : vector<1x512xf32> to vector<8x512xf32>
    %156 = arith.mulf %86, %155 : vector<8x512xf32>
    %cst_52 = arith.constant dense<0.000000e+00> : vector<8x32xf32>
    %157 = tpu.matmul %156, %59, %cst_52 {dimension_numbers = #tpu.dot_dimension_numbers<[1], [0], [0], [1], [0, 0, 1, 1], [], []>} : vector<8x512xf32>, vector<512x32xf32>, vector<8x32xf32> -> vector<8x32xf32>
    %cst_53 = arith.constant dense<0.000000e+00> : vector<8x128xf32>
    %158 = tpu.matmul %150, %101, %cst_53 {dimension_numbers = #tpu.dot_dimension_numbers<[1], [0], [0], [1], [0, 0, 1, 1], [], []>} : vector<8x32xf32>, vector<32x128xf32>, vector<8x128xf32> -> vector<8x128xf32>
    %159 = vector.extract_strided_slice %158 {offsets = [0, 0], sizes = [8, 32], strides = [1, 1]} : vector<8x128xf32> to vector<8x32xf32>
    %160 = arith.addf %157, %159 : vector<8x32xf32>
    %161 = vector.broadcast %100 : vector<1x32xf32> to vector<8x32xf32>
    %162 = arith.addf %160, %161 : vector<8x32xf32>
    %cst_54 = arith.constant 0.000000e+00 : f32
    %163 = vector.broadcast %cst_54 : f32 to vector<8x32xf32>
    %164 = arith.maximumf %162, %163 : vector<8x32xf32>
    %cst_55 = arith.constant dense<0.000000e+00> : vector<8x96xf32>
    %165 = tpu.matmul %164, %102, %cst_55 {dimension_numbers = #tpu.dot_dimension_numbers<[1], [0], [0], [1], [0, 0, 1, 1], [], []>} : vector<8x32xf32>, vector<32x96xf32>, vector<8x96xf32> -> vector<8x96xf32>
    %166 = vector.broadcast %103 : vector<1x96xf32> to vector<8x96xf32>
    %167 = arith.addf %165, %166 : vector<8x96xf32>
    %168 = vector.extract_strided_slice %158 {offsets = [0, 32], sizes = [8, 96], strides = [1, 1]} : vector<8x128xf32> to vector<8x96xf32>
    %169 = vector.broadcast %104 : vector<1x96xf32> to vector<8x96xf32>
    %170 = arith.addf %168, %169 : vector<8x96xf32>
    %171 = vector.extract_strided_slice %167 {offsets = [0, 0], sizes = [8, 32], strides = [1, 1]} : vector<8x96xf32> to vector<8x32xf32>
    %172 = vector.extract_strided_slice %170 {offsets = [0, 0], sizes = [8, 32], strides = [1, 1]} : vector<8x96xf32> to vector<8x32xf32>
    %173 = arith.addf %171, %172 : vector<8x32xf32>
    %174 = arith.negf %173 : vector<8x32xf32>
    %175 = math.exp %174 : vector<8x32xf32>
    %cst_56 = arith.constant 1.000000e+00 : f32
    %176 = vector.broadcast %cst_56 : f32 to vector<8x32xf32>
    %177 = arith.addf %176, %175 : vector<8x32xf32>
    %178 = arith.divf %176, %177 : vector<8x32xf32>
    %179 = vector.extract_strided_slice %167 {offsets = [0, 32], sizes = [8, 32], strides = [1, 1]} : vector<8x96xf32> to vector<8x32xf32>
    %180 = vector.extract_strided_slice %170 {offsets = [0, 32], sizes = [8, 32], strides = [1, 1]} : vector<8x96xf32> to vector<8x32xf32>
    %181 = arith.addf %179, %180 : vector<8x32xf32>
    %182 = arith.negf %181 : vector<8x32xf32>
    %183 = math.exp %182 : vector<8x32xf32>
    %cst_57 = arith.constant 1.000000e+00 : f32
    %184 = vector.broadcast %cst_57 : f32 to vector<8x32xf32>
    %185 = arith.addf %184, %183 : vector<8x32xf32>
    %186 = arith.divf %184, %185 : vector<8x32xf32>
    %187 = vector.extract_strided_slice %167 {offsets = [0, 64], sizes = [8, 32], strides = [1, 1]} : vector<8x96xf32> to vector<8x32xf32>
    %188 = vector.extract_strided_slice %170 {offsets = [0, 64], sizes = [8, 32], strides = [1, 1]} : vector<8x96xf32> to vector<8x32xf32>
    %189 = arith.mulf %178, %188 : vector<8x32xf32>
    %190 = arith.addf %187, %189 : vector<8x32xf32>
    %191 = math.tanh %190 : vector<8x32xf32>
    %cst_58 = arith.constant 1.000000e+00 : f32
    %192 = vector.broadcast %cst_58 : f32 to vector<8x32xf32>
    %193 = arith.subf %192, %186 : vector<8x32xf32>
    %194 = arith.mulf %193, %191 : vector<8x32xf32>
    %195 = arith.mulf %186, %150 : vector<8x32xf32>
    %196 = arith.addf %194, %195 : vector<8x32xf32>
    %c2_i32 = arith.constant 2 : i32
    %cst_59 = arith.constant dense<0.000000e+00> : vector<8x512xf32>
    %197 = tpu.matmul %196, %99, %cst_59 {dimension_numbers = #tpu.dot_dimension_numbers<[1], [0], [0], [1], [0, 0, 1, 1], [], []>} : vector<8x32xf32>, vector<32x512xf32>, vector<8x512xf32> -> vector<8x512xf32>
    %198 = arith.mulf %83, %197 : vector<8x512xf32>
    %cst_60 = arith.constant dense<0.000000e+00> : vector<512xf32>
    %199 = vector.multi_reduction <add>, %198, %cst_60 [0] : vector<8x512xf32> to vector<512xf32>
    %200 = vector.shape_cast %199 : vector<512xf32> to vector<1x512xf32>
    %201 = vector.broadcast %200 : vector<1x512xf32> to vector<8x512xf32>
    %202 = arith.mulf %86, %201 : vector<8x512xf32>
    %cst_61 = arith.constant dense<0.000000e+00> : vector<8x32xf32>
    %203 = tpu.matmul %202, %59, %cst_61 {dimension_numbers = #tpu.dot_dimension_numbers<[1], [0], [0], [1], [0, 0, 1, 1], [], []>} : vector<8x512xf32>, vector<512x32xf32>, vector<8x32xf32> -> vector<8x32xf32>
    %cst_62 = arith.constant dense<0.000000e+00> : vector<8x128xf32>
    %204 = tpu.matmul %196, %101, %cst_62 {dimension_numbers = #tpu.dot_dimension_numbers<[1], [0], [0], [1], [0, 0, 1, 1], [], []>} : vector<8x32xf32>, vector<32x128xf32>, vector<8x128xf32> -> vector<8x128xf32>
    %205 = vector.extract_strided_slice %204 {offsets = [0, 0], sizes = [8, 32], strides = [1, 1]} : vector<8x128xf32> to vector<8x32xf32>
    %206 = arith.addf %203, %205 : vector<8x32xf32>
    %207 = vector.broadcast %100 : vector<1x32xf32> to vector<8x32xf32>
    %208 = arith.addf %206, %207 : vector<8x32xf32>
    %cst_63 = arith.constant 0.000000e+00 : f32
    %209 = vector.broadcast %cst_63 : f32 to vector<8x32xf32>
    %210 = arith.maximumf %208, %209 : vector<8x32xf32>
    %cst_64 = arith.constant dense<0.000000e+00> : vector<8x96xf32>
    %211 = tpu.matmul %210, %102, %cst_64 {dimension_numbers = #tpu.dot_dimension_numbers<[1], [0], [0], [1], [0, 0, 1, 1], [], []>} : vector<8x32xf32>, vector<32x96xf32>, vector<8x96xf32> -> vector<8x96xf32>
    %212 = vector.broadcast %103 : vector<1x96xf32> to vector<8x96xf32>
    %213 = arith.addf %211, %212 : vector<8x96xf32>
    %214 = vector.extract_strided_slice %204 {offsets = [0, 32], sizes = [8, 96], strides = [1, 1]} : vector<8x128xf32> to vector<8x96xf32>
    %215 = vector.broadcast %104 : vector<1x96xf32> to vector<8x96xf32>
    %216 = arith.addf %214, %215 : vector<8x96xf32>
    %217 = vector.extract_strided_slice %213 {offsets = [0, 0], sizes = [8, 32], strides = [1, 1]} : vector<8x96xf32> to vector<8x32xf32>
    %218 = vector.extract_strided_slice %216 {offsets = [0, 0], sizes = [8, 32], strides = [1, 1]} : vector<8x96xf32> to vector<8x32xf32>
    %219 = arith.addf %217, %218 : vector<8x32xf32>
    %220 = arith.negf %219 : vector<8x32xf32>
    %221 = math.exp %220 : vector<8x32xf32>
    %cst_65 = arith.constant 1.000000e+00 : f32
    %222 = vector.broadcast %cst_65 : f32 to vector<8x32xf32>
    %223 = arith.addf %222, %221 : vector<8x32xf32>
    %224 = arith.divf %222, %223 : vector<8x32xf32>
    %225 = vector.extract_strided_slice %213 {offsets = [0, 32], sizes = [8, 32], strides = [1, 1]} : vector<8x96xf32> to vector<8x32xf32>
    %226 = vector.extract_strided_slice %216 {offsets = [0, 32], sizes = [8, 32], strides = [1, 1]} : vector<8x96xf32> to vector<8x32xf32>
    %227 = arith.addf %225, %226 : vector<8x32xf32>
    %228 = arith.negf %227 : vector<8x32xf32>
    %229 = math.exp %228 : vector<8x32xf32>
    %cst_66 = arith.constant 1.000000e+00 : f32
    %230 = vector.broadcast %cst_66 : f32 to vector<8x32xf32>
    %231 = arith.addf %230, %229 : vector<8x32xf32>
    %232 = arith.divf %230, %231 : vector<8x32xf32>
    %233 = vector.extract_strided_slice %213 {offsets = [0, 64], sizes = [8, 32], strides = [1, 1]} : vector<8x96xf32> to vector<8x32xf32>
    %234 = vector.extract_strided_slice %216 {offsets = [0, 64], sizes = [8, 32], strides = [1, 1]} : vector<8x96xf32> to vector<8x32xf32>
    %235 = arith.mulf %224, %234 : vector<8x32xf32>
    %236 = arith.addf %233, %235 : vector<8x32xf32>
    %237 = math.tanh %236 : vector<8x32xf32>
    %cst_67 = arith.constant 1.000000e+00 : f32
    %238 = vector.broadcast %cst_67 : f32 to vector<8x32xf32>
    %239 = arith.subf %238, %232 : vector<8x32xf32>
    %240 = arith.mulf %239, %237 : vector<8x32xf32>
    %241 = arith.mulf %232, %196 : vector<8x32xf32>
    %242 = arith.addf %240, %241 : vector<8x32xf32>
    %c0_68 = arith.constant 0 : index
    %c0_69 = arith.constant 0 : index
    %243 = vector.load %arg16[%c0_68, %c0_69] : memref<32x32xf32, #tpu.memory_space<vmem>>, vector<32x32xf32>
    %cst_70 = arith.constant dense<0.000000e+00> : vector<8x32xf32>
    %244 = tpu.matmul %242, %243, %cst_70 {dimension_numbers = #tpu.dot_dimension_numbers<[1], [0], [0], [1], [0, 0, 1, 1], [], []>} : vector<8x32xf32>, vector<32x32xf32>, vector<8x32xf32> -> vector<8x32xf32>
    %c0_71 = arith.constant 0 : index
    %c0_72 = arith.constant 0 : index
    %245 = vector.load %arg17[%c0_71, %c0_72] : memref<1x32xf32, #tpu.memory_space<vmem>>, vector<1x32xf32>
    %246 = vector.broadcast %245 : vector<1x32xf32> to vector<8x32xf32>
    %247 = arith.addf %244, %246 : vector<8x32xf32>
    %cst_73 = arith.constant 0.000000e+00 : f32
    %248 = vector.broadcast %cst_73 : f32 to vector<8x32xf32>
    %249 = arith.maximumf %247, %248 : vector<8x32xf32>
    %c0_74 = arith.constant 0 : index
    %c0_75 = arith.constant 0 : index
    %250 = vector.load %arg18[%c0_74, %c0_75] : memref<32x128xf32, #tpu.memory_space<vmem>>, vector<32x128xf32>
    %cst_76 = arith.constant dense<0.000000e+00> : vector<8x128xf32>
    %251 = tpu.matmul %249, %250, %cst_76 {dimension_numbers = #tpu.dot_dimension_numbers<[1], [0], [0], [1], [0, 0, 1, 1], [], []>} : vector<8x32xf32>, vector<32x128xf32>, vector<8x128xf32> -> vector<8x128xf32>
    %c0_77 = arith.constant 0 : index
    %c0_78 = arith.constant 0 : index
    %252 = vector.load %arg19[%c0_77, %c0_78] : memref<1x128xf32, #tpu.memory_space<vmem>>, vector<1x128xf32>
    %253 = vector.broadcast %252 : vector<1x128xf32> to vector<8x128xf32>
    %254 = arith.addf %251, %253 : vector<8x128xf32>
    %c0_79 = arith.constant 0 : index
    %c0_80 = arith.constant 0 : index
    %c0_81 = arith.constant 0 : index
    %255 = vector.load %arg20[%c0_79, %c0_80, %c0_81] : memref<1x8x128xf32, #tpu.memory_space<vmem>>, vector<1x8x128xf32>
    %256 = vector.shape_cast %255 : vector<1x8x128xf32> to vector<8x128xf32>
    %257 = vector.shape_cast %254 : vector<8x128xf32> to vector<1x8x128xf32>
    tpu.vector_store %arg20[%c0_79, %c0_80, %c0_81], %257 {strides = array<i32>} : memref<1x8x128xf32, #tpu.memory_space<vmem>>, vector<1x8x128xf32>,
    return
  }
  func.func @transform_0(%arg0: i32) -> (i32, i32, i32) {
    %c0_i32 = arith.constant 0 : i32
    %c0_i32_0 = arith.constant 0 : i32
    %c0_i32_1 = arith.constant 0 : i32
    return %arg0, %c0_i32, %c0_i32_0 : i32, i32, i32
  }
  func.func @transform_1(%arg0: i32) -> (i32, i32, i32) {
    %c0_i32 = arith.constant 0 : i32
    %c0_i32_0 = arith.constant 0 : i32
    %c0_i32_1 = arith.constant 0 : i32
    return %arg0, %c0_i32, %c0_i32_0 : i32, i32, i32
  }
  func.func @transform_2(%arg0: i32) -> (i32, i32, i32) {
    %c0_i32 = arith.constant 0 : i32
    %c0_i32_0 = arith.constant 0 : i32
    %c0_i32_1 = arith.constant 0 : i32
    return %arg0, %c0_i32, %c0_i32_0 : i32, i32, i32
  }
  func.func @transform_3(%arg0: i32) -> (i32, i32, i32) {
    %c0_i32 = arith.constant 0 : i32
    %c0_i32_0 = arith.constant 0 : i32
    %c0_i32_1 = arith.constant 0 : i32
    return %arg0, %c0_i32, %c0_i32_0 : i32, i32, i32
  }
  func.func @transform_4(%arg0: i32) -> (i32, i32) {
    %c0_i32 = arith.constant 0 : i32
    %c0_i32_0 = arith.constant 0 : i32
    %c0_i32_1 = arith.constant 0 : i32
    return %c0_i32, %c0_i32_0 : i32, i32
  }
  func.func @transform_5(%arg0: i32) -> (i32, i32) {
    %c0_i32 = arith.constant 0 : i32
    %c0_i32_0 = arith.constant 0 : i32
    %c0_i32_1 = arith.constant 0 : i32
    return %c0_i32, %c0_i32_0 : i32, i32
  }
  func.func @transform_6(%arg0: i32) -> (i32, i32) {
    %c0_i32 = arith.constant 0 : i32
    %c0_i32_0 = arith.constant 0 : i32
    %c0_i32_1 = arith.constant 0 : i32
    return %c0_i32, %c0_i32_0 : i32, i32
  }
  func.func @transform_7(%arg0: i32) -> (i32, i32) {
    %c0_i32 = arith.constant 0 : i32
    %c0_i32_0 = arith.constant 0 : i32
    %c0_i32_1 = arith.constant 0 : i32
    return %c0_i32, %c0_i32_0 : i32, i32
  }
  func.func @transform_8(%arg0: i32) -> (i32, i32) {
    %c0_i32 = arith.constant 0 : i32
    %c0_i32_0 = arith.constant 0 : i32
    %c0_i32_1 = arith.constant 0 : i32
    return %c0_i32, %c0_i32_0 : i32, i32
  }
  func.func @transform_9(%arg0: i32) -> (i32, i32) {
    %c0_i32 = arith.constant 0 : i32
    %c0_i32_0 = arith.constant 0 : i32
    %c0_i32_1 = arith.constant 0 : i32
    return %c0_i32, %c0_i32_0 : i32, i32
  }
  func.func @transform_10(%arg0: i32) -> (i32, i32) {
    %c0_i32 = arith.constant 0 : i32
    %c0_i32_0 = arith.constant 0 : i32
    %c0_i32_1 = arith.constant 0 : i32
    return %c0_i32, %c0_i32_0 : i32, i32
  }
  func.func @transform_11(%arg0: i32) -> (i32, i32) {
    %c0_i32 = arith.constant 0 : i32
    %c0_i32_0 = arith.constant 0 : i32
    %c0_i32_1 = arith.constant 0 : i32
    return %c0_i32, %c0_i32_0 : i32, i32
  }
  func.func @transform_12(%arg0: i32) -> (i32, i32) {
    %c0_i32 = arith.constant 0 : i32
    %c0_i32_0 = arith.constant 0 : i32
    %c0_i32_1 = arith.constant 0 : i32
    return %c0_i32, %c0_i32_0 : i32, i32
  }
  func.func @transform_13(%arg0: i32) -> (i32, i32) {
    %c0_i32 = arith.constant 0 : i32
    %c0_i32_0 = arith.constant 0 : i32
    %c0_i32_1 = arith.constant 0 : i32
    return %c0_i32, %c0_i32_0 : i32, i32
  }
  func.func @transform_14(%arg0: i32) -> (i32, i32) {
    %c0_i32 = arith.constant 0 : i32
    %c0_i32_0 = arith.constant 0 : i32
    %c0_i32_1 = arith.constant 0 : i32
    return %c0_i32, %c0_i32_0 : i32, i32
  }
  func.func @transform_15(%arg0: i32) -> (i32, i32) {
    %c0_i32 = arith.constant 0 : i32
    %c0_i32_0 = arith.constant 0 : i32
    %c0_i32_1 = arith.constant 0 : i32
    return %c0_i32, %c0_i32_0 : i32, i32
  }
  func.func @transform_16(%arg0: i32) -> (i32, i32) {
    %c0_i32 = arith.constant 0 : i32
    %c0_i32_0 = arith.constant 0 : i32
    %c0_i32_1 = arith.constant 0 : i32
    return %c0_i32, %c0_i32_0 : i32, i32
  }
  func.func @transform_17(%arg0: i32) -> (i32, i32) {
    %c0_i32 = arith.constant 0 : i32
    %c0_i32_0 = arith.constant 0 : i32
    %c0_i32_1 = arith.constant 0 : i32
    return %c0_i32, %c0_i32_0 : i32, i32
  }
  func.func @transform_18(%arg0: i32) -> (i32, i32) {
    %c0_i32 = arith.constant 0 : i32
    %c0_i32_0 = arith.constant 0 : i32
    %c0_i32_1 = arith.constant 0 : i32
    return %c0_i32, %c0_i32_0 : i32, i32
  }
  func.func @transform_19(%arg0: i32) -> (i32, i32, i32) {
    %c0_i32 = arith.constant 0 : i32
    %c0_i32_0 = arith.constant 0 : i32
    %c0_i32_1 = arith.constant 0 : i32
    return %arg0, %c0_i32, %c0_i32_0 : i32, i32, i32
  }
}

</mosaic_0001>

<bundles_post_ra>
// kernel: mpnn_forward.1
= control target key start
LH: loop header
LB: loop body
LE: loop exit
PB: predicated region body
PF: predicated region fallthrough
CT: control target
= control target key end

     0   :  { %s5422_s0 = inlined_call_operand.vmem [shape: f32[4,8,16], index: 0, kind: input, shape index: {}]   ;;  %s5423_s1 = inlined_call_operand.vmem [shape: f32[4,16,1], index: 1, kind: input, shape index: {}]   ;;  %s5424_s2 = inlined_call_operand.vmem [shape: s32[4,1,16], index: 2, kind: input, shape index: {}]   ;;  %s5425_s3 = inlined_call_operand.vmem [shape: s32[4,1,16], index: 3, kind: input, shape index: {}]   ;;  %s5426_s4 = inlined_call_operand.vmem [shape: f32[16,32], index: 4, kind: input, shape index: {}]   ;;  %s5427_s5 = inlined_call_operand.vmem [shape: f32[1,32], index: 5, kind: input, shape index: {}]   ;;  %s5428_s6 = inlined_call_operand.vmem [shape: f32[1,128], index: 6, kind: input, shape index: {}]   ;;  %s5429_s7 = inlined_call_operand.vmem [shape: f32[1,128], index: 7, kind: input, shape index: {}]   ;;  %s5430_s8 = inlined_call_operand.hbm [shape: f32[128,1024], index: 8, kind: input, shape index: {}]   ;;  %s5431_s9 = inlined_call_operand.vmem [shape: f32[1,1024], index: 9, kind: input, shape index: {}]   ;;  %s5432_s10 = inlined_call_operand.vmem [shape: f32[1,32], index: 10, kind: input, shape index: {}]   ;;  %s5433_s11 = inlined_call_operand.vmem [shape: f32[32,128], index: 11, kind: input, shape index: {}]   ;;  %s5434_s12 = inlined_call_operand.vmem [shape: f32[32,96], index: 12, kind: input, shape index: {}]   ;;  %s5435_s13 = inlined_call_operand.vmem [shape: f32[1,96], index: 13, kind: input, shape index: {}]   ;;  %s5436_s14 = inlined_call_operand.vmem [shape: f32[1,96], index: 14, kind: input, shape index: {}]   ;;  %s5437_s15 = inlined_call_operand.vmem [shape: f32[32,32], index: 15, kind: input, shape index: {}]   ;;  %s5438_s16 = inlined_call_operand.vmem [shape: f32[1,32], index: 16, kind: input, shape index: {}]   ;;  %s5439_s17 = inlined_call_operand.vmem [shape: f32[32,128], index: 17, kind: input, shape index: {}]   ;;  %s5440_s18 = inlined_call_operand.vmem [shape: f32[1,128], index: 18, kind: input, shape index: {}]   ;;  %s5441_s19 = inlined_call_operand.hbm [shape: f32[4,8,128], index: 19, kind: output, shape index: {}]  }
   0x1   :  { %5587 = sst [smem:[#allocation88_spill]] %s5422_s0 }
   0x2   :  { %5588 = sst [smem:[#allocation89_spill]] %s5423_s1 }
   0x3   :  { %5589 = sst [smem:[#allocation90_spill]] %s5424_s2 }
   0x4   :  { %5590 = sst [smem:[#allocation91_spill]] %s5425_s3 }
   0x5   :  { %5591 = sst [smem:[#allocation92_spill]] %s5430_s8 }
   0x6   :  { %5592 = sst [smem:[#allocation93_spill]] %s5438_s16 }
   0x7   :  { %5593 = sst [smem:[#allocation94_spill]] %s5440_s18 }
   0x8   :  { %5594 = sst [smem:[#allocation95_spill]] %s5441_s19 }
   0x9   :  { %24 = vsyncpa [#allocation3], 0 }
   0xa   :  { %25 = vsyncpa [#allocation4], 0 }
   0xb   :  { %27 = vsyncpa [#allocation4 + $0x1], 0  ;;  %s4158_s0 = smov 0   ;;  %s4160_s30 = smov 0  }
   0xc   :  { %s4162_s20 = smov 0   ;;  %s4164_s21 = smov 0  }
   0xd LB: > { %5595 = sst [smem:[#allocation8_spill]] %s4029_s0  ;;  %s4179_s1 = sadd.s32 4294967295, %s4041_s21   ;;  %s4041_s21 = sphi %s4164_s21, %s5853_s21   ;;  %s4037_s20 = sphi %s4162_s20, %s5855_s20   ;;  %s4033_s30 = sphi %s4160_s30, %s5857_s30   ;;  %s4029_s0 = sphi %s4158_s0, %s5856_s0  }
   0xe   : > { %5596 = sst [smem:[#allocation9_spill]] %s4037_s20  ;;  %s3406_s22 = sadd.s32 4294967294, %s4041_s21  }
   0xf   : > { %5597 = sst [smem:[#allocation10_spill]] %s4041_s21  ;;  %s4183_s2 = sadd.s32 1, %s4041_s21  }
  0x10   : > { %5598 = sst [smem:[#allocation11_spill]] %s4179_s1  ;;  %s459_s23 = sadd.s32 1, %s4037_s20 }
  0x11   : > { %5599 = sst [smem:[#allocation12_spill]] %s4183_s2  ;;  %s456_s24 = ssub.s32 %s4041_s21, %s4183_s2 }
  0x12   : > { %p469_p0 = scmp.ne.s32.totalorder %s4037_s20, %s4033_s30  ;;  %p457_p1 = scmp.eq.s32.totalorder %s456_s24, 0 }
  0x13   : > { %p470_p2 = scmp.eq.s32.totalorder %s4179_s1, 3  ;;  %p475_p3 = scmp.ne.s32.totalorder %s4033_s30, %s4029_s0 }
  0x14   : > { %p476_p4 = scmp.eq.s32.totalorder %s3406_s22, 3  ;;  %p3407_p7 = scmp.ge.s32.totalorder %s4041_s21, 1 }
  0x15   : > { %s4194_s25 = scalar_select %p457_p1, %s4037_s20, %s459_s23  }
  0x16   : > { %p4196_p5 = por %p470_p2, %p469_p0  ;;  %p4200_p6 = por %p476_p4, %p475_p3 }
  0x17   : > { %5600 = sst [smem:[#allocation13_spill]] %s4194_s25  ;;  %p483_p8 = scmp.lt.s32.totalorder %s4041_s21, 5 }
  0x18   : > { %s5601_s3 = scalar_select %p4196_p5, 1, 0 }
  0x19   : > { %s5603_s26 = scalar_select %p4200_p6, 1, 0 }
  0x1a   : > { %5602 = sst [smem:[#allocation14_spill]] %s5601_s3  ;;  %p3877_p9 = scmp.eq.s32.totalorder %s4179_s1, 0 }
  0x1b   : > { %5604 = sst [smem:[#allocation15_spill]] %s5603_s26  ;;  %p4207_p10 = pnand %p3407_p7, %p483_p8 }
  0x1c   : > { %s4043_s28 = smov [#allocation2]  }
  0x1d   : > { %s507_s29 = sshll.u32 %s4043_s28, 4  ;;  %p3869_p11 = pneg %p4207_p10  ;;  %s508_s29 = int_to_ptr.vmem [resolvable:$true] %s507_s29 }
  0x1e   : > { %s3962_s22 = scalar_lea.vmem %s508_s29, 16384  ;;  %p3970_p3 = scmp.lt.s32.totalorder %s508_s29, %s508_s29 }
  0x1f   : > { %p3870_p12 = pnand %p3877_p9, %p3869_p11  ;;  %p3963_p0 = scmp.ne.s32.totalorder %s508_s29, %s3962_s22 }
  0x20   : > { %p3971_p4 = scmp.lt.s32.totalorder %s3962_s22, %s3962_s22 }
  0x21   : > { %p3953_p13 = pneg %p3870_p12 }
  0x22   : > { %p3972_p6 = por %p3971_p4, %p3970_p3 }
  0x23   : > { %p3965_p1 = pnand %p3963_p0, %p3953_p13 }
  0x25   : > { %p3966_p2 = pneg %p3965_p1 }
  0x27   : > { %p3973_p7 = pnand %p3972_p6, %p3966_p2 }
  0x29   : > { %3976 = shalt.err (!%p3973_p7)
}
  0x2a   : > { %s4044_s23 = smov 1024   ;;  %s4045_s24 = smov 64  }
  0x2b   : > { %s5606_s8 = sld [smem:[#allocation92_spill]] }
  0x2d   : > { %580 = sbr.rel (%p4207_p10) target bundleno = 3846 (0xf06), region = 96 }
  0x31   : > { %3872 = dma.hbm_to_vmem [thread:$0]  (!%p3870_p12), %s5606_s8, 16384, %s508_s29, [#allocation3], %s4044_s23, %s4044_s23, %s4045_s24  }
  0x32   : > { %4020 = dma.done.wait (%p3877_p9), [#allocation3], 16384  }
  0x33   : > { %4022 = vsyncadd (%p3877_p9), [#allocation3], 4294950912  ;;  %p646_p8 = scmp.lt.s32.totalorder %s4179_s1, 3  ;;  %v4046_v0 = vmov 0   ;;  %v5472_v1 = vmov 0.0   ;;  %v908_v2 = vlaneseq  ;;  %vm5455_vm0 = vmmov 0  }
  0x34   : > { %3926 = vset.pattern.permute.xlu0 %v4046_v0  ;;  %3768 = vmatprep.subr.mxu0 %v5472_v1  ;;  %s5607_s29 = sld [smem:[#allocation90_spill]]  ;;  %v663_v5 = vld [vmem:[%s5426_s4 + $0x8] sm:$0xff]  ;;  %v662_v6 = vld [vmem:[%s5426_s4] sm:$0xff]  ;;  %vm5454_vm1 = vcmask 130048   ;;  %v901_v11 = vld [vmem:[#allocation2 + $0x3d8] sm:$0xff]  ;;  %s4050_s16 = smov 64  }
  0x35   : > { %s4227_s20 = scalar_select %p646_p8, %s4179_s1, 3  ;;  %3772 = vmatprep.mubr.msk.f32.mxu0 %vm5455_vm0, %v5472_v1  ;;  %1012 = vmatprep.mubr.f32.mxu1 %v5472_v1  ;;  %v4242_v3 = vshrl.u32 %v908_v2, 7  ;;  %v899_v10 = vld [vmem:[#allocation2 + $0x3c8] sm:$0xff]  ;;  %v898_v13 = vld [vmem:[#allocation2 + $0x3c0] sm:$0xff]  ;;  %v900_v14 = vld [vmem:[#allocation2 + $0x3d0] sm:$0xff]  ;;  %vm5457_vm4 = vcmask 261120  }
  0x36   : > { %s5608_s8 = sld [smem:[#allocation89_spill]]  ;;  %3769 = vmatpush3.msra.mxu0 %v663_v5  ;;  %948 = vmatprep.subr.mxu1 %v899_v10  ;;  %v891_v15 = vld [vmem:[#allocation2 + $0x388] sm:$0xff]  ;;  %v893_v16 = vld [vmem:[#allocation2 + $0x398] sm:$0xff]  ;;  %v890_v17 = vld [vmem:[#allocation2 + $0x380] sm:$0xff]  ;;  %s4051_s1 = smov 16   ;;  %vm5453_vm5 = vcmask 392192  }
  0x37   : > { %s3514_s25 = sshll.u32 %s4227_s20, 4  ;;  %s3413_s26 = sshll.u32 %s4227_s20, 3  ;;  %3770 = vmatprep.subr.mxu0 %v5472_v1  ;;  %949 = vmatpush1.msra.mxu1 %v898_v13  ;;  %v892_v18 = vld [vmem:[#allocation2 + $0x390] sm:$0xff]  ;;  %v883_v19 = vld [vmem:[#allocation2 + $0x348] sm:$0xff]  ;;  %v885_v20 = vld [vmem:[#allocation2 + $0x358] sm:$0xff]  ;;  %vm5452_vm6 = vcmask 523264  }
  0x38   : > { %s5609_s19 = sld [smem:[#allocation88_spill]]  ;;  %3771 = vmatpush3.msra.mxu0 %v662_v6  ;;  %950 = vmatprep.subr.mxu1 %v891_v15  ;;  %v882_v21 = vld [vmem:[#allocation2 + $0x340] sm:$0xff]  ;;  %v884_v22 = vld [vmem:[#allocation2 + $0x350] sm:$0xff]  ;;  %v875_v23 = vld [vmem:[#allocation2 + $0x308] sm:$0xff]  ;;  %s4053_s3 = smov 112  }
  0x39   : > { %1025 = vmatprep.subr.mxu0 %v901_v11  ;;  %951 = vmatpush1.msra.mxu1 %v890_v17  ;;  %v877_v24 = vld [vmem:[#allocation2 + $0x318] sm:$0xff]  ;;  %v874_v25 = vld [vmem:[#allocation2 + $0x300] sm:$0xff]  ;;  %v876_v26 = vld [vmem:[#allocation2 + $0x310] sm:$0xff]  ;;  %s5610_s0 = sld [smem:[#allocation91_spill]] }
  0x3a   : > { %s657_s22 = scalar_lea.vmem %s5607_s29, %s4227_s20  ;;  %952 = vmatprep.subr.mxu1 %v883_v19  ;;  %v867_v27 = vld [vmem:[#allocation2 + $0x2c8] sm:$0xff]  ;;  %v869_v28 = vld [vmem:[#allocation2 + $0x2d8] sm:$0xff]  ;;  %v866_v29 = vld [vmem:[#allocation2 + $0x2c0] sm:$0xff]  ;;  %s5843_s24 = sld [smem:[#allocation11_spill]] }
  0x3b   : > { %v3420_v8 = vld [vmem:[%s657_s22] ss:$0 sm:$0xff]  ;;  %953 = vmatpush1.msra.mxu1 %v882_v21  ;;  %v868_v30 = vld [vmem:[#allocation2 + $0x2d0] sm:$0xff]  ;;  %v859_v31 = vld [vmem:[#allocation2 + $0x288] sm:$0xff]  ;;  %s5847_s28 = sld [smem:[#allocation94_spill]] }
  0x3c   : > { %s654_s2 = scalar_lea.vmem %s5608_s8, %s3514_s25  ;;  %vm1424_vm2 = vcmp.eq.s32.totalorder %v3420_v8, %v4242_v3  ;;  %s4049_s8 = smov 32   ;;  %954 = vmatprep.subr.mxu1 %v875_v23  ;;  %v861_v32 = vld [vmem:[#allocation2 + $0x298] sm:$0xff]  ;;  %v858_v33 = vld [vmem:[#allocation2 + $0x280] sm:$0xff]  ;;  %v860_v34 = vld [vmem:[#allocation2 + $0x290] sm:$0xff] }
  0x3d   : > { %v746_v4 = vld [vmem:[%s654_s2] sm:$0xff]  ;;  %v747_v9 = vld [vmem:[%s654_s2 + $0x8] sm:$0xff]  ;;  %v4256_v12 = vsel %vm1424_vm2, 1.0, %v5472_v1  ;;  %955 = vmatpush1.msra.mxu1 %v874_v25  ;;  %v853_v36 = vld [vmem:[#allocation2 + $0x258] sm:$0xff]  ;;  %s4052_s2 = smov 48   ;;  %s5848_s23 = sld [smem:[#allocation95_spill]] }
  0x3e   : > { %s649_s18 = scalar_lea.vmem %s5609_s19, %s3413_s26  ;;  %751 = vperm.xlu0 %3926, %v746_v4   ;;  %1445 = vrot.lane.b32.xlu1 %v4256_v12, %s4049_s8  ;;  %v851_v35 = vld [vmem:[#allocation2 + $0x248] sm:$0xff]  ;;  %v850_v37 = vld [vmem:[#allocation2 + $0x240] sm:$0xff]  ;;  %v852_v38 = vld [vmem:[#allocation2 + $0x250] sm:$0xff]  ;;  %s4054_s26 = smov 80  }
  0x3f   : > { %v661_v7 = vld [vmem:[%s649_s18] sm:$0xff]  ;;  %956 = vmatprep.subr.mxu1 %v867_v27  ;;  %v843_v39 = vld [vmem:[#allocation2 + $0x208] sm:$0xff]  ;;  %v845_v40 = vld [vmem:[#allocation2 + $0x218] sm:$0xff]  ;;  %s660_s21 = scalar_lea.vmem %s5610_s0, %s4227_s20  ;;  %s4055_s20 = smov 96  }
  0x40   : > { %3773 = vmatmul.mubr.msk.f32.vlgmr.msra.gmra.mxu0 %vm5454_vm1, %v661_v7  ;;  %957 = vmatpush1.msra.mxu1 %v866_v29  ;;  %v842_v41 = vld [vmem:[#allocation2 + $0x200] sm:$0xff]  ;;  %v844_v42 = vld [vmem:[#allocation2 + $0x210] sm:$0xff]  ;;  %v835_v43 = vld [vmem:[#allocation2 + $0x1c8] sm:$0xff]  ;;  %s5844_s19 = sld [smem:[#allocation93_spill]] }
  0x41   : > { %1026 = vmatpush1.msra.mxu0 %v900_v14  ;;  %958 = vmatprep.subr.mxu1 %v859_v31  ;;  %v837_v44 = vld [vmem:[#allocation2 + $0x1d8] sm:$0xff]  ;;  %v834_v45 = vld [vmem:[#allocation2 + $0x1c0] sm:$0xff]  ;;  %v836_v46 = vld [vmem:[#allocation2 + $0x1d0] sm:$0xff] }
  0x42   : > { %756 = vperm.xlu0 %3926, %v747_v9   ;;  %1027 = vmatprep.subr.mxu0 %v893_v16  ;;  %v827_v47 = vld [vmem:[#allocation2 + $0x188] sm:$0xff]  ;;  %v829_v48 = vld [vmem:[#allocation2 + $0x198] sm:$0xff]  ;;  %v826_v49 = vld [vmem:[#allocation2 + $0x180] sm:$0xff] }
  0x43   : > { %1451 = vrot.lane.b32.xlu1 %v4256_v12, %s4050_s16  ;;  %1028 = vmatpush1.msra.mxu0 %v892_v18  ;;  %v828_v50 = vld [vmem:[#allocation2 + $0x190] sm:$0xff]  ;;  %v819_v51 = vld [vmem:[#allocation2 + $0x148] sm:$0xff]  ;;  %v821_v52 = vld [vmem:[#allocation2 + $0x158] sm:$0xff] }
  0x44   : > { %1029 = vmatprep.subr.mxu0 %v885_v20  ;;  %959 = vmatpush1.msra.mxu1 %v858_v33  ;;  %v818_v53 = vld [vmem:[#allocation2 + $0x140] sm:$0xff]  ;;  %v820_v54 = vld [vmem:[#allocation2 + $0x150] sm:$0xff]  ;;  %v811_v55 = vld [vmem:[#allocation2 + $0x108] sm:$0xff] }
  0x45   : > { %1030 = vmatpush1.msra.mxu0 %v884_v22  ;;  %960 = vmatprep.subr.mxu1 %v851_v35  ;;  %v813_v56 = vld [vmem:[#allocation2 + $0x118] sm:$0xff]  ;;  %v810_v57 = vld [vmem:[#allocation2 + $0x100] sm:$0xff]  ;;  %v812_v58 = vld [vmem:[#allocation2 + $0x110] sm:$0xff] }
  0x46   : > { %1031 = vmatprep.subr.mxu0 %v877_v24  ;;  %961 = vmatpush1.msra.mxu1 %v850_v37  ;;  %v803_v59 = vld [vmem:[#allocation2 + $0xc8] sm:$0xff]  ;;  %v805_v60 = vld [vmem:[#allocation2 + $0xd8] sm:$0xff]  ;;  %v802_v61 = vld [vmem:[#allocation2 + $0xc0] sm:$0xff] }
  0x47   : > { %1032 = vmatpush1.msra.mxu0 %v876_v26  ;;  %962 = vmatprep.subr.mxu1 %v843_v39  ;;  %v804_v62 = vld [vmem:[#allocation2 + $0xd0] sm:$0xff]  ;;  %v795_v63 = vld [vmem:[#allocation2 + $0x88] sm:$0xff]  ;;  %v797_v0 = vld [vmem:[#allocation2 + $0x98] sm:$0xff] }
  0x48   : > { %1033 = vmatprep.subr.mxu0 %v869_v28  ;;  %963 = vmatpush1.msra.mxu1 %v842_v41  ;;  %v794_v4 = vld [vmem:[#allocation2 + $0x80] sm:$0xff]  ;;  %v796_v5 = vld [vmem:[#allocation2 + $0x90] sm:$0xff]  ;;  %v787_v6 = vld [vmem:[#allocation2 + $0x48] sm:$0xff] }
  0x49   : > { %1034 = vmatpush1.msra.mxu0 %v868_v30  ;;  %964 = vmatprep.subr.mxu1 %v835_v43  ;;  %v789_v7 = vld [vmem:[#allocation2 + $0x58] sm:$0xff]  ;;  %v3422_v8 = vld [vmem:[%s660_s21] ss:$0 sm:$0xff]  ;;  %v788_v10 = vld [vmem:[#allocation2 + $0x50] sm:$0xff]  ;;  %s643_s21 = sand.u32 1, %s4033_s30  }
  0x4a   : > { %1035 = vmatprep.subr.mxu0 %v861_v32  ;;  %965 = vmatpush1.msra.mxu1 %v834_v45  ;;  %v786_v9 = vld [vmem:[#allocation2 + $0x40] sm:$0xff]  ;;  %v779_v11 = vld [vmem:[#allocation2 + $0x8] sm:$0xff]  ;;  %v781_v13 = vld [vmem:[#allocation2 + $0x18] sm:$0xff]  ;;  %vm1431_vm3 = vcmp.eq.s32.totalorder %v3422_v8, %v4242_v3  ;;  %s3292_s18 = scalar_lea.sflag [#allocation4], %s643_s21 }
  0x4b   : > { %1036 = vmatpush1.msra.mxu0 %v860_v34  ;;  %966 = vmatprep.subr.mxu1 %v827_v47  ;;  %v778_v14 = vld [vmem:[#allocation2] sm:$0xff]  ;;  %v780_v15 = vld [vmem:[#allocation2 + $0x10] sm:$0xff]  ;;  %v903_v16 = vld [vmem:[#allocation2 + $0x3e8] sm:$0xff]  ;;  %v4273_v18 = vsel %vm1431_vm3, 1.0, %v5472_v1 }
  0x4c   : > { %1037 = vmatprep.subr.mxu0 %v853_v36  ;;  %967 = vmatpush1.msra.mxu1 %v826_v49  ;;  %v905_v17 = vld [vmem:[#allocation2 + $0x3f8] sm:$0xff]  ;;  %v1434_v19 = vsel %vm5454_vm1, %v4273_v18, 0.0  ;;  %v3418_v20 = vld [vmem:[%s5428_s6] ss:$0 sm:$0xff]  ;;  %v904_v29 = vld [vmem:[#allocation2 + $0x3f0] sm:$0xff] }
  0x4d   : > { %1038 = vmatpush1.msra.mxu0 %v852_v38  ;;  %968 = vmatprep.subr.mxu1 %v819_v51  ;;  %v3419_v21 = vld [vmem:[%s5429_s7] ss:$0 sm:$0xff]  ;;  %v895_v30 = vld [vmem:[#allocation2 + $0x3a8] sm:$0xff]  ;;  %v897_v31 = vld [vmem:[#allocation2 + $0x3b8] sm:$0xff] }
  0x4e   : > { %1039 = vmatprep.subr.mxu0 %v845_v40  ;;  %969 = vmatpush1.msra.mxu1 %v818_v53  ;;  %v902_v28 = vld [vmem:[#allocation2 + $0x3e0] sm:$0xff]  ;;  %v896_v34 = vld [vmem:[#allocation2 + $0x3b0] sm:$0xff]  ;;  %v887_v36 = vld [vmem:[#allocation2 + $0x368] sm:$0xff] }
  0x4f   : > { %1040 = vmatpush1.msra.mxu0 %v844_v42  ;;  %970 = vmatprep.subr.mxu1 %v811_v55  ;;  %v894_v33 = vld [vmem:[#allocation2 + $0x3a0] sm:$0xff]  ;;  %v889_v37 = vld [vmem:[#allocation2 + $0x378] sm:$0xff]  ;;  %v888_v39 = vld [vmem:[#allocation2 + $0x370] sm:$0xff] }
  0x50   : > { %1041 = vmatprep.subr.mxu0 %v837_v44  ;;  %971 = vmatpush1.msra.mxu1 %v810_v57  ;;  %v886_v38 = vld [vmem:[#allocation2 + $0x360] sm:$0xff]  ;;  %v879_v40 = vld [vmem:[#allocation2 + $0x328] sm:$0xff]  ;;  %v881_v41 = vld [vmem:[#allocation2 + $0x338] sm:$0xff] }
  0x51   : > { %1042 = vmatpush1.msra.mxu0 %v836_v46  ;;  %972 = vmatprep.subr.mxu1 %v803_v59  ;;  %v878_v42 = vld [vmem:[#allocation2 + $0x320] sm:$0xff]  ;;  %v880_v43 = vld [vmem:[#allocation2 + $0x330] sm:$0xff]  ;;  %v871_v44 = vld [vmem:[#allocation2 + $0x2e8] sm:$0xff]  ;;  %v1512_v59 = vadd.s32 24, %v4242_v3 }
  0x52   : > { %1043 = vmatprep.subr.mxu0 %v829_v48  ;;  %973 = vmatpush1.msra.mxu1 %v802_v61  ;;  %v873_v45 = vld [vmem:[#allocation2 + $0x2f8] sm:$0xff]  ;;  %v870_v46 = vld [vmem:[#allocation2 + $0x2e0] sm:$0xff]  ;;  %v872_v47 = vld [vmem:[#allocation2 + $0x2f0] sm:$0xff] }
  0x53   : > { %1044 = vmatpush1.msra.mxu0 %v828_v50  ;;  %1442 = vrot.lane.b32.xlu0 %v4256_v12, %s4051_s1  ;;  %v863_v48 = vld [vmem:[#allocation2 + $0x2a8] sm:$0xff]  ;;  %v865_v49 = vld [vmem:[#allocation2 + $0x2b8] sm:$0xff]  ;;  %v862_v50 = vld [vmem:[#allocation2 + $0x2a0] sm:$0xff] }
  0x54   : > { %1045 = vmatprep.subr.mxu0 %v821_v52  ;;  %974 = vmatprep.subr.mxu1 %v795_v63  ;;  %v864_v51 = vld [vmem:[#allocation2 + $0x2b0] sm:$0xff]  ;;  %v855_v52 = vld [vmem:[#allocation2 + $0x268] sm:$0xff]  ;;  %v857_v53 = vld [vmem:[#allocation2 + $0x278] sm:$0xff] }
  0x55   : > { %1046 = vmatpush1.msra.mxu0 %v820_v54  ;;  %975 = vmatpush1.msra.mxu1 %v794_v4  ;;  %v854_v54 = vld [vmem:[#allocation2 + $0x260] sm:$0xff]  ;;  %v856_v55 = vld [vmem:[#allocation2 + $0x270] sm:$0xff]  ;;  %v849_v57 = vld [vmem:[#allocation2 + $0x238] sm:$0xff] }
  0x56   : > { %1047 = vmatprep.subr.mxu0 %v813_v56  ;;  %976 = vmatprep.subr.mxu1 %v787_v6  ;;  %v847_v56 = vld [vmem:[#allocation2 + $0x228] sm:$0xff]  ;;  %v848_v61 = vld [vmem:[#allocation2 + $0x230] sm:$0xff] }
  0x57   : > { %1048 = vmatpush1.msra.mxu0 %v812_v58  ;;  %977 = vmatpush1.msra.mxu1 %v786_v9  ;;  %v839_v63 = vld [vmem:[#allocation2 + $0x1e8] sm:$0xff]  ;;  %v840_v6 = vld [vmem:[#allocation2 + $0x1f0] sm:$0xff] }
  0x58   : > { %1049 = vmatprep.subr.mxu0 %v805_v60  ;;  %1448 = vrot.lane.b32.xlu0 %v4256_v12, %s4052_s2  ;;  %v846_v60 = vld [vmem:[#allocation2 + $0x220] sm:$0xff]  ;;  %v831_v9 = vld [vmem:[#allocation2 + $0x1a8] sm:$0xff] }
  0x59   : > { %1050 = vmatpush1.msra.mxu0 %v804_v62  ;;  %978 = vmatprep.subr.mxu1 %v779_v11  ;;  %v1536_v11 = vadd.s32 1, %v1512_v59 }
  0x5a   : > { %1051 = vmatprep.subr.mxu0 %v797_v0  ;;  %979 = vmatpush1.msra.mxu1 %v778_v14  ;;  %v841_v0 = vld [vmem:[#allocation2 + $0x1f8] sm:$0xff]  ;;  %v832_v14 = vld [vmem:[#allocation2 + $0x1b0] sm:$0xff] }
  0x5b   : > { %1052 = vmatpush1.msra.mxu0 %v796_v5  ;;  %1089 = vmatprep.mubr.f32.mxu0 %v5472_v1  ;;  %v838_v5 = vld [vmem:[#allocation2 + $0x1e0] sm:$0xff] }
  0x5c   : > { %1053 = vmatprep.subr.mxu0 %v789_v7  ;;  %1102 = vmatprep.subr.mxu1 %v903_v16  ;;  %v4304_v7 = vand.u32 127, %v908_v2  ;;  %v823_v2 = vld [vmem:[#allocation2 + $0x168] sm:$0xff]  ;;  %v825_v16 = vld [vmem:[#allocation2 + $0x178] sm:$0xff] }
  0x5d   : > { %1054 = vmatpush1.msra.mxu0 %v788_v10  ;;  %1460 = vrot.lane.b32.xlu0 %v4256_v12, %s4053_s3  ;;  %v833_v10 = vld [vmem:[#allocation2 + $0x1b8] sm:$0xff] }
  0x5e   : > { %1055 = vmatprep.subr.mxu0 %v781_v13  ;;  %v1511_v13 = vadd.s32 16, %v4242_v3 }
  0x5f   : > { %1056 = vmatpush1.msra.mxu0 %v780_v15 }
  0x60   : > { %1179 = vmatprep.subr.mxu0 %v905_v17 }
  0x67   : > { %1435 = vadd.xlane.f32.xlu1 %v1434_v19 }
  0x78   : > { %1454 = vrot.lane.b32.xlu1 %v4256_v12, %s4054_s26 }
  0x7c   : > { %1457 = vrot.lane.b32.xlu1 %v4256_v12, %s4055_s20 }
  0xb0   : > { %v1446_v58 = vpop.permute.xlu1 %1445 }
  0xb5   : > { %v1452_v17 = vpop.permute.xlu1 %1451 }
  0xb9   : > { %v752_v22 = vpop.permute.xlu0 %751 }
  0xba   : > { %v765_v23 = vmul.f32 %v3418_v20, %v752_v22  ;;  %v4310_v22 = vadd.s32 128, %v4304_v7 }
  0xbc   : > { %v774_v24 = vadd.f32 %v3419_v21, %v765_v23  ;;  %v4312_v23 = vmul.u32 16, %v1512_v59  ;;  %v5615_v59 = vmov 0 }
  0xbd   : > { %v757_v25 = vpop.permute.xlu0 %756 }
  0xbe   : > { %v4290_v26 = vmax.f32 %v774_v24, 0.0  ;;  %v766_v27 = vmul.f32 %v3418_v20, %v757_v25  ;;  %v822_v20 = vld [vmem:[#allocation2 + $0x160] sm:$0xff]  ;;  %v815_v25 = vld [vmem:[#allocation2 + $0x128] sm:$0xff]  ;;  %vm1530_vm7 = vcmp.ge.s32.totalorder %v4310_v22, %v4312_v23  ;;  %vm1529_vm11 = vcmp.ge.s32.totalorder %v4304_v7, %v4312_v23 }
  0xc0   : > { %v775_v32 = vadd.f32 %v3419_v21, %v766_v27  ;;  %1013 = vmatmul.mubr.f32.vlgmr.msra.gmra.mxu1 %v4290_v26  ;;  %1090 = vmatmul.mubr.f32.vlgmr.msra.gmra.mxu0 %v4290_v26  ;;  %v824_v21 = vld [vmem:[#allocation2 + $0x170] sm:$0xff]  ;;  %v817_v27 = vld [vmem:[#allocation2 + $0x138] sm:$0xff] }
  0xc1   : > { %1103 = vmatpush1.msra.mxu1 %v902_v28  ;;  %1180 = vmatpush1.msra.mxu0 %v904_v29  ;;  %v4317_v28 = vmul.u32 16, %v1536_v11  ;;  %v1535_v29 = vadd.s32 1, %v1511_v13  ;;  %v5636_v11 = vmov 0 }
  0xc2   : > { %v4294_v35 = vmax.f32 %v775_v32, 0.0  ;;  %1104 = vmatprep.subr.mxu1 %v895_v30  ;;  %1181 = vmatprep.subr.mxu0 %v897_v31  ;;  %v1510_v30 = vadd.s32 8, %v4242_v3  ;;  %v814_v31 = vld [vmem:[#allocation2 + $0x120] sm:$0xff]  ;;  %v816_v32 = vld [vmem:[#allocation2 + $0x130] sm:$0xff] }
  0xc3   : > { %1105 = vmatpush1.msra.mxu1 %v894_v33  ;;  %1182 = vmatpush1.msra.mxu0 %v896_v34  ;;  %v4321_v33 = vadd.s32 384, %v4304_v7  ;;  %v807_v34 = vld [vmem:[#allocation2 + $0xe8] sm:$0xff]  ;;  %vm1554_vm8 = vcmp.lt.s32.totalorder %v4310_v22, %v4317_v28  ;;  %vm1553_vm12 = vcmp.lt.s32.totalorder %v4304_v7, %v4317_v28 }
  0xc4   : > { %1018 = vmatprep.mubr.f32.mxu1 %v5472_v1  ;;  %1095 = vmatprep.mubr.f32.mxu0 %v5472_v1  ;;  %vm4346_vm13 = vmand %vm1530_vm7, %vm1554_vm8 }
  0xc5   : > { %1106 = vmatprep.subr.mxu1 %v887_v36  ;;  %1183 = vmatprep.subr.mxu0 %v889_v37  ;;  %v1443_v62 = vpop.permute.xlu0 %1442  ;;  %v809_v36 = vld [vmem:[#allocation2 + $0xf8] sm:$0xff]  ;;  %v806_v37 = vld [vmem:[#allocation2 + $0xe0] sm:$0xff]  ;;  %vm1532_vm9 = vcmp.ge.s32.totalorder %v4321_v33, %v4312_v23  ;;  %vm1556_vm10 = vcmp.lt.s32.totalorder %v4321_v33, %v4317_v28  ;;  %vm4374_vm8 = vmand %vm1529_vm11, %vm1553_vm12 }
  0xc6   : > { %1019 = vmatmul.mubr.f32.gmra.mxu1 %v4294_v35  ;;  %1096 = vmatmul.mubr.f32.gmra.mxu0 %v4294_v35  ;;  %v1463_v4 = vsel %vm5454_vm1, %v4256_v12, %v1443_v62  ;;  %v830_v12 = vld [vmem:[#allocation2 + $0x1a0] sm:$0xff]  ;;  %vm4360_vm2 = vmand %vm1532_vm9, %vm1556_vm10  ;;  %v5616_v59 = vsel %vm4374_vm8, 4294967295, %v5615_v59  ;;  %v5619_v62 = vmov 0 }
  0xc7   : > { %1107 = vmatpush1.msra.mxu1 %v886_v38  ;;  %1184 = vmatpush1.msra.mxu0 %v888_v39  ;;  %v1465_v8 = vsel %vm5457_vm4, %v1463_v4, %v1446_v58  ;;  %v808_v38 = vld [vmem:[#allocation2 + $0xf0] sm:$0xff]  ;;  %v4326_v39 = vadd.s32 256, %v4304_v7  ;;  %v782_v58 = vld [vmem:[#allocation2 + $0x20] sm:$0xff] }
  0xc8   : > { %1108 = vmatprep.subr.mxu1 %v879_v40  ;;  %1185 = vmatprep.subr.mxu0 %v881_v41  ;;  %v799_v40 = vld [vmem:[#allocation2 + $0xa8] sm:$0xff]  ;;  %v801_v41 = vld [vmem:[#allocation2 + $0xb8] sm:$0xff] }
  0xc9   : > { %1109 = vmatpush1.msra.mxu1 %v878_v42  ;;  %1186 = vmatpush1.msra.mxu0 %v880_v43  ;;  %v4330_v42 = vmul.u32 16, %v1511_v13  ;;  %v1539_v43 = vmul.u32 16, %v1535_v29  ;;  %vm1531_vm14 = vcmp.ge.s32.totalorder %v4326_v39, %v4312_v23  ;;  %vm1555_vm15 = vcmp.lt.s32.totalorder %v4326_v39, %v4317_v28  ;;  %v4595_v28 = vld [vmem:[%s5433_s11] sm:$0xff] }
  0xca   : > { %1110 = vmatprep.subr.mxu1 %v871_v44  ;;  %1187 = vmatprep.subr.mxu0 %v873_v45  ;;  %v1449_v15 = vpop.permute.xlu0 %1448  ;;  %v1534_v44 = vadd.s32 1, %v1510_v30  ;;  %v798_v45 = vld [vmem:[#allocation2 + $0xa0] sm:$0xff]  ;;  %v5645_v13 = vmov 0  ;;  %5658 = vst [vmem:[#allocation23_spill] sm:$0xff] %v4595_v28  ;;  %v910_v29 = vsub.s32 0, %v4242_v3 }
  0xcb   : > { %1111 = vmatpush1.msra.mxu1 %v870_v46  ;;  %1188 = vmatpush1.msra.mxu0 %v872_v47  ;;  %v1467_v19 = vsel %vm5453_vm5, %v1465_v8, %v1449_v15  ;;  %v800_v46 = vld [vmem:[#allocation2 + $0xb0] sm:$0xff]  ;;  %v791_v47 = vld [vmem:[#allocation2 + $0x68] sm:$0xff]  ;;  %vm1526_vm3 = vcmp.ge.s32.totalorder %v4310_v22, %v4330_v42  ;;  %vm1550_vm7 = vcmp.lt.s32.totalorder %v4310_v22, %v1539_v43  ;;  %v5470_v8 = vmov 1.0  }
  0xcc   : > { %1112 = vmatprep.subr.mxu1 %v863_v48  ;;  %1189 = vmatprep.subr.mxu0 %v865_v49  ;;  %v4315_v24 = vsel %vm5452_vm6, %v1467_v19, %v1452_v17  ;;  %v793_v48 = vld [vmem:[#allocation2 + $0x78] sm:$0xff]  ;;  %v790_v49 = vld [vmem:[#allocation2 + $0x60] sm:$0xff]  ;;  %vm1528_vm9 = vcmp.ge.s32.totalorder %v4321_v33, %v4330_v42  ;;  %vm1552_vm10 = vcmp.lt.s32.totalorder %v4321_v33, %v1539_v43  ;;  %vm4387_vm6 = vmand %vm1531_vm14, %vm1555_vm15 }
  0xcd   : > { %1113 = vmatpush1.msra.mxu1 %v862_v50  ;;  %1190 = vmatpush1.msra.mxu0 %v864_v51  ;;  %v792_v50 = vld [vmem:[#allocation2 + $0x70] sm:$0xff]  ;;  %v5611_v51 = vmov 0  ;;  %vm1525_vm11 = vcmp.ge.s32.totalorder %v4304_v7, %v4330_v42  ;;  %vm1549_vm12 = vcmp.lt.s32.totalorder %v4304_v7, %v1539_v43  ;;  %vm4399_vm5 = vmand %vm1526_vm3, %vm1550_vm7  ;;  %vm1527_vm14 = vcmp.ge.s32.totalorder %v4326_v39, %v4330_v42  ;;  %v3416_v17 = vld [vmem:[%s5427_s5] ss:$0 sm:$0xff] }
  0xce   : > { %1114 = vmatprep.subr.mxu1 %v855_v52  ;;  %1191 = vmatprep.subr.mxu0 %v857_v53  ;;  %v5612_v51 = vsel %vm4346_vm13, 4294967295, %v5611_v51  ;;  %v1514_v52 = vmul.u32 16, %v1510_v30  ;;  %v783_v53 = vld [vmem:[#allocation2 + $0x28] sm:$0xff]  ;;  %v5620_v62 = vsel %vm4399_vm5, 4294967295, %v5619_v62  ;;  %vm1551_vm15 = vcmp.lt.s32.totalorder %v4326_v39, %v1539_v43  ;;  %vm4410_vm1 = vmand %vm1528_vm9, %vm1552_vm10 }
  0xcf   : > { %1115 = vmatpush1.msra.mxu1 %v854_v54  ;;  %1192 = vmatpush1.msra.mxu0 %v856_v55  ;;  %v785_v54 = vld [vmem:[#allocation2 + $0x38] sm:$0xff]  ;;  %v5613_v55 = vmov 0  ;;  %vm4423_vm0 = vmand %vm1525_vm11, %vm1549_vm12  ;;  %v918_v30 = vsub.s32 2, %v4242_v3 }
  0xd0   : > { %1116 = vmatprep.subr.mxu1 %v847_v56  ;;  %1193 = vmatprep.subr.mxu0 %v849_v57  ;;  %v5614_v55 = vsel %vm4360_vm2, 4294967295, %v5613_v55  ;;  %v1538_v56 = vmul.u32 16, %v1534_v44  ;;  %v1533_v57 = vadd.s32 1, %v4242_v3  ;;  %vm1522_vm3 = vcmp.ge.s32.totalorder %v4310_v22, %v1514_v52  ;;  %vm4436_vm4 = vmand %vm1527_vm14, %vm1551_vm15 }
  0xd1   : > { %1117 = vmatpush1.msra.mxu1 %v846_v60  ;;  %1194 = vmatpush1.msra.mxu0 %v848_v61  ;;  %v784_v60 = vld [vmem:[#allocation2 + $0x30] sm:$0xff]  ;;  %v5617_v61 = vmov 0  ;;  %vm5629_vm11 = vcmp.ge.s32.totalorder %v4321_v33, %v1514_v52  ;;  %vm5632_vm14 = vcmp.ge.s32.totalorder %v4304_v7, %v1514_v52 }
  0xd2   : > { %1118 = vmatprep.subr.mxu1 %v839_v63  ;;  %1195 = vmatprep.subr.mxu0 %v841_v0  ;;  %v5618_v61 = vsel %vm4387_vm6, 4294967295, %v5617_v61  ;;  %vm1546_vm7 = vcmp.lt.s32.totalorder %v4310_v22, %v1538_v56  ;;  %v1513_v0 = vmul.u32 16, %v4242_v3  ;;  %v1537_v4 = vmul.u32 16, %v1533_v57 }
  0xd3   : > { %1119 = vmatpush1.msra.mxu1 %v838_v5  ;;  %1196 = vmatpush1.msra.mxu0 %v840_v6  ;;  %vm1548_vm10 = vcmp.lt.s32.totalorder %v4321_v33, %v1538_v56  ;;  %v5625_v6 = vmov 0  ;;  %vm1545_vm12 = vcmp.lt.s32.totalorder %v4304_v7, %v1538_v56  ;;  %vm4448_vm9 = vmand %vm1522_vm3, %vm1546_vm7  ;;  %vm1547_vm15 = vcmp.lt.s32.totalorder %v4326_v39, %v1538_v56 }
  0xd4   : > { %1120 = vmatprep.subr.mxu1 %v831_v9  ;;  %1197 = vmatprep.subr.mxu0 %v833_v10  ;;  %v5626_v6 = vsel %vm4436_vm4, 4294967295, %v5625_v6  ;;  %vm4462_vm4 = vmand %vm5629_vm11, %vm1548_vm10  ;;  %vm1518_vm3 = vcmp.ge.s32.totalorder %v4310_v22, %v1513_v0  ;;  %vm1542_vm7 = vcmp.lt.s32.totalorder %v4310_v22, %v1537_v4  ;;  %vm1520_vm10 = vcmp.ge.s32.totalorder %v4321_v33, %v1513_v0 }
  0xd5   : > { %1121 = vmatpush1.msra.mxu1 %v830_v12  ;;  %1198 = vmatpush1.msra.mxu0 %v832_v14  ;;  %vm1544_vm11 = vcmp.lt.s32.totalorder %v4321_v33, %v1537_v4  ;;  %v5648_v12 = vmov 0  ;;  %v938_v57 = vsub.s32 7, %v4242_v3 }
  0xd6   : > { %1122 = vmatprep.subr.mxu1 %v823_v2  ;;  %1199 = vmatprep.subr.mxu0 %v825_v16 }
  0xd7   : > { %1123 = vmatpush1.msra.mxu1 %v822_v20  ;;  %1200 = vmatpush1.msra.mxu0 %v824_v21 }
  0xd8   : > { %1124 = vmatprep.subr.mxu1 %v815_v25  ;;  %1201 = vmatprep.subr.mxu0 %v817_v27  ;;  %v4564_v27 = vld [vmem:[%s5433_s11 + $0x18] sm:$0xff] }
  0xd9   : > { %1125 = vmatpush1.msra.mxu1 %v814_v31  ;;  %1202 = vmatpush1.msra.mxu0 %v816_v32  ;;  %5652 = vst [vmem:[#allocation20_spill] sm:$0xff] %v4564_v27  ;;  %v906_v31 = vld [vmem:[%s5431_s9] sm:$0xff] }
  0xda   : > { %1126 = vmatprep.subr.mxu1 %v807_v34  ;;  %1203 = vmatprep.subr.mxu0 %v809_v36  ;;  %v911_v32 = vrot.slane %v906_v31, %v910_v29  ;;  %v919_v33 = vrot.slane %v906_v31, %v918_v30  ;;  %v922_v34 = vsub.s32 3, %v4242_v3 }
  0xdb   : > { %1127 = vmatpush1.msra.mxu1 %v806_v37  ;;  %1204 = vmatpush1.msra.mxu0 %v808_v38 }
  0xdc   : > { %1128 = vmatprep.subr.mxu1 %v799_v40  ;;  %1205 = vmatprep.subr.mxu0 %v801_v41  ;;  %v914_v40 = vsub.s32 1, %v4242_v3  ;;  %v923_v41 = vrot.slane %v906_v31, %v922_v34 }
  0xdd   : > { %1129 = vmatpush1.msra.mxu1 %v798_v45  ;;  %1206 = vmatpush1.msra.mxu0 %v800_v46 }
  0xde   : > { %1130 = vmatprep.subr.mxu1 %v791_v47  ;;  %1207 = vmatprep.subr.mxu0 %v793_v48  ;;  %v915_v43 = vrot.slane %v906_v31, %v914_v40 }
  0xdf   : > { %1131 = vmatpush1.msra.mxu1 %v790_v49  ;;  %1208 = vmatpush1.msra.mxu0 %v792_v50 }
  0xe0   : > { %1132 = vmatprep.subr.mxu1 %v783_v53  ;;  %1209 = vmatprep.subr.mxu0 %v785_v54 }
  0xe1   : > { %1133 = vmatpush1.msra.mxu1 %v782_v58  ;;  %1166 = vmatprep.mubr.f32.mxu1 %v5472_v1 }
  0xe2   : > { %1210 = vmatpush1.msra.mxu0 %v784_v60  ;;  %1243 = vmatprep.mubr.f32.mxu0 %v5472_v1  ;;  %v934_v60 = vsub.s32 6, %v4242_v3 }
  0xe3   : > { %1167 = vmatmul.mubr.f32.vlgmr.msra.gmra.mxu1 %v4290_v26  ;;  %1244 = vmatmul.mubr.f32.vlgmr.msra.gmra.mxu0 %v4290_v26 }
  0xe4   : > { %1172 = vmatprep.mubr.f32.mxu1 %v5472_v1  ;;  %1249 = vmatprep.mubr.f32.mxu0 %v5472_v1 }
  0xe5   : > { %3440 = vmatprep.subr.msk.mxu1 %vm4346_vm13, %v5470_v8  ;;  %3449 = vmatprep.subr.msk.mxu0 %vm4360_vm2, %v5470_v8  ;;  %vm4476_vm2 = vmand %vm5632_vm14, %vm1545_vm12  ;;  %vm1541_vm12 = vcmp.lt.s32.totalorder %v4304_v7, %v1537_v4 }
  0xe6   : > { %3441 = vmatpush1.msk.msra.mxu1 %vm4374_vm8, %v5470_v8  ;;  %3450 = vmatpush1.msk.msra.mxu0 %vm4387_vm6, %v5470_v8  ;;  %vm5635_vm8 = vcmp.ge.s32.totalorder %v4326_v39, %v1514_v52  ;;  %vm1517_vm6 = vcmp.ge.s32.totalorder %v4304_v7, %v1513_v0  ;;  %vm4498_vm14 = vmand %vm1518_vm3, %vm1542_vm7  ;;  %v5642_v7 = vmov 0 }
  0xe7   : > { %1173 = vmatmul.mubr.f32.gmra.mxu1 %v4294_v35  ;;  %1250 = vmatmul.mubr.f32.gmra.mxu0 %v4294_v35  ;;  %vm4486_vm13 = vmand %vm5635_vm8, %vm1547_vm15  ;;  %vm1519_vm8 = vcmp.ge.s32.totalorder %v4326_v39, %v1513_v0  ;;  %vm1543_vm15 = vcmp.lt.s32.totalorder %v4326_v39, %v1537_v4  ;;  %v930_v0 = vsub.s32 5, %v4242_v3  ;;  %v939_v4 = vrot.slane %v906_v31, %v938_v57  ;;  %v3462_v57 = vld [vmem:[%s5436_s14] ss:$0 sm:$0xff] }
  0xe8   : > { %v5637_v11 = vsel %vm4486_vm13, 4294967295, %v5636_v11  ;;  %3442 = vmatprep.subr.msk.mxu1 %vm4399_vm5, %v5470_v8  ;;  %3451 = vmatprep.subr.msk.mxu0 %vm4410_vm1, %v5470_v8  ;;  %vm5641_vm13 = vnez %v5626_v6  ;;  %vm4510_vm5 = vmand %vm1520_vm10, %vm1544_vm11  ;;  %vm5653_vm11 = vcmask 261120  }
  0xe9   : > { %5638 = vst [vmem:[#allocation16_spill] sm:$0xff] %v5637_v11  ;;  %3443 = vmatpush1.msk.msra.mxu1 %vm4423_vm0, %v5470_v8  ;;  %3452 = vmatpush1.msk.msra.mxu0 %vm5641_vm13, %v5470_v8  ;;  %v5643_v7 = vsel %vm4510_vm5, 4294967295, %v5642_v7  ;;  %vm4520_vm3 = vmand %vm1517_vm6, %vm1541_vm12  ;;  %vm5647_vm7 = vnez %v5637_v11  ;;  %vm1470_vm6 = vcmask 654336  }
  0xea   : > { %5644 = vst [vmem:[#allocation17_spill] sm:$0xff] %v5643_v7  ;;  %3444 = vmatprep.subr.msk.mxu1 %vm4448_vm9, %v5470_v8  ;;  %3453 = vmatprep.subr.msk.mxu0 %vm4462_vm4, %v5470_v8  ;;  %v5646_v13 = vsel %vm4520_vm3, 4294967295, %v5645_v13  ;;  %vm4530_vm10 = vmand %vm1519_vm8, %vm1543_vm15  ;;  %vm5656_vm8 = vmmov 0  }
  0xeb   : > { %3445 = vmatpush1.msk.msra.mxu1 %vm4476_vm2, %v5470_v8  ;;  %3454 = vmatpush1.msk.msra.mxu0 %vm5647_vm7, %v5470_v8  ;;  %v5649_v12 = vsel %vm4530_vm10, 4294967295, %v5648_v12  ;;  %vm5654_vm12 = vmmov %vm5653_vm11 }
  0xec   : > { %5650 = vst [vmem:[#allocation18_spill] sm:$0xff] %v5649_v12  ;;  %3446 = vmatprep.subr.msk.mxu1 %vm4498_vm14, %v5470_v8  ;;  %3455 = vmatprep.subr.msk.mxu0 %vm4510_vm5, %v5470_v8  ;;  %vm5659_vm15 = vmmov %vm5653_vm11 }
  0xed   : > { %3447 = vmatpush1.msk.msra.mxu1 %vm4520_vm3, %v5470_v8  ;;  %1683 = vmatprep.mubr.f32.mxu1 %v5472_v1 }
  0xee   : > { %3456 = vmatpush1.msk.msra.mxu0 %vm4530_vm10, %v5470_v8  ;;  %1754 = vmatprep.mubr.f32.mxu0 %v5472_v1 }
  0xef   : > { %3775 = vmatprep.subr.mxu1 %v5472_v1 }
  0xf0   : > { %v1436_v14 = vpop.xlane.xlu1 %1435 }
  0xf1   : > { %v1437_v15 = vmax.f32 %v1436_v14, 1.0 }
  0xf3   : > { %3927 = vrcp.f32 %v1437_v15 }
  0xf4   : > { %v1455_v2 = vpop.permute.xlu1 %1454 }
  0xf5   : > { %v4551_v16 = vsel %vm1470_vm6, %v4315_v24, %v1455_v2  ;;  %v4586_v24 = vld [vmem:[%s5433_s11 + $0x8] sm:$0xff]  ;;  %v926_v2 = vsub.s32 4, %v4242_v3 }
  0xf6   : > { %5657 = vst [vmem:[#allocation22_spill] sm:$0xff] %v4586_v24 }
 0x100   : > { %v741_v19 = vpop.f32.mrf.mxu0  ;;  %v3928_v20 = vpop.eup %3927 }
 0x101   : > { %v742_v21 = vadd.f32 %v3416_v17, %v741_v19  ;;  %v4557_v22 = vmul.f32 %v3928_v20, %v4273_v18  ;;  %v4577_v18 = vld [vmem:[%s5433_s11 + $0x10] sm:$0xff]  ;;  %v935_v17 = vrot.slane %v906_v31, %v934_v60  ;;  %v931_v19 = vrot.slane %v906_v31, %v930_v0 }
 0x102   : > { %v3774_v23 = vpop.f32.mrf.mxu0  ;;  %5655 = vst [vmem:[#allocation21_spill] sm:$0xff] %v4577_v18 }
 0x103   : > { %v4559_v25 = vmax.f32 %v742_v21, 0.0  ;;  %1477 = vrot.lane.b32.xlu1 %v4557_v22, %s4051_s1  ;;  %1480 = vrot.lane.b32.xlu0 %v4557_v22, %s4049_s8  ;;  %v927_v23 = vrot.slane %v906_v31, %v926_v2  ;;  %s3412_s1 = sshll.u32 %s643_s21, 3 }
 0x104   : > { %s645_s29 = scalar_lea.vmem [#allocation5], %s3412_s1 }
 0x105   : > { %5651 = vst [vmem:[#allocation19_spill] sm:$0xff] %v4559_v25  ;;  %3448 = vmatmul.mubr.msk.f32.vlgmr.msra.gmra.mxu1 %vm5653_vm11, %v4559_v25  ;;  %3457 = vmatmul.mubr.msk.f32.vlgmr.msra.gmra.mxu0 %vm5654_vm12, %v4559_v25  ;;  %vm1472_vm11 = vcmask 785408   ;;  %vm5549_vm12 = vcmask 916480  }
 0x106   : > { %3776 = vmatpush3.msra.mxu1 %v4564_v27  ;;  %3783 = vmatprep.mubr.msk.f32.mxu1 %vm5656_vm8, %v5472_v1 }
 0x107   : > { %3777 = vmatprep.subr.mxu1 %v5472_v1  ;;  %1483 = vrot.lane.b32.xlu1 %v4557_v22, %s4052_s2  ;;  %s3511_s2 = sshll.u32 %s5843_s24, 7 }
 0x108   : > { %3778 = vmatpush3.msra.mxu1 %v4577_v18  ;;  %s5387_s27 = scalar_lea.hbm %s5848_s23, %s3511_s2 }
 0x109   : > { %3779 = vmatprep.subr.mxu1 %v5472_v1 }
 0x10a   : > { %3780 = vmatpush3.msra.mxu1 %v4586_v24 }
 0x10b   : > { %3781 = vmatprep.subr.mxu1 %v5472_v1 }
 0x10c   : > { %3782 = vmatpush3.msra.mxu1 %v4595_v28 }
 0x10d   : > { %3784 = vmatmul.mubr.msk.f32.vlgmr.msra.gmra.mxu1 %vm5659_vm15, %v4559_v25  ;;  %vm5721_vm15 = vcmask 130048  }
 0x180   : > { %v1014_v36 = vpop.f32.mrf.mxu1  ;;  %v1091_v37 = vpop.f32.mrf.mxu0 }
 0x181   : > { %v4608_v38 = vadd.f32 %v1014_v36, %v911_v32  ;;  %v4610_v39 = vadd.f32 %v1091_v37, %v919_v33 }
 0x182   : > { %v1093_v42 = vpop.f32.mrf.mxu0  ;;  %v1016_v45 = vpop.f32.mrf.mxu1 }
 0x183   : > { %5660 = vst [vmem:[#allocation24_spill] sm:$0xff] %v4608_v38  ;;  %5661 = vst [vmem:[#allocation25_spill] sm:$0xff] %v4610_v39  ;;  %1264 = vrot.lane.b32.xlu0 %v4608_v38, %s4050_s16  ;;  %1310 = vrot.lane.b32.xlu1 %v4610_v39, %s4049_s8  ;;  %v4617_v44 = vadd.f32 %v1093_v42, %v923_v41  ;;  %v4623_v46 = vadd.f32 %v1016_v45, %v915_v43 }
 0x185   : > { %5662 = vst [vmem:[#allocation26_spill] sm:$0xff] %v4617_v44  ;;  %5663 = vst [vmem:[#allocation27_spill] sm:$0xff] %v4623_v46 }
 0x186   : > { %v1097_v47 = vpop.f32.mrf.mxu0  ;;  %v1020_v49 = vpop.f32.mrf.mxu1 }
 0x187   : > { %1330 = vrot.lane.b32.xlu0 %v4617_v44, %s4049_s8  ;;  %1270 = vrot.lane.b32.xlu1 %v4608_v38, %s4049_s8  ;;  %v4633_v48 = vadd.f32 %v1097_v47, %v919_v33  ;;  %v4643_v50 = vadd.f32 %v1020_v49, %v911_v32  ;;  %v4749_v49 = vpop.permute.xlu1 %1457 }
 0x188   : > { %v1022_v52 = vpop.f32.mrf.mxu1  ;;  %v1099_v54 = vpop.f32.mrf.mxu0 }
 0x189   : > { %5664 = vst [vmem:[#allocation28_spill] sm:$0xff] %v4633_v48  ;;  %5665 = vst [vmem:[#allocation29_spill] sm:$0xff] %v4643_v50  ;;  %v4649_v53 = vadd.f32 %v1022_v52, %v915_v43  ;;  %v4655_v56 = vadd.f32 %v1099_v54, %v923_v41  ;;  %v4757_v54 = vpop.permute.xlu0 %1460 }
 0x18b   : > { %1290 = vrot.lane.b32.xlu0 %v4623_v46, %s4049_s8  ;;  %1304 = vrot.lane.b32.xlu1 %v4610_v39, %s4050_s16  ;;  %5666 = vst [vmem:[#allocation30_spill] sm:$0xff] %v4649_v53  ;;  %5667 = vst [vmem:[#allocation31_spill] sm:$0xff] %v4655_v56  ;;  %v4753_v52 = vpop.permute.xlu1 %1477 }
 0x18f   : > { %1324 = vrot.lane.b32.xlu0 %v4617_v44, %s4050_s16  ;;  %1278 = vrot.lane.b32.xlu1 %v4623_v46, %s4055_s20  ;;  %v4766_v60 = vpop.permute.xlu1 %1483 }
 0x193   : > { %1284 = vrot.lane.b32.xlu0 %v4623_v46, %s4050_s16  ;;  %1312 = vrot.lane.b32.xlu1 %v4633_v48, %s4049_s8 }
 0x197   : > { %1318 = vrot.lane.b32.xlu0 %v4617_v44, %s4055_s20  ;;  %1306 = vrot.lane.b32.xlu1 %v4633_v48, %s4050_s16 }
 0x19b   : > { %1272 = vrot.lane.b32.xlu0 %v4643_v50, %s4049_s8  ;;  %1266 = vrot.lane.b32.xlu1 %v4643_v50, %s4050_s16 }
 0x19f   : > { %1292 = vrot.lane.b32.xlu0 %v4649_v53, %s4049_s8  ;;  %1300 = vrot.lane.b32.xlu1 %v4633_v48, %s4055_s20 }
 0x1a3   : > { %v1245_v58 = vpop.f32.mrf.mxu0  ;;  %1326 = vrot.lane.b32.xlu0 %v4655_v56, %s4050_s16  ;;  %1332 = vrot.lane.b32.xlu1 %v4655_v56, %s4049_s8  ;;  %v1168_v14 = vpop.f32.mrf.mxu1 }
 0x1a4   : > { %v4675_v29 = vadd.f32 %v1245_v58, %v935_v17  ;;  %v4683_v3 = vadd.f32 %v1168_v14, %v927_v23  ;;  %v4764_v58 = vpop.permute.xlu0 %1480 }
 0x1a5   : > { %v1247_v15 = vpop.f32.mrf.mxu0  ;;  %v1170_v21 = vpop.f32.mrf.mxu1 }
 0x1a6   : > { %v4669_v20 = vadd.f32 %v1247_v15, %v939_v4  ;;  %5669 = vst [vmem:[#allocation33_spill] sm:$0xff] %v4675_v29  ;;  %v4677_v30 = vadd.f32 %v1170_v21, %v931_v19  ;;  %5671 = vst [vmem:[#allocation35_spill] sm:$0xff] %v4683_v3 }
 0x1a7   : > { %1286 = vrot.lane.b32.xlu0 %v4649_v53, %s4050_s16  ;;  %1280 = vrot.lane.b32.xlu1 %v4649_v53, %s4055_s20  ;;  %v1174_v32 = vpop.f32.mrf.mxu1  ;;  %v1251_v33 = vpop.f32.mrf.mxu0 }
 0x1a8   : > { %5668 = vst [vmem:[#allocation32_spill] sm:$0xff] %v4669_v20  ;;  %5670 = vst [vmem:[#allocation34_spill] sm:$0xff] %v4677_v30  ;;  %v4689_v31 = vadd.f32 %v1174_v32, %v927_v23  ;;  %v4711_v41 = vadd.f32 %v1251_v33, %v935_v17 }
 0x1a9   : > { %v1176_v34 = vpop.f32.mrf.mxu1  ;;  %v1253_v37 = vpop.f32.mrf.mxu0 }
 0x1aa   : > { %5672 = vst [vmem:[#allocation36_spill] sm:$0xff] %v4689_v31  ;;  %v4699_v36 = vadd.f32 %v1176_v34, %v931_v19  ;;  %v4705_v40 = vadd.f32 %v1253_v37, %v939_v4  ;;  %5674 = vst [vmem:[#allocation38_spill] sm:$0xff] %v4711_v41 }
 0x1ab   : > { %1320 = vrot.lane.b32.xlu0 %v4655_v56, %s4055_s20  ;;  %1410 = vrot.lane.b32.xlu1 %v4669_v20, %s4049_s8 }
 0x1ac   : > { %5673 = vst [vmem:[#allocation37_spill] sm:$0xff] %v4705_v40 }
 0x1af   : > { %1390 = vrot.lane.b32.xlu0 %v4675_v29, %s4049_s8  ;;  %1370 = vrot.lane.b32.xlu1 %v4677_v30, %s4049_s8 }
 0x1b3   : > { %1350 = vrot.lane.b32.xlu0 %v4683_v3, %s4049_s8  ;;  %1404 = vrot.lane.b32.xlu1 %v4669_v20, %s4050_s16 }
 0x1b7   : > { %1384 = vrot.lane.b32.xlu0 %v4675_v29, %s4050_s16  ;;  %1346 = vrot.lane.b32.xlu1 %v4689_v31, %s4050_s16 }
 0x1bb   : > { %1364 = vrot.lane.b32.xlu0 %v4677_v30, %s4050_s16  ;;  %1344 = vrot.lane.b32.xlu1 %v4683_v3, %s4050_s16 }
 0x1bf   : > { %1398 = vrot.lane.b32.xlu0 %v4669_v20, %s4055_s20  ;;  %1372 = vrot.lane.b32.xlu1 %v4699_v36, %s4049_s8 }
 0x1c3   : > { %1358 = vrot.lane.b32.xlu0 %v4677_v30, %s4055_s20  ;;  %1406 = vrot.lane.b32.xlu1 %v4705_v40, %s4050_s16 }
 0x1c5   : > { %v4717_v42 = vpop.f32.mrf.mxu1 }
 0x1c7   : > { %1392 = vrot.lane.b32.xlu0 %v4711_v41, %s4049_s8  ;;  %1366 = vrot.lane.b32.xlu1 %v4699_v36, %s4050_s16  ;;  %v4723_v43 = vpop.f32.mrf.mxu1 }
 0x1cb   : > { %1352 = vrot.lane.b32.xlu0 %v4689_v31, %s4049_s8  ;;  %1400 = vrot.lane.b32.xlu1 %v4705_v40, %s4055_s20 }
 0x1cd   : > { %v4725_v45 = vpop.f32.mrf.mxu1 }
 0x1cf   : > { %1386 = vrot.lane.b32.xlu0 %v4711_v41, %s4050_s16  ;;  %1298 = vrot.lane.b32.xlu1 %v4610_v39, %s4055_s20  ;;  %v3785_v47 = vpop.f32.mrf.mxu1 }
 0x1d3   : > { %1412 = vrot.lane.b32.xlu0 %v4705_v40, %s4049_s8  ;;  %1489 = vrot.lane.b32.xlu1 %v4557_v22, %s4054_s26  ;;  %s3305_s26 = sshll.u32 %s645_s29, 4  ;;  %s3306_s26 = int_to_ptr.vmem [resolvable:$true] %s3305_s26 }
 0x1d7   : > { %1260 = vrot.lane.b32.xlu0 %v4643_v50, %s4055_s20  ;;  %1340 = vrot.lane.b32.xlu1 %v4689_v31, %s4055_s20 }
 0x1db   : > { %1360 = vrot.lane.b32.xlu0 %v4699_v36, %s4055_s20  ;;  %1378 = vrot.lane.b32.xlu1 %v4675_v29, %s4055_s20 }
 0x1df   : > { %1486 = vrot.lane.b32.xlu0 %v4557_v22, %s4050_s16  ;;  %1338 = vrot.lane.b32.xlu1 %v4683_v3, %s4055_s20 }
 0x1e3   : > { %1380 = vrot.lane.b32.xlu0 %v4711_v41, %s4055_s20 }
 0x1e7   : > { %1258 = vrot.lane.b32.xlu0 %v4608_v38, %s4055_s20 }
 0x1eb   : > { %1492 = vrot.lane.b32.xlu0 %v4557_v22, %s4055_s20 }
 0x1ef   : > { %1495 = vrot.lane.b32.xlu0 %v4557_v22, %s4053_s3 }
 0x1f3   : > { %2095 = vrot.lane.b32.xlu0 %v3462_v57, %s4049_s8 }
 0x1f5   : > { %v4769_v0 = vpop.permute.xlu0 %1264  ;;  %v4771_v4 = vpop.permute.xlu1 %1310 }
 0x1f6   : > { %5675 = vst [vmem:[#allocation39_spill] sm:$0xff] %v4769_v0  ;;  %5676 = vst [vmem:[#allocation40_spill] sm:$0xff] %v4771_v4 }
 0x1f9   : > { %v4773_v14 = vpop.permute.xlu0 %1330  ;;  %v4775_v15 = vpop.permute.xlu1 %1270 }
 0x1fa   : > { %5677 = vst [vmem:[#allocation41_spill] sm:$0xff] %v4773_v14  ;;  %5678 = vst [vmem:[#allocation42_spill] sm:$0xff] %v4775_v15 }
 0x1fd   : > { %v4777_v2 = vpop.permute.xlu0 %1290  ;;  %v4779_v17 = vpop.permute.xlu1 %1304 }
 0x1fe   : > { %5679 = vst [vmem:[#allocation43_spill] sm:$0xff] %v4777_v2  ;;  %5680 = vst [vmem:[#allocation44_spill] sm:$0xff] %v4779_v17 }
 0x201   : > { %v4781_v19 = vpop.permute.xlu0 %1324  ;;  %v4783_v21 = vpop.permute.xlu1 %1278 }
 0x202   : > { %5681 = vst [vmem:[#allocation45_spill] sm:$0xff] %v4781_v19  ;;  %5682 = vst [vmem:[#allocation46_spill] sm:$0xff] %v4783_v21 }
 0x205   : > { %v4785_v23 = vpop.permute.xlu0 %1284  ;;  %v4787_v32 = vpop.permute.xlu1 %1312 }
 0x206   : > { %5683 = vst [vmem:[#allocation47_spill] sm:$0xff] %v4785_v23  ;;  %5684 = vst [vmem:[#allocation48_spill] sm:$0xff] %v4787_v32 }
 0x209   : > { %v4789_v33 = vpop.permute.xlu0 %1318  ;;  %v4791_v34 = vpop.permute.xlu1 %1306 }
 0x20a   : > { %5685 = vst [vmem:[#allocation49_spill] sm:$0xff] %v4789_v33  ;;  %5686 = vst [vmem:[#allocation50_spill] sm:$0xff] %v4791_v34 }
 0x20d   : > { %v4793_v37 = vpop.permute.xlu0 %1272  ;;  %v4795_v47 = vpop.permute.xlu1 %1266 }
 0x20e   : > { %5687 = vst [vmem:[#allocation51_spill] sm:$0xff] %v4793_v37  ;;  %5688 = vst [vmem:[#allocation52_spill] sm:$0xff] %v4795_v47 }
 0x211   : > { %v4797_v57 = vpop.permute.xlu0 %1292  ;;  %v4799_v8 = vpop.permute.xlu1 %1300 }
 0x212   : > { %5689 = vst [vmem:[#allocation53_spill] sm:$0xff] %v4797_v57  ;;  %5690 = vst [vmem:[#allocation54_spill] sm:$0xff] %v4799_v8 }
 0x215   : > { %v4801_v1 = vpop.permute.xlu0 %1326  ;;  %v4803_v28 = vpop.permute.xlu1 %1332 }
 0x216   : > { %5691 = vst [vmem:[#allocation55_spill] sm:$0xff] %v4801_v1  ;;  %5692 = vst [vmem:[#allocation56_spill] sm:$0xff] %v4803_v28  ;;  %3523 = vmatprep.subr.mxu0 %v4803_v28 }
 0x217   : > { %3524 = vmatpush3.msra.mxu0 %v4797_v57 }
 0x218   : > { %3525 = vmatprep.subr.mxu0 %v4773_v14 }
 0x219   : > { %v4808_v24 = vpop.permute.xlu0 %1286  ;;  %3526 = vmatpush3.msra.mxu0 %v4777_v2  ;;  %v4811_v18 = vpop.permute.xlu1 %1280 }
 0x21a   : > { %5693 = vst [vmem:[#allocation57_spill] sm:$0xff] %v4808_v24  ;;  %5694 = vst [vmem:[#allocation58_spill] sm:$0xff] %v4811_v18  ;;  %3527 = vmatprep.subr.mxu0 %v4801_v1 }
 0x21b   : > { %3528 = vmatpush3.msra.mxu0 %v4808_v24 }
 0x21c   : > { %3529 = vmatprep.subr.mxu0 %v4781_v19 }
 0x21d   : > { %v4816_v27 = vpop.permute.xlu0 %1320  ;;  %3530 = vmatpush3.msra.mxu0 %v4785_v23  ;;  %v4819_v25 = vpop.permute.xlu1 %1410  ;;  %v5789_v63 = vld [vmem:[#allocation56_spill] sm:$0xff] }
 0x21e   : > { %5695 = vst [vmem:[#allocation59_spill] sm:$0xff] %v4816_v27  ;;  %5696 = vst [vmem:[#allocation60_spill] sm:$0xff] %v4819_v25  ;;  %3531 = vmatprep.subr.mxu0 %v4816_v27 }
 0x21f   : > { %3532 = vmatpush3.msra.mxu0 %v4811_v18 }
 0x220   : > { %3533 = vmatprep.subr.mxu0 %v4789_v33 }
 0x221   : > { %v4824_v2 = vpop.permute.xlu0 %1390  ;;  %3534 = vmatpush3.msra.mxu0 %v4783_v21  ;;  %v4827_v1 = vpop.permute.xlu1 %1370 }
 0x222   : > { %5697 = vst [vmem:[#allocation61_spill] sm:$0xff] %v4824_v2  ;;  %5698 = vst [vmem:[#allocation62_spill] sm:$0xff] %v4827_v1  ;;  %3535 = vmatprep.subr.mxu0 %v4655_v56 }
 0x223   : > { %3536 = vmatpush3.msra.mxu0 %v4649_v53  ;;  %v1756_v53 = vpop.f32.mrf.mxu0 }
 0x224   : > { %3537 = vmatprep.subr.mxu0 %v4617_v44 }
 0x225   : > { %v4832_v23 = vpop.permute.xlu0 %1350  ;;  %3538 = vmatpush3.msra.mxu0 %v4623_v46  ;;  %v4835_v27 = vpop.permute.xlu1 %1404 }
 0x226   : > { %5699 = vst [vmem:[#allocation63_spill] sm:$0xff] %v4832_v23  ;;  %5700 = vst [vmem:[#allocation64_spill] sm:$0xff] %v4835_v27  ;;  %3539 = vmatprep.subr.mxu0 %v4787_v32  ;;  %v1758_v19 = vpop.f32.mrf.mxu0 }
 0x227   : > { %3540 = vmatpush3.msra.mxu0 %v4793_v37 }
 0x228   : > { %3541 = vmatprep.subr.mxu0 %v4771_v4 }
 0x229   : > { %v4840_v21 = vpop.permute.xlu0 %1384  ;;  %3542 = vmatpush3.msra.mxu0 %v4775_v15  ;;  %v4843_v56 = vpop.permute.xlu1 %1346 }
 0x22a   : > { %5701 = vst [vmem:[#allocation65_spill] sm:$0xff] %v4840_v21  ;;  %5702 = vst [vmem:[#allocation66_spill] sm:$0xff] %v4843_v56  ;;  %3543 = vmatprep.subr.mxu0 %v4791_v34 }
 0x22b   : > { %3544 = vmatpush3.msra.mxu0 %v4795_v47 }
 0x22c   : > { %3545 = vmatprep.subr.mxu0 %v4779_v17 }
 0x22d   : > { %v4848_v46 = vpop.permute.xlu0 %1364  ;;  %3546 = vmatpush3.msra.mxu0 %v4769_v0  ;;  %v4851_v32 = vpop.permute.xlu1 %1344 }
 0x22e   : > { %5703 = vst [vmem:[#allocation67_spill] sm:$0xff] %v4848_v46  ;;  %5704 = vst [vmem:[#allocation68_spill] sm:$0xff] %v4851_v32  ;;  %3547 = vmatprep.subr.mxu0 %v4799_v8  ;;  %v1473_v8 = vsel %vm1472_vm11, %v4551_v16, %v4749_v49 }
 0x22f   : > { %v4880_v24 = vsel %vm5549_vm12, %v1473_v8, %v4757_v54  ;;  %vm5722_vm12 = vcmask 261120  }
 0x230   : > { %5715 = vst [vmem:[#allocation79_spill] sm:$0xff] %v4880_v24  ;;  %v1761_v14 = vmul.f32 %v4717_v42, %v4880_v24  ;;  %v1763_v16 = vmul.f32 %v1756_v53, %v4880_v24  ;;  %v1762_v49 = vmul.f32 %v4723_v43, %v4880_v24 }
 0x231   : > { %v4854_v4 = vpop.permute.xlu0 %1398  ;;  %v4856_v37 = vpop.permute.xlu1 %1372 }
 0x232   : > { %5705 = vst [vmem:[#allocation69_spill] sm:$0xff] %v4854_v4  ;;  %5706 = vst [vmem:[#allocation70_spill] sm:$0xff] %v4856_v37  ;;  %v1765_v8 = vrot.slane %v1761_v14, 4  ;;  %v1777_v53 = vrot.slane %v1763_v16, 4  ;;  %v1771_v42 = vrot.slane %v1762_v49, 4 }
 0x235   : > { %v4858_v15 = vpop.permute.xlu0 %1358  ;;  %v4860_v44 = vpop.permute.xlu1 %1406 }
 0x236   : > { %5707 = vst [vmem:[#allocation71_spill] sm:$0xff] %v4858_v15  ;;  %5708 = vst [vmem:[#allocation72_spill] sm:$0xff] %v4860_v44 }
 0x239   : > { %v4862_v34 = vpop.permute.xlu0 %1392  ;;  %v4864_v47 = vpop.permute.xlu1 %1366 }
 0x23a   : > { %5709 = vst [vmem:[#allocation73_spill] sm:$0xff] %v4862_v34  ;;  %5710 = vst [vmem:[#allocation74_spill] sm:$0xff] %v4864_v47 }
 0x23d   : > { %v4866_v17 = vpop.permute.xlu0 %1352  ;;  %v4870_v33 = vpop.permute.xlu1 %1400 }
 0x23e   : > { %5711 = vst [vmem:[#allocation75_spill] sm:$0xff] %v4866_v17  ;;  %5713 = vst [vmem:[#allocation77_spill] sm:$0xff] %v4870_v33 }
 0x241   : > { %v4868_v0 = vpop.permute.xlu0 %1386  ;;  %v4885_v57 = vpop.permute.xlu1 %1298 }
 0x242   : > { %5712 = vst [vmem:[#allocation76_spill] sm:$0xff] %v4868_v0  ;;  %5716 = vst [vmem:[#allocation80_spill] sm:$0xff] %v4885_v57 }
 0x245   : > { %v4875_v18 = vpop.permute.xlu0 %1412 }
 0x246   : > { %5714 = vst [vmem:[#allocation78_spill] sm:$0xff] %v4875_v18  ;;  %3558 = vmatprep.subr.mxu1 %v4875_v18  ;;  %v1764_v18 = vmul.f32 %v1758_v19, %v4880_v24  ;;  %v1490_v19 = vpop.permute.xlu1 %1489  ;;  %v1766_v24 = vadd.f32 %v1765_v8, %v1761_v14 }
 0x247   : > { %3559 = vmatpush3.msra.mxu1 %v4856_v37 }
 0x248   : > { %3560 = vmatprep.subr.mxu1 %v4819_v25  ;;  %v1783_v43 = vrot.slane %v1764_v18, 4 }
 0x249   : > { %v4892_v28 = vpop.permute.xlu0 %1260  ;;  %3561 = vmatpush3.msra.mxu1 %v4827_v1 }
 0x24a   : > { %5717 = vst [vmem:[#allocation81_spill] sm:$0xff] %v4892_v28  ;;  %3548 = vmatpush3.msra.mxu0 %v4892_v28  ;;  %3562 = vmatprep.subr.mxu1 %v4860_v44  ;;  %v1772_v28 = vadd.f32 %v1771_v42, %v1762_v49 }
 0x24b   : > { %3549 = vmatprep.subr.mxu0 %v4885_v57  ;;  %3563 = vmatpush3.msra.mxu1 %v4864_v47  ;;  %v1778_v57 = vadd.f32 %v1777_v53, %v1763_v16  ;;  %v1784_v47 = vadd.f32 %v1783_v43, %v1764_v18  ;;  %v1498_v18 = vsel %vm5721_vm15, %v4557_v22, %v4753_v52  ;;  %vm5725_vm15 = vcmask 392192  }
 0x24c   : > { %3564 = vmatprep.subr.mxu1 %v4835_v27  ;;  %v1767_v27 = vrot.slane %v1766_v24, 2  ;;  %v1499_v49 = vsel %vm5722_vm12, %v1498_v18, %v4764_v58  ;;  %vm5726_vm12 = vcmask 523264  }
 0x24d   : > { %v4900_v54 = vpop.permute.xlu0 %1360  ;;  %3565 = vmatpush3.msra.mxu1 %v4848_v46  ;;  %v4909_v46 = vpop.permute.xlu1 %1340  ;;  %v1785_v14 = vrot.slane %v1784_v47, 2  ;;  %v1500_v22 = vsel %vm5725_vm15, %v1499_v49, %v4766_v60  ;;  %v5727_v60 = vmov 0.0   ;;  %vm5729_vm15 = vcmask 916480  }
 0x24e   : > { %5718 = vst [vmem:[#allocation82_spill] sm:$0xff] %v4900_v54  ;;  %3566 = vmatprep.subr.mxu1 %v4870_v33  ;;  %5719 = vst [vmem:[#allocation83_spill] sm:$0xff] %v4909_v46  ;;  %v1779_v33 = vrot.slane %v1778_v57, 2  ;;  %v1768_v16 = vadd.f32 %v1767_v27, %v1766_v24 }
 0x24f   : > { %3567 = vmatpush3.msra.mxu1 %v4900_v54  ;;  %v1773_v54 = vrot.slane %v1772_v28, 2  ;;  %v1786_v43 = vadd.f32 %v1785_v14, %v1784_v47 }
 0x250   : > { %3568 = vmatprep.subr.mxu1 %v4854_v4  ;;  %v1780_v53 = vadd.f32 %v1779_v33, %v1778_v57  ;;  %v1769_v27 = vrot.slane %v1768_v16, 1 }
 0x251   : > { %v1487_v44 = vpop.permute.xlu0 %1486  ;;  %3569 = vmatpush3.msra.mxu1 %v4858_v15  ;;  %v1774_v42 = vadd.f32 %v1773_v54, %v1772_v28  ;;  %v1787_v52 = vrot.slane %v1786_v43, 1 }
 0x252   : > { %3570 = vmatprep.subr.mxu1 %v4705_v40  ;;  %v1781_v24 = vrot.slane %v1780_v53, 1  ;;  %v1501_v58 = vsel %vm5726_vm12, %v1500_v22, %v1487_v44  ;;  %v1770_v47 = vadd.f32 %v1769_v27, %v1768_v16  ;;  %vm5733_vm12 = vnez %v5620_v62 }
 0x253   : > { %3571 = vmatpush3.msra.mxu1 %v4699_v36  ;;  %v1775_v28 = vrot.slane %v1774_v42, 1  ;;  %v1502_v54 = vsel %vm1470_vm6, %v1501_v58, %v1490_v19  ;;  %v1788_v22 = vadd.f32 %v1787_v52, %v1786_v43  ;;  %v5730_v43 = vmov 1.0   ;;  %v5004_v52 = vld [vmem:[%s5434_s12 + $0x10] sm:$0xff]  ;;  %v5010_v58 = vld [vmem:[%s5434_s12 + $0x8] sm:$0xff] }
 0x254   : > { %3572 = vmatprep.subr.mxu1 %v4669_v20  ;;  %v1782_v44 = vadd.f32 %v1781_v24, %v1780_v53  ;;  %vm5731_vm6 = vnez %v5612_v51 }
 0x255   : > { %v4912_v8 = vpop.permute.xlu0 %1380  ;;  %3573 = vmatpush3.msra.mxu1 %v4677_v30  ;;  %v4926_v30 = vpop.permute.xlu1 %1378  ;;  %v1776_v49 = vadd.f32 %v1775_v28, %v1774_v42  ;;  %v4997_v28 = vld [vmem:[%s5434_s12 + $0x18] sm:$0xff] }
 0x256   : > { %5720 = vst [vmem:[#allocation84_spill] sm:$0xff] %v4912_v8  ;;  %3574 = vmatprep.subr.mxu1 %v4862_v34  ;;  %5724 = vst [vmem:[#allocation86_spill] sm:$0xff] %v4926_v30 }
 0x257   : > { %3575 = vmatpush3.msra.mxu1 %v4866_v17 }
 0x258   : > { %3576 = vmatprep.subr.mxu1 %v4824_v2 }
 0x259   : > { %v4923_v20 = vpop.permute.xlu0 %1258  ;;  %3577 = vmatpush3.msra.mxu1 %v4832_v23  ;;  %v4943_v57 = vpop.permute.xlu1 %1338 }
 0x25a   : > { %5723 = vst [vmem:[#allocation85_spill] sm:$0xff] %v4923_v20  ;;  %3550 = vmatpush3.msra.mxu0 %v4923_v20  ;;  %3578 = vmatprep.subr.mxu1 %v4868_v0  ;;  %5728 = vst [vmem:[#allocation87_spill] sm:$0xff] %v4943_v57 }
 0x25b   : > { %3551 = vmatprep.subr.mxu0 %v4633_v48  ;;  %3579 = vmatpush3.msra.mxu1 %v4843_v56 }
 0x25c   : > { %3552 = vmatpush3.msra.mxu0 %v4643_v50  ;;  %3580 = vmatprep.subr.mxu1 %v4840_v21 }
 0x25d   : > { %v1493_v33 = vpop.permute.xlu0 %1492  ;;  %3553 = vmatprep.subr.mxu0 %v4610_v39  ;;  %3581 = vmatpush3.msra.mxu1 %v4851_v32 }
 0x25e   : > { %3554 = vmatpush3.msra.mxu0 %v4608_v38  ;;  %3582 = vmatprep.subr.mxu1 %v4912_v8  ;;  %v1503_v14 = vsel %vm1472_vm11, %v1502_v54, %v1493_v33  ;;  %vm5732_vm11 = vnez %v5616_v59  ;;  %v5016_v33 = vld [vmem:[%s5434_s12] sm:$0xff] }
 0x25f   : > { %3583 = vmatpush3.msra.mxu1 %v4909_v46  ;;  %3786 = vmatprep.subr.mxu0 %v5727_v60 }
 0x260   : > { %3584 = vmatprep.subr.mxu1 %v4926_v30 }
 0x261   : > { %v1496_v18 = vpop.permute.xlu0 %1495  ;;  %3585 = vmatpush3.msra.mxu1 %v4943_v57 }
 0x262   : > { %v4950_v8 = vsel %vm5729_vm15, %v1503_v14, %v1496_v18  ;;  %3586 = vmatprep.subr.mxu1 %v4711_v41  ;;  %vm5734_vm15 = vnez %v5614_v55 }
 0x263   : > { %3587 = vmatpush3.msra.mxu1 %v4689_v31  ;;  %v1790_v16 = vmul.f32 %v1776_v49, %v4950_v8  ;;  %v1792_v19 = vmul.f32 %v1788_v22, %v4950_v8  ;;  %v1789_v53 = vmul.f32 %v1770_v47, %v4950_v8  ;;  %v1791_v27 = vmul.f32 %v1782_v44, %v4950_v8 }
 0x264   : > { %3588 = vmatprep.subr.mxu1 %v4675_v29 }
 0x265   : > { %v4959_v24 = vpop.permute.xlu0 %2095  ;;  %1927 = vmatprep.mubr.f32.mxu0 %v1790_v16  ;;  %3589 = vmatpush3.msra.mxu1 %v4683_v3  ;;  %v5028_v16 = vld [vmem:[%s5432_s10] ss:$0 sm:$0xff] }
 0x266   : > { %v2098_v42 = vadd.f32 %v4959_v24, %v4725_v45  ;;  %1997 = vmatprep.mubr.f32.mxu1 %v1792_v19  ;;  %1928 = vmatmul.mubr.f32.vlgmr.msra.gmra.mxu0 %v1789_v53 }
 0x267   : > { %1998 = vmatmul.mubr.f32.vlgmr.msra.gmra.mxu1 %v1791_v27  ;;  %3794 = vmatprep.mubr.msk.f32.mxu0 %vm5656_vm8, %v5727_v60 }
 0x268   : > { %2110 = vrot.lane.b32.xlu0 %v2098_v42, %s4049_s8  ;;  %2100 = vrot.lane.b32.xlu1 %v2098_v42, %s4055_s20  ;;  %v5058_v42 = vld [vmem:[%s5435_s13] ss:$0 sm:$0xff] }
 0x269   : > { %3464 = vmatprep.subr.msk.mxu1 %vm5731_vm6, %v5730_v43  ;;  %2200 = vmatprep.mubr.f32.mxu1 %v5727_v60 }
 0x26a   : > { %3465 = vmatpush1.msk.msra.mxu1 %vm5732_vm11, %v5730_v43  ;;  %3787 = vmatpush3.msra.mxu0 %v4997_v28 }
 0x26b   : > { %3466 = vmatprep.subr.msk.mxu1 %vm5733_vm12, %v5730_v43  ;;  %3788 = vmatprep.subr.mxu0 %v5727_v60 }
 0x26c   : > { %3467 = vmatpush1.msk.msra.mxu1 %vm4423_vm0, %v5730_v43  ;;  %3789 = vmatpush3.msra.mxu0 %v5004_v52 }
 0x26d   : > { %3468 = vmatprep.subr.msk.mxu1 %vm4448_vm9, %v5730_v43  ;;  %3790 = vmatprep.subr.mxu0 %v5727_v60 }
 0x26e   : > { %3469 = vmatpush1.msk.msra.mxu1 %vm4476_vm2, %v5730_v43  ;;  %3791 = vmatpush3.msra.mxu0 %v5010_v58 }
 0x26f   : > { %3470 = vmatprep.subr.msk.mxu1 %vm4498_vm14, %v5730_v43  ;;  %3792 = vmatprep.subr.mxu0 %v5727_v60 }
 0x270   : > { %3471 = vmatpush1.msk.msra.mxu1 %vm4520_vm3, %v5730_v43  ;;  %3793 = vmatpush3.msra.mxu0 %v5016_v33  ;;  %vm5735_vm3 = vcmask 261120  }
 0x271   : > { %3797 = vmatprep.subr.mxu1 %v5727_v60  ;;  %3473 = vmatprep.subr.msk.mxu0 %vm5734_vm15, %v5730_v43  ;;  %vm5736_vm15 = vnez %v5618_v61  ;;  %v5810_v61 = vld [vmem:[#allocation82_spill] sm:$0xff] }
 0x326   : > { %v3555_v47 = vpop.f32.mrf.mxu0 }
 0x327   : > { %v3590_v54 = vpop.f32.mrf.mxu1 }
 0x328   : > { %v3556_v44 = vpop.f32.mrf.mxu0 }
 0x329   : > { %v3557_v14 = vadd.f32 %v3556_v44, %v3555_v47  ;;  %v3591_v18 = vpop.f32.mrf.mxu1  ;;  %v2101_v44 = vpop.permute.xlu1 %2100 }
 0x32a   : > { %v3592_v22 = vadd.f32 %v3591_v18, %v3590_v54 }
 0x32b   : > { %v1930_v49 = vadd.f32 %v3557_v14, %v4725_v45  ;;  %v5737_v45 = vld [vmem:[#allocation56_spill] sm:$0xff] }
 0x32d   : > { %v2000_v19 = vadd.f32 %v3592_v22, %v1930_v49 }
 0x32f   : > { %v2009_v53 = vadd.f32 %v5028_v16, %v2000_v19 }
 0x331   : > { %v2010_v27 = vmax.f32 %v2009_v53, 0.0 }
 0x333   : > { %3795 = vmatmul.mubr.msk.f32.vlgmr.msra.gmra.mxu0 %vm5735_vm3, %v2010_v27  ;;  %v2111_v27 = vpop.permute.xlu0 %2110 }
 0x334   : > { %3474 = vmatpush1.msk.msra.mxu0 %vm5736_vm15, %v5730_v43  ;;  %2271 = vmatprep.mubr.f32.mxu0 %v5727_v60 }
 0x335   : > { %3475 = vmatprep.subr.msk.mxu0 %vm4410_vm1, %v5730_v43 }
 0x336   : > { %3476 = vmatpush1.msk.msra.mxu0 %vm5641_vm13, %v5730_v43 }
 0x337   : > { %3477 = vmatprep.subr.msk.mxu0 %vm4462_vm4, %v5730_v43 }
 0x338   : > { %3478 = vmatpush1.msk.msra.mxu0 %vm5647_vm7, %v5730_v43 }
 0x339   : > { %3479 = vmatprep.subr.msk.mxu0 %vm4510_vm5, %v5730_v43 }
 0x33a   : > { %3480 = vmatpush1.msk.msra.mxu0 %vm4530_vm10, %v5730_v43  ;;  %vm5739_vm10 = vmmov %vm5735_vm3 }
 0x33b   : > { %3603 = vmatprep.subr.mxu0 %v5737_v45  ;;  %v5738_v45 = vld [vmem:[#allocation19_spill] sm:$0xff] }
 0x3f3   : > { %v2086_v47 = vpop.f32.mrf.mxu0 }
 0x3f4   : > { %v2087_v54 = vadd.f32 %v5058_v42, %v2086_v47 }
 0x3f5   : > { %v3796_v14 = vpop.f32.mrf.mxu0 }
 0x3f6   : > { %v2103_v18 = vadd.f32 %v2101_v44, %v2087_v54 }
 0x3f8   : > { %v3463_v49 = vmul.f32 -1.442695, %v2103_v18 }
 0x3fa   : > { %3929 = vpow2.f32 %v3463_v49 }
 0x407   : > { %v3930_v22 = vpop.eup %3929 }
 0x408   : > { %v2107_v19 = vadd.f32 1.0, %v3930_v22 }
 0x40a   : > { %3931 = vrcp.f32 %v2107_v19 }
 0x417   : > { %v3932_v53 = vpop.eup %3931 }
 0x418   : > { %v2113_v12 = vmul.f32 %v3932_v53, %v2111_v27  ;;  %v2120_v14 = vsub.f32 1.0, %v3932_v53  ;;  %v5745_v27 = vld [vmem:[#allocation55_spill] sm:$0xff] }
 0x41a   : > { %2115 = vrot.lane.b32.xlu1 %v2113_v12, %s4050_s16 }
 0x41e   : > { %2126 = vrot.lane.b32.xlu1 %v5738_v45, %s4049_s8  ;;  %v5742_v45 = vld [vmem:[#allocation41_spill] sm:$0xff] }
 0x48c   : > { %v2116_v7 = vpop.permute.xlu1 %2115 }
 0x48d   : > { %v2118_v11 = vadd.f32 %v2116_v7, %v2087_v54  ;;  %v5740_v7 = vld [vmem:[#allocation20_spill] sm:$0xff]  ;;  %v5743_v54 = vld [vmem:[#allocation21_spill] sm:$0xff] }
 0x48f   : > { %3933 = vtanh.f32 %v2118_v11  ;;  %v5741_v11 = vld [vmem:[#allocation53_spill] sm:$0xff] }
 0x490   : > { %v2127_v44 = vpop.permute.xlu1 %2126 }
 0x491   : > { %v2129_v49 = vmul.f32 %v3932_v53, %v2127_v44  ;;  %v5744_v53 = vld [vmem:[#allocation43_spill] sm:$0xff]  ;;  %v5747_v44 = vld [vmem:[#allocation57_spill] sm:$0xff] }
 0x49c   : > { %v3934_v47 = vpop.eup %3933 }
 0x49d   : > { %2122 = vrot.lane.b32.xlu0 %v3934_v47, %s4055_s20  ;;  %v5746_v47 = vld [vmem:[#allocation22_spill] sm:$0xff] }
 0x50f   : > { %v2123_v18 = vpop.permute.xlu0 %2122 }
 0x510   : > { %v2125_v22 = vmul.f32 %v2123_v18, %v2120_v14  ;;  %v5748_v14 = vld [vmem:[#allocation45_spill] sm:$0xff]  ;;  %v5749_v18 = vld [vmem:[#allocation23_spill] sm:$0xff] }
 0x512   : > { %v5065_v19 = vadd.f32 %v2129_v49, %v2125_v22  ;;  %v5750_v49 = vld [vmem:[#allocation47_spill] sm:$0xff] }
 0x513   : > { %v5752_v22 = vld [vmem:[#allocation59_spill] sm:$0xff] }
 0x514   : > { %2132 = vrot.lane.b32.xlu0 %v5065_v19, %s4055_s20 }
 0x586   : > { %v2133_v12 = vpop.permute.xlu0 %2132 }
 0x587   : > { %3472 = vmatmul.mubr.msk.f32.vlgmr.msra.gmra.mxu1 %vm5735_vm3, %v2133_v12  ;;  %3481 = vmatmul.mubr.msk.f32.vlgmr.msra.gmra.mxu0 %vm5739_vm10, %v2133_v12  ;;  %vm5751_vm10 = vmmov %vm5735_vm3 }
 0x588   : > { %3798 = vmatpush3.msra.mxu1 %v5740_v7  ;;  %3604 = vmatpush3.msra.mxu0 %v5741_v11  ;;  %v5753_v7 = vld [vmem:[#allocation78_spill] sm:$0xff] }
 0x589   : > { %3799 = vmatprep.subr.mxu1 %v5727_v60  ;;  %3605 = vmatprep.subr.mxu0 %v5742_v45 }
 0x58a   : > { %3800 = vmatpush3.msra.mxu1 %v5743_v54  ;;  %3606 = vmatpush3.msra.mxu0 %v5744_v53  ;;  %v5754_v54 = vld [vmem:[#allocation58_spill] sm:$0xff] }
 0x58b   : > { %3801 = vmatprep.subr.mxu1 %v5727_v60  ;;  %3607 = vmatprep.subr.mxu0 %v5745_v27 }
 0x58c   : > { %3802 = vmatpush3.msra.mxu1 %v5746_v47  ;;  %3608 = vmatpush3.msra.mxu0 %v5747_v44  ;;  %v5755_v47 = vld [vmem:[#allocation49_spill] sm:$0xff] }
 0x58d   : > { %3803 = vmatprep.subr.mxu1 %v5727_v60  ;;  %3609 = vmatprep.subr.mxu0 %v5748_v14  ;;  %v5757_v14 = vld [vmem:[#allocation31_spill] sm:$0xff] }
 0x58e   : > { %3804 = vmatpush3.msra.mxu1 %v5749_v18  ;;  %3805 = vmatprep.mubr.msk.f32.mxu1 %vm5656_vm8, %v5727_v60  ;;  %v5756_v18 = vld [vmem:[#allocation46_spill] sm:$0xff] }
 0x58f   : > { %3610 = vmatpush3.msra.mxu0 %v5750_v49  ;;  %3806 = vmatmul.mubr.msk.f32.vlgmr.msra.gmra.mxu1 %vm5751_vm10, %v2133_v12  ;;  %v5758_v49 = vld [vmem:[#allocation72_spill] sm:$0xff]  ;;  %v5759_v12 = vld [vmem:[#allocation30_spill] sm:$0xff] }
 0x590   : > { %3611 = vmatprep.subr.mxu0 %v5752_v22  ;;  %3638 = vmatprep.subr.mxu1 %v5753_v7  ;;  %v5760_v22 = vld [vmem:[#allocation74_spill] sm:$0xff] }
 0x591   : > { %3612 = vmatpush3.msra.mxu0 %v5754_v54  ;;  %3639 = vmatpush3.msra.mxu1 %v4856_v37  ;;  %v5761_v7 = vld [vmem:[#allocation26_spill] sm:$0xff]  ;;  %v5762_v54 = vld [vmem:[#allocation64_spill] sm:$0xff]  ;;  %v5763_v37 = vld [vmem:[#allocation27_spill] sm:$0xff] }
 0x592   : > { %3613 = vmatprep.subr.mxu0 %v5755_v47  ;;  %3640 = vmatprep.subr.mxu1 %v4819_v25  ;;  %v5764_v47 = vld [vmem:[#allocation67_spill] sm:$0xff]  ;;  %v5765_v25 = vld [vmem:[#allocation48_spill] sm:$0xff] }
 0x593   : > { %3614 = vmatpush3.msra.mxu0 %v5756_v18  ;;  %3641 = vmatpush3.msra.mxu1 %v4827_v1  ;;  %v5766_v18 = vld [vmem:[#allocation77_spill] sm:$0xff]  ;;  %v5767_v1 = vld [vmem:[#allocation51_spill] sm:$0xff] }
 0x594   : > { %3615 = vmatprep.subr.mxu0 %v5757_v14  ;;  %3642 = vmatprep.subr.mxu1 %v5758_v49  ;;  %v5768_v14 = vld [vmem:[#allocation82_spill] sm:$0xff]  ;;  %v5769_v49 = vld [vmem:[#allocation40_spill] sm:$0xff] }
 0x595   : > { %3616 = vmatpush3.msra.mxu0 %v5759_v12  ;;  %3643 = vmatpush3.msra.mxu1 %v5760_v22  ;;  %v5770_v22 = vld [vmem:[#allocation42_spill] sm:$0xff] }
 0x596   : > { %3617 = vmatprep.subr.mxu0 %v5761_v7  ;;  %3644 = vmatprep.subr.mxu1 %v5762_v54  ;;  %v5771_v54 = vld [vmem:[#allocation50_spill] sm:$0xff] }
 0x597   : > { %3618 = vmatpush3.msra.mxu0 %v5763_v37  ;;  %3645 = vmatpush3.msra.mxu1 %v5764_v47  ;;  %v5772_v47 = vld [vmem:[#allocation52_spill] sm:$0xff] }
 0x598   : > { %3619 = vmatprep.subr.mxu0 %v5765_v25  ;;  %3646 = vmatprep.subr.mxu1 %v5766_v18  ;;  %v5773_v18 = vld [vmem:[#allocation44_spill] sm:$0xff] }
 0x599   : > { %3620 = vmatpush3.msra.mxu0 %v5767_v1  ;;  %3647 = vmatpush3.msra.mxu1 %v5768_v14  ;;  %v5774_v1 = vld [vmem:[#allocation32_spill] sm:$0xff]  ;;  %v5775_v14 = vld [vmem:[#allocation39_spill] sm:$0xff] }
 0x59a   : > { %3621 = vmatprep.subr.mxu0 %v5769_v49  ;;  %3648 = vmatprep.subr.mxu1 %v4854_v4  ;;  %v5776_v49 = vld [vmem:[#allocation34_spill] sm:$0xff] }
 0x59b   : > { %3622 = vmatpush3.msra.mxu0 %v5770_v22  ;;  %3649 = vmatpush3.msra.mxu1 %v4858_v15  ;;  %v5777_v4 = vld [vmem:[#allocation54_spill] sm:$0xff]  ;;  %v5778_v15 = vld [vmem:[#allocation81_spill] sm:$0xff] }
 0x59c   : > { %3623 = vmatprep.subr.mxu0 %v5771_v54  ;;  %3650 = vmatprep.subr.mxu1 %v4705_v40  ;;  %v5779_v40 = vld [vmem:[#allocation80_spill] sm:$0xff] }
 0x59d   : > { %3624 = vmatpush3.msra.mxu0 %v5772_v47  ;;  %3651 = vmatpush3.msra.mxu1 %v4699_v36 }
 0x59e   : > { %3625 = vmatprep.subr.mxu0 %v5773_v18  ;;  %3652 = vmatprep.subr.mxu1 %v5774_v1 }
 0x59f   : > { %3626 = vmatpush3.msra.mxu0 %v5775_v14  ;;  %3653 = vmatpush3.msra.mxu1 %v5776_v49 }
 0x5a0   : > { %3627 = vmatprep.subr.mxu0 %v5777_v4  ;;  %3654 = vmatprep.subr.mxu1 %v4862_v34 }
 0x5a1   : > { %3628 = vmatpush3.msra.mxu0 %v5778_v15  ;;  %3655 = vmatpush3.msra.mxu1 %v4866_v17 }
 0x5a2   : > { %3629 = vmatprep.subr.mxu0 %v5779_v40  ;;  %3656 = vmatprep.subr.mxu1 %v4824_v2  ;;  %v5780_v2 = vld [vmem:[#allocation84_spill] sm:$0xff] }
 0x5a3   : > { %3630 = vmatpush3.msra.mxu0 %v4923_v20  ;;  %3657 = vmatpush3.msra.mxu1 %v4832_v23 }
 0x5a4   : > { %3631 = vmatprep.subr.mxu0 %v4633_v48  ;;  %3658 = vmatprep.subr.mxu1 %v4868_v0 }
 0x5a5   : > { %3632 = vmatpush3.msra.mxu0 %v4643_v50  ;;  %3659 = vmatpush3.msra.mxu1 %v4843_v56 }
 0x5a6   : > { %3633 = vmatprep.subr.mxu0 %v4610_v39  ;;  %3660 = vmatprep.subr.mxu1 %v4840_v21 }
 0x5a7   : > { %3634 = vmatpush3.msra.mxu0 %v4608_v38  ;;  %3661 = vmatpush3.msra.mxu1 %v4851_v32  ;;  %v5781_v38 = vld [vmem:[#allocation79_spill] sm:$0xff] }
 0x5a8   : > { %3662 = vmatprep.subr.mxu1 %v5780_v2  ;;  %3808 = vmatprep.subr.mxu0 %v5727_v60 }
 0x5a9   : > { %3663 = vmatpush3.msra.mxu1 %v4909_v46 }
 0x5aa   : > { %3664 = vmatprep.subr.mxu1 %v4926_v30 }
 0x5ab   : > { %3665 = vmatpush3.msra.mxu1 %v4943_v57 }
 0x5ac   : > { %3666 = vmatprep.subr.mxu1 %v4711_v41 }
 0x5ad   : > { %3667 = vmatpush3.msra.mxu1 %v4689_v31 }
 0x5ae   : > { %3668 = vmatprep.subr.mxu1 %v4675_v29 }
 0x5af   : > { %3669 = vmatpush3.msra.mxu1 %v4683_v3 }
 0x5b0   : > { %3485 = vmatprep.subr.msk.mxu1 %vm5731_vm6, %v5730_v43  ;;  %vm5783_vm6 = vnez %v5646_v13  ;;  %v5809_v13 = vld [vmem:[#allocation51_spill] sm:$0xff] }
 0x647   : > { %v2202_v2 = vpop.f32.mrf.mxu1  ;;  %v2273_v32 = vpop.f32.mrf.mxu0 }
 0x648   : > { %v2278_v46 = vmul.f32 %v2202_v2, %v5781_v38  ;;  %v2280_v30 = vmul.f32 %v2273_v32, %v5781_v38 }
 0x649   : > { %v2204_v21 = vpop.f32.mrf.mxu1  ;;  %v2275_v57 = vpop.f32.mrf.mxu0 }
 0x64a   : > { %v2282_v39 = vrot.slane %v2278_v46, 4  ;;  %v2294_v41 = vrot.slane %v2280_v30, 4  ;;  %v2279_v31 = vmul.f32 %v2204_v21, %v5781_v38  ;;  %v2281_v29 = vmul.f32 %v2275_v57, %v5781_v38 }
 0x64c   : > { %v2283_v56 = vadd.f32 %v2282_v39, %v2278_v46  ;;  %v2295_v3 = vadd.f32 %v2294_v41, %v2280_v30  ;;  %v2288_v50 = vrot.slane %v2279_v31, 4  ;;  %v2300_v0 = vrot.slane %v2281_v29, 4 }
 0x64e   : > { %v2284_v51 = vrot.slane %v2283_v56, 2  ;;  %v2296_v48 = vrot.slane %v2295_v3, 2  ;;  %v2289_v23 = vadd.f32 %v2288_v50, %v2279_v31  ;;  %v2301_v20 = vadd.f32 %v2300_v0, %v2281_v29 }
 0x64f   : > { %v2376_v40 = vpop.f32.mrf.mxu1 }
 0x650   : > { %v2285_v2 = vadd.f32 %v2284_v51, %v2283_v56  ;;  %v2297_v17 = vadd.f32 %v2296_v48, %v2295_v3  ;;  %v2290_v32 = vrot.slane %v2289_v23, 2  ;;  %v2302_v15 = vrot.slane %v2301_v20, 2 }
 0x651   : > { %v2595_v34 = vadd.f32 %v2376_v40, %v4959_v24  ;;  %v3807_v4 = vpop.f32.mrf.mxu1 }
 0x652   : > { %v2286_v49 = vrot.slane %v2285_v2, 1  ;;  %v2298_v21 = vrot.slane %v2297_v17, 1  ;;  %v2291_v14 = vadd.f32 %v2290_v32, %v2289_v23  ;;  %v2303_v57 = vadd.f32 %v2302_v15, %v2301_v20 }
 0x653   : > { %2607 = vrot.lane.b32.xlu0 %v2595_v34, %s4049_s8  ;;  %2597 = vrot.lane.b32.xlu1 %v2595_v34, %s4055_s20 }
 0x654   : > { %v2292_v39 = vrot.slane %v2291_v14, 1  ;;  %v2304_v46 = vrot.slane %v2303_v57, 1  ;;  %v2287_v50 = vadd.f32 %v2286_v49, %v2285_v2  ;;  %v2299_v29 = vadd.f32 %v2298_v21, %v2297_v17 }
 0x656   : > { %v2293_v30 = vadd.f32 %v2292_v39, %v2291_v14  ;;  %v2305_v56 = vadd.f32 %v2304_v46, %v2303_v57  ;;  %v2306_v31 = vmul.f32 %v2287_v50, %v4950_v8  ;;  %v2308_v41 = vmul.f32 %v2299_v29, %v4950_v8 }
 0x658   : > { %v2307_v48 = vmul.f32 %v2293_v30, %v4950_v8  ;;  %v2309_v3 = vmul.f32 %v2305_v56, %v4950_v8 }
 0x65a   : > { %2444 = vmatprep.mubr.f32.mxu0 %v2307_v48  ;;  %2514 = vmatprep.mubr.f32.mxu1 %v2309_v3  ;;  %v3947_v48 = vld [vmem:[%s5433_s11 + $0x18] sm:$0xff]  ;;  %v3949_v3 = vld [vmem:[%s5433_s11 + $0x8] sm:$0xff] }
 0x65b   : > { %2445 = vmatmul.mubr.f32.vlgmr.msra.gmra.mxu0 %v2306_v31  ;;  %2515 = vmatmul.mubr.f32.vlgmr.msra.gmra.mxu1 %v2308_v41  ;;  %v5796_v31 = vld [vmem:[#allocation78_spill] sm:$0xff] }
 0x65c   : > { %3809 = vmatpush3.msra.mxu0 %v4997_v28  ;;  %3816 = vmatprep.mubr.msk.f32.mxu0 %vm5656_vm8, %v5727_v60  ;;  %v5798_v41 = vld [vmem:[#allocation70_spill] sm:$0xff] }
 0x65d   : > { %3810 = vmatprep.subr.mxu0 %v5727_v60  ;;  %3486 = vmatpush1.msk.msra.mxu1 %vm5732_vm11, %v5730_v43 }
 0x65e   : > { %3811 = vmatpush3.msra.mxu0 %v5004_v52  ;;  %3487 = vmatprep.subr.msk.mxu1 %vm5733_vm12, %v5730_v43 }
 0x65f   : > { %3812 = vmatprep.subr.mxu0 %v5727_v60  ;;  %3488 = vmatpush1.msk.msra.mxu1 %vm4423_vm0, %v5730_v43  ;;  %vm5782_vm0 = vnez %v5614_v55 }
 0x660   : > { %3813 = vmatpush3.msra.mxu0 %v5010_v58  ;;  %3489 = vmatprep.subr.msk.mxu1 %vm4448_vm9, %v5730_v43 }
 0x661   : > { %3814 = vmatprep.subr.mxu0 %v5727_v60  ;;  %3490 = vmatpush1.msk.msra.mxu1 %vm4476_vm2, %v5730_v43  ;;  %vm5784_vm2 = vmmov %vm5735_vm3 }
 0x662   : > { %3815 = vmatpush3.msra.mxu0 %v5016_v33  ;;  %3491 = vmatprep.subr.msk.mxu1 %vm4498_vm14, %v5730_v43 }
 0x663   : > { %3494 = vmatprep.subr.msk.mxu0 %vm5782_vm0, %v5730_v43  ;;  %3492 = vmatpush1.msk.msra.mxu1 %vm5783_vm6, %v5730_v43 }
 0x664   : > { %2694 = vmatprep.mubr.f32.mxu1 %v5727_v60  ;;  %3819 = vmatprep.subr.mxu1 %v5727_v60 }
 0x6c5   : > { %v2598_v17 = vpop.permute.xlu1 %2597  ;;  %v2608_v2 = vpop.permute.xlu0 %2607 }
 0x71b   : > { %v3635_v59 = vpop.f32.mrf.mxu0  ;;  %v3670_v62 = vpop.f32.mrf.mxu1 }
 0x71d   : > { %v3636_v5 = vpop.f32.mrf.mxu0  ;;  %v3671_v26 = vpop.f32.mrf.mxu1 }
 0x71e   : > { %v3637_v10 = vadd.f32 %v3636_v5, %v3635_v59  ;;  %v3672_v35 = vadd.f32 %v3671_v26, %v3670_v62  ;;  %v5799_v59 = vld [vmem:[#allocation49_spill] sm:$0xff]  ;;  %v5800_v62 = vld [vmem:[#allocation60_spill] sm:$0xff]  ;;  %v5801_v5 = vld [vmem:[#allocation46_spill] sm:$0xff] }
 0x71f   : > { %v5802_v26 = vld [vmem:[#allocation62_spill] sm:$0xff] }
 0x720   : > { %v2447_v20 = vadd.f32 %v3637_v10, %v2376_v40  ;;  %v5787_v40 = vld [vmem:[#allocation18_spill] sm:$0xff]  ;;  %v5803_v10 = vld [vmem:[#allocation31_spill] sm:$0xff] }
 0x721   : > { %vm5788_vm9 = vnez %v5787_v40  ;;  %v5811_v40 = vld [vmem:[#allocation40_spill] sm:$0xff] }
 0x722   : > { %v2517_v0 = vadd.f32 %v3672_v35, %v2447_v20  ;;  %v5804_v20 = vld [vmem:[#allocation72_spill] sm:$0xff]  ;;  %v5805_v35 = vld [vmem:[#allocation74_spill] sm:$0xff] }
 0x724   : > { %v2520_v4 = vadd.f32 %v5028_v16, %v2517_v0  ;;  %v5806_v0 = vld [vmem:[#allocation64_spill] sm:$0xff] }
 0x726   : > { %v2521_v55 = vmax.f32 %v2520_v4, 0.0  ;;  %v5807_v4 = vld [vmem:[#allocation67_spill] sm:$0xff] }
 0x728   : > { %3817 = vmatmul.mubr.msk.f32.vlgmr.msra.gmra.mxu0 %vm5784_vm2, %v2521_v55  ;;  %v5808_v55 = vld [vmem:[#allocation77_spill] sm:$0xff] }
 0x729   : > { %3495 = vmatpush1.msk.msra.mxu0 %vm5736_vm15, %v5730_v43  ;;  %2765 = vmatprep.mubr.f32.mxu0 %v5727_v60 }
 0x72a   : > { %3496 = vmatprep.subr.msk.mxu0 %vm4410_vm1, %v5730_v43  ;;  %vm5790_vm1 = vmmov %vm5784_vm2 }
 0x72b   : > { %3497 = vmatpush1.msk.msra.mxu0 %vm5641_vm13, %v5730_v43  ;;  %vm5841_vm13 = vmmov %vm5790_vm1 }
 0x72c   : > { %3498 = vmatprep.subr.msk.mxu0 %vm4462_vm4, %v5730_v43  ;;  %vm5791_vm4 = vmmov %vm5790_vm1 }
 0x72d   : > { %3499 = vmatpush1.msk.msra.mxu0 %vm5647_vm7, %v5730_v43  ;;  %vm5842_vm14 = vmmov %vm5790_vm1 }
 0x72e   : > { %3500 = vmatprep.subr.msk.mxu0 %vm4510_vm5, %v5730_v43  ;;  %vm5794_vm5 = vmmov %vm5790_vm1 }
 0x72f   : > { %3501 = vmatpush1.msk.msra.mxu0 %vm5788_vm9, %v5730_v43  ;;  %vm5845_vm7 = vmmov %vm5790_vm1 }
 0x730   : > { %3683 = vmatprep.subr.mxu0 %v5789_v63  ;;  %v5816_v63 = vld [vmem:[#allocation34_spill] sm:$0xff] }
 0x7e8   : > { %v2591_v6 = vpop.f32.mrf.mxu0 }
 0x7e9   : > { %v2592_v15 = vadd.f32 %v5058_v42, %v2591_v6  ;;  %v5817_v6 = vld [vmem:[#allocation54_spill] sm:$0xff] }
 0x7ea   : > { %v3818_v9 = vpop.f32.mrf.mxu0 }
 0x7eb   : > { %v2600_v23 = vadd.f32 %v2598_v17, %v2592_v15  ;;  %v5821_v17 = vld [vmem:[#allocation80_spill] sm:$0xff] }
 0x7ec   : > { %v5826_v9 = vld [vmem:[#allocation76_spill] sm:$0xff] }
 0x7ed   : > { %v3484_v34 = vmul.f32 -1.442695, %v2600_v23  ;;  %v5827_v23 = vld [vmem:[#allocation29_spill] sm:$0xff] }
 0x7ef   : > { %3935 = vpow2.f32 %v3484_v34  ;;  %v5828_v34 = vld [vmem:[#allocation66_spill] sm:$0xff] }
 0x7fc   : > { %v3936_v14 = vpop.eup %3935 }
 0x7fd   : > { %v2604_v49 = vadd.f32 1.0, %v3936_v14  ;;  %v5829_v14 = vld [vmem:[#allocation25_spill] sm:$0xff] }
 0x7ff   : > { %3937 = vrcp.f32 %v2604_v49  ;;  %v5830_v49 = vld [vmem:[#allocation65_spill] sm:$0xff] }
 0x80c   : > { %v3938_v51 = vpop.eup %3937 }
 0x80d   : > { %v2610_v32 = vmul.f32 %v3938_v51, %v2608_v2  ;;  %v2617_v39 = vsub.f32 1.0, %v3938_v51  ;;  %v2623_v50 = vmul.f32 %v3938_v51, %v5065_v19  ;;  %v3948_v19 = vld [vmem:[%s5433_s11 + $0x10] sm:$0xff] }
 0x80e   : > { %v5831_v51 = vld [vmem:[#allocation24_spill] sm:$0xff] }
 0x80f   : > { %2612 = vrot.lane.b32.xlu1 %v2610_v32, %s4050_s16  ;;  %v5832_v2 = vld [vmem:[#allocation68_spill] sm:$0xff] }
 0x810   : > { %v5833_v32 = vld [vmem:[#allocation84_spill] sm:$0xff] }
 0x881   : > { %v2613_v21 = vpop.permute.xlu1 %2612 }
 0x882   : > { %v2615_v43 = vadd.f32 %v2613_v21, %v2592_v15  ;;  %v5819_v15 = vld [vmem:[#allocation81_spill] sm:$0xff]  ;;  %v5834_v21 = vld [vmem:[#allocation83_spill] sm:$0xff] }
 0x884   : > { %3939 = vtanh.f32 %v2615_v43  ;;  %v5835_v43 = vld [vmem:[#allocation86_spill] sm:$0xff] }
 0x891   : > { %v3940_v57 = vpop.eup %3939 }
 0x892   : > { %2619 = vrot.lane.b32.xlu0 %v3940_v57, %s4055_s20  ;;  %v5836_v57 = vld [vmem:[#allocation87_spill] sm:$0xff] }
 0x904   : > { %v2620_v46 = vpop.permute.xlu0 %2619 }
 0x905   : > { %v2622_v29 = vmul.f32 %v2620_v46, %v2617_v39  ;;  %v5837_v39 = vld [vmem:[#allocation38_spill] sm:$0xff]  ;;  %v5838_v46 = vld [vmem:[#allocation36_spill] sm:$0xff] }
 0x907   : > { %v5223_v30 = vadd.f32 %v2623_v50, %v2622_v29  ;;  %v5839_v50 = vld [vmem:[#allocation33_spill] sm:$0xff]  ;;  %v5840_v29 = vld [vmem:[#allocation35_spill] sm:$0xff] }
 0x909   : > { %2626 = vrot.lane.b32.xlu1 %v5223_v30, %s4055_s20 }
 0x97b   : > { %v2627_v56 = vpop.permute.xlu1 %2626 }
 0x97c   : > { %3493 = vmatmul.mubr.msk.f32.vlgmr.msra.gmra.mxu1 %vm5790_vm1, %v2627_v56  ;;  %3502 = vmatmul.mubr.msk.f32.vlgmr.msra.gmra.mxu0 %vm5791_vm4, %v2627_v56 }
 0x97d   : > { %3820 = vmatpush3.msra.mxu1 %v3947_v48  ;;  %3684 = vmatpush3.msra.mxu0 %v5741_v11  ;;  %v5792_v11 = vld [vmem:[#allocation45_spill] sm:$0xff] }
 0x97e   : > { %3821 = vmatprep.subr.mxu1 %v5727_v60  ;;  %3685 = vmatprep.subr.mxu0 %v5742_v45  ;;  %v3950_v45 = vld [vmem:[%s5433_s11] sm:$0xff] }
 0x97f   : > { %3822 = vmatpush3.msra.mxu1 %v3948_v19  ;;  %3686 = vmatpush3.msra.mxu0 %v5744_v53  ;;  %v5793_v53 = vld [vmem:[#allocation47_spill] sm:$0xff] }
 0x980   : > { %3823 = vmatprep.subr.mxu1 %v5727_v60  ;;  %3687 = vmatprep.subr.mxu0 %v5745_v27  ;;  %v5795_v27 = vld [vmem:[#allocation59_spill] sm:$0xff] }
 0x981   : > { %3824 = vmatpush3.msra.mxu1 %v3949_v3  ;;  %3688 = vmatpush3.msra.mxu0 %v5747_v44  ;;  %v5797_v44 = vld [vmem:[#allocation58_spill] sm:$0xff] }
 0x982   : > { %3825 = vmatprep.subr.mxu1 %v5727_v60  ;;  %3689 = vmatprep.subr.mxu0 %v5792_v11 }
 0x983   : > { %3826 = vmatpush3.msra.mxu1 %v3950_v45  ;;  %3827 = vmatprep.mubr.msk.f32.mxu1 %vm5656_vm8, %v5727_v60 }
 0x984   : > { %3690 = vmatpush3.msra.mxu0 %v5793_v53  ;;  %3828 = vmatmul.mubr.msk.f32.vlgmr.msra.gmra.mxu1 %vm5794_vm5, %v2627_v56 }
 0x985   : > { %3691 = vmatprep.subr.mxu0 %v5795_v27  ;;  %3718 = vmatprep.subr.mxu1 %v5796_v31 }
 0x986   : > { %3692 = vmatpush3.msra.mxu0 %v5797_v44  ;;  %3719 = vmatpush3.msra.mxu1 %v5798_v41 }
 0x987   : > { %3693 = vmatprep.subr.mxu0 %v5799_v59  ;;  %3720 = vmatprep.subr.mxu1 %v5800_v62 }
 0x988   : > { %3694 = vmatpush3.msra.mxu0 %v5801_v5  ;;  %3721 = vmatpush3.msra.mxu1 %v5802_v26 }
 0x989   : > { %3695 = vmatprep.subr.mxu0 %v5803_v10  ;;  %3722 = vmatprep.subr.mxu1 %v5804_v20 }
 0x98a   : > { %3696 = vmatpush3.msra.mxu0 %v5759_v12  ;;  %3723 = vmatpush3.msra.mxu1 %v5805_v35  ;;  %v5812_v12 = vld [vmem:[#allocation69_spill] sm:$0xff] }
 0x98b   : > { %3697 = vmatprep.subr.mxu0 %v5761_v7  ;;  %3724 = vmatprep.subr.mxu1 %v5806_v0  ;;  %v5813_v7 = vld [vmem:[#allocation71_spill] sm:$0xff] }
 0x98c   : > { %3698 = vmatpush3.msra.mxu0 %v5763_v37  ;;  %3725 = vmatpush3.msra.mxu1 %v5807_v4  ;;  %v5814_v37 = vld [vmem:[#allocation37_spill] sm:$0xff] }
 0x98d   : > { %3699 = vmatprep.subr.mxu0 %v5765_v25  ;;  %3726 = vmatprep.subr.mxu1 %v5808_v55  ;;  %v5815_v25 = vld [vmem:[#allocation39_spill] sm:$0xff] }
 0x98e   : > { %3700 = vmatpush3.msra.mxu0 %v5809_v13  ;;  %3727 = vmatpush3.msra.mxu1 %v5810_v61 }
 0x98f   : > { %3701 = vmatprep.subr.mxu0 %v5811_v40  ;;  %3728 = vmatprep.subr.mxu1 %v5812_v12 }
 0x990   : > { %3702 = vmatpush3.msra.mxu0 %v5770_v22  ;;  %3729 = vmatpush3.msra.mxu1 %v5813_v7  ;;  %v5818_v22 = vld [vmem:[#allocation73_spill] sm:$0xff] }
 0x991   : > { %3703 = vmatprep.subr.mxu0 %v5771_v54  ;;  %3730 = vmatprep.subr.mxu1 %v5814_v37  ;;  %v5820_v54 = vld [vmem:[#allocation75_spill] sm:$0xff] }
 0x992   : > { %3704 = vmatpush3.msra.mxu0 %v5772_v47  ;;  %3731 = vmatpush3.msra.mxu1 %v4699_v36  ;;  %v5822_v47 = vld [vmem:[#allocation61_spill] sm:$0xff] }
 0x993   : > { %3705 = vmatprep.subr.mxu0 %v5773_v18  ;;  %3732 = vmatprep.subr.mxu1 %v5774_v1  ;;  %v5823_v36 = vld [vmem:[#allocation85_spill] sm:$0xff]  ;;  %v5824_v18 = vld [vmem:[#allocation63_spill] sm:$0xff]  ;;  %v5825_v1 = vld [vmem:[#allocation28_spill] sm:$0xff] }
 0x994   : > { %3706 = vmatpush3.msra.mxu0 %v5815_v25  ;;  %3733 = vmatpush3.msra.mxu1 %v5816_v63 }
 0x995   : > { %3707 = vmatprep.subr.mxu0 %v5817_v6  ;;  %3734 = vmatprep.subr.mxu1 %v5818_v22 }
 0x996   : > { %3708 = vmatpush3.msra.mxu0 %v5819_v15  ;;  %3735 = vmatpush3.msra.mxu1 %v5820_v54 }
 0x997   : > { %3709 = vmatprep.subr.mxu0 %v5821_v17  ;;  %3736 = vmatprep.subr.mxu1 %v5822_v47 }
 0x998   : > { %3710 = vmatpush3.msra.mxu0 %v5823_v36  ;;  %3737 = vmatpush3.msra.mxu1 %v5824_v18 }
 0x999   : > { %3711 = vmatprep.subr.mxu0 %v5825_v1  ;;  %3738 = vmatprep.subr.mxu1 %v5826_v9 }
 0x99a   : > { %3712 = vmatpush3.msra.mxu0 %v5827_v23  ;;  %3739 = vmatpush3.msra.mxu1 %v5828_v34 }
 0x99b   : > { %3713 = vmatprep.subr.mxu0 %v5829_v14  ;;  %3740 = vmatprep.subr.mxu1 %v5830_v49 }
 0x99c   : > { %3714 = vmatpush3.msra.mxu0 %v5831_v51  ;;  %3741 = vmatpush3.msra.mxu1 %v5832_v2 }
 0x99d   : > { %3742 = vmatprep.subr.mxu1 %v5833_v32  ;;  %3830 = vmatprep.subr.mxu0 %v5727_v60 }
 0x99e   : > { %3743 = vmatpush3.msra.mxu1 %v5834_v21 }
 0x99f   : > { %3744 = vmatprep.subr.mxu1 %v5835_v43 }
 0x9a0   : > { %3745 = vmatpush3.msra.mxu1 %v5836_v57 }
 0x9a1   : > { %3746 = vmatprep.subr.mxu1 %v5837_v39 }
 0x9a2   : > { %3747 = vmatpush3.msra.mxu1 %v5838_v46 }
 0x9a3   : > { %3748 = vmatprep.subr.mxu1 %v5839_v50 }
 0x9a4   : > { %3749 = vmatpush3.msra.mxu1 %v5840_v29 }
 0x9a5   : > { %3841 = vmatprep.subr.mxu1 %v5727_v60 }
 0xa3c   : > { %v2696_v56 = vpop.f32.mrf.mxu1  ;;  %v2767_v48 = vpop.f32.mrf.mxu0 }
 0xa3d   : > { %v2772_v19 = vmul.f32 %v2696_v56, %v5781_v38  ;;  %v2774_v3 = vmul.f32 %v2767_v48, %v5781_v38  ;;  %v3121_v48 = vld [vmem:[%s5437_s15 + $0x10] sm:$0xff] }
 0xa3e   : > { %v2698_v11 = vpop.f32.mrf.mxu1  ;;  %v2769_v45 = vpop.f32.mrf.mxu0 }
 0xa3f   : > { %v2776_v53 = vrot.slane %v2772_v19, 4  ;;  %v2788_v27 = vrot.slane %v2774_v3, 4  ;;  %v2773_v31 = vmul.f32 %v2698_v11, %v5781_v38  ;;  %v2775_v44 = vmul.f32 %v2769_v45, %v5781_v38  ;;  %v3209_v45 = vld [vmem:[%s5439_s17 + $0x18] sm:$0xff] }
 0xa41   : > { %v2777_v41 = vadd.f32 %v2776_v53, %v2772_v19  ;;  %v2789_v59 = vadd.f32 %v2788_v27, %v2774_v3  ;;  %v2782_v62 = vrot.slane %v2773_v31, 4  ;;  %v2794_v5 = vrot.slane %v2775_v44, 4  ;;  %v3120_v19 = vld [vmem:[%s5437_s15 + $0x8] sm:$0xff]  ;;  %v3119_v3 = vld [vmem:[%s5437_s15] sm:$0xff] }
 0xa43   : > { %v2778_v26 = vrot.slane %v2777_v41, 2  ;;  %v2790_v10 = vrot.slane %v2789_v59, 2  ;;  %v2783_v20 = vadd.f32 %v2782_v62, %v2773_v31  ;;  %v2795_v35 = vadd.f32 %v2794_v5, %v2775_v44  ;;  %v3208_v62 = vld [vmem:[%s5439_s17 + $0x10] sm:$0xff]  ;;  %v3207_v5 = vld [vmem:[%s5439_s17 + $0x8] sm:$0xff] }
 0xa44   : > { %v2870_v0 = vpop.f32.mrf.mxu1 }
 0xa45   : > { %v2779_v4 = vadd.f32 %v2778_v26, %v2777_v41  ;;  %v2791_v55 = vadd.f32 %v2790_v10, %v2789_v59  ;;  %v2784_v13 = vrot.slane %v2783_v20, 2  ;;  %v2796_v61 = vrot.slane %v2795_v35, 2  ;;  %v3506_v26 = vld [vmem:[%s5844_s19] ss:$0 sm:$0xff] }
 0xa46   : > { %v3089_v40 = vadd.f32 %v2870_v0, %v4959_v24  ;;  %v3829_v12 = vpop.f32.mrf.mxu1 }
 0xa47   : > { %v2780_v7 = vrot.slane %v2779_v4, 1  ;;  %v2792_v37 = vrot.slane %v2791_v55, 1  ;;  %v2785_v25 = vadd.f32 %v2784_v13, %v2783_v20  ;;  %v2797_v38 = vadd.f32 %v2796_v61, %v2795_v35 }
 0xa48   : > { %3101 = vrot.lane.b32.xlu1 %v3089_v40, %s4049_s8  ;;  %3091 = vrot.lane.b32.xlu0 %v3089_v40, %s4055_s20  ;;  %s4057_s8 = smov [#allocation5]  }
 0xa49   : > { %v2786_v63 = vrot.slane %v2785_v25, 1  ;;  %v2798_v6 = vrot.slane %v2797_v38, 1  ;;  %v2781_v22 = vadd.f32 %v2780_v7, %v2779_v4  ;;  %v2793_v15 = vadd.f32 %v2792_v37, %v2791_v55  ;;  %v3508_v4 = vld [vmem:[%s5847_s28] ss:$0 sm:$0xff]  ;;  %s3981_s24 = sshll.u32 %s4057_s8, 4  ;;  %s3982_s24 = int_to_ptr.vmem [resolvable:$false] %s3981_s24 }
 0xa4a   : > { %s3983_s19 = scalar_lea.vmem %s3982_s24, 256  ;;  %p3984_p11 = scmp.lt.s32.totalorder %s3306_s26, %s3982_s24 }
 0xa4b   : > { %v2787_v54 = vadd.f32 %v2786_v63, %v2785_v25  ;;  %v2799_v17 = vadd.f32 %v2798_v6, %v2797_v38  ;;  %v2800_v24 = vmul.f32 %v2781_v22, %v4950_v8  ;;  %v2802_v18 = vmul.f32 %v2793_v15, %v4950_v8 }
 0xa4d   : > { %v2801_v47 = vmul.f32 %v2787_v54, %v4950_v8  ;;  %v2803_v36 = vmul.f32 %v2799_v17, %v4950_v8 }
 0xa4f   : > { %2938 = vmatprep.mubr.f32.mxu0 %v2801_v47  ;;  %3008 = vmatprep.mubr.f32.mxu1 %v2803_v36 }
 0xa50   : > { %2939 = vmatmul.mubr.f32.vlgmr.msra.gmra.mxu0 %v2800_v24  ;;  %3009 = vmatmul.mubr.f32.vlgmr.msra.gmra.mxu1 %v2802_v18 }
 0xa51   : > { %3831 = vmatpush3.msra.mxu0 %v4997_v28  ;;  %3838 = vmatprep.mubr.msk.f32.mxu0 %vm5656_vm8, %v5727_v60 }
 0xa52   : > { %3832 = vmatprep.subr.mxu0 %v5727_v60  ;;  %3849 = vmatprep.mubr.msk.f32.mxu1 %vm5656_vm8, %v5727_v60 }
 0xa53   : > { %3833 = vmatpush3.msra.mxu0 %v5004_v52 }
 0xa54   : > { %3834 = vmatprep.subr.mxu0 %v5727_v60 }
 0xa55   : > { %3835 = vmatpush3.msra.mxu0 %v5010_v58 }
 0xa56   : > { %3836 = vmatprep.subr.mxu0 %v5727_v60 }
 0xa57   : > { %3837 = vmatpush3.msra.mxu0 %v5016_v33 }
 0xa58   : > { %3852 = vmatprep.subr.mxu0 %v5727_v60 }
 0xaba   : > { %v3092_v2 = vpop.permute.xlu0 %3091  ;;  %v3102_v50 = vpop.permute.xlu1 %3101 }
 0xb10   : > { %v3715_v8 = vpop.f32.mrf.mxu0  ;;  %v3750_v28 = vpop.f32.mrf.mxu1 }
 0xb12   : > { %v3716_v1 = vpop.f32.mrf.mxu0  ;;  %v3751_v9 = vpop.f32.mrf.mxu1 }
 0xb13   : > { %v3717_v23 = vadd.f32 %v3716_v1, %v3715_v8  ;;  %v3752_v14 = vadd.f32 %v3751_v9, %v3750_v28 }
 0xb15   : > { %v2941_v34 = vadd.f32 %v3717_v23, %v2870_v0 }
 0xb17   : > { %v3011_v49 = vadd.f32 %v3752_v14, %v2941_v34 }
 0xb19   : > { %v3014_v52 = vadd.f32 %v5028_v16, %v3011_v49 }
 0xb1b   : > { %v3015_v51 = vmax.f32 %v3014_v52, 0.0 }
 0xb1d   : > { %3839 = vmatmul.mubr.msk.f32.vlgmr.msra.gmra.mxu0 %vm5841_vm13, %v3015_v51 }
 0xb1e   : > { %3860 = vmatprep.mubr.msk.f32.mxu0 %vm5656_vm8, %v5727_v60  ;;  %3853 = vmatpush3.msra.mxu0 %v3209_v45 }
 0xb1f   : > { %3854 = vmatprep.subr.mxu0 %v5727_v60 }
 0xb20   : > { %3855 = vmatpush3.msra.mxu0 %v3208_v62 }
 0xb21   : > { %3856 = vmatprep.subr.mxu0 %v5727_v60 }
 0xb22   : > { %3857 = vmatpush3.msra.mxu0 %v3207_v5 }
 0xb23   : > { %3858 = vmatprep.subr.mxu0 %v5727_v60 }
 0xbdd   : > { %v3085_v58 = vpop.f32.mrf.mxu0 }
 0xbde   : > { %v3086_v33 = vadd.f32 %v5058_v42, %v3085_v58  ;;  %v3122_v42 = vld [vmem:[%s5437_s15 + $0x18] sm:$0xff] }
 0xbdf   : > { %v3840_v32 = vpop.f32.mrf.mxu0  ;;  %3842 = vmatpush3.msra.mxu1 %v3122_v42 }
 0xbe0   : > { %v3094_v21 = vadd.f32 %v3092_v2, %v3086_v33  ;;  %3843 = vmatprep.subr.mxu1 %v5727_v60 }
 0xbe1   : > { %3844 = vmatpush3.msra.mxu1 %v3121_v48 }
 0xbe2   : > { %v3505_v43 = vmul.f32 -1.442695, %v3094_v21  ;;  %3845 = vmatprep.subr.mxu1 %v5727_v60 }
 0xbe3   : > { %3846 = vmatpush3.msra.mxu1 %v3120_v19 }
 0xbe4   : > { %3941 = vpow2.f32 %v3505_v43  ;;  %3847 = vmatprep.subr.mxu1 %v5727_v60 }
 0xbe5   : > { %3848 = vmatpush3.msra.mxu1 %v3119_v3 }
 0xbf1   : > { %v3942_v57 = vpop.eup %3941 }
 0xbf2   : > { %v3098_v39 = vadd.f32 1.0, %v3942_v57 }
 0xbf4   : > { %3943 = vrcp.f32 %v3098_v39 }
 0xc01   : > { %v3944_v46 = vpop.eup %3943 }
 0xc02   : > { %v3104_v16 = vmul.f32 %v3944_v46, %v3102_v50  ;;  %v3111_v53 = vsub.f32 1.0, %v3944_v46  ;;  %v3117_v31 = vmul.f32 %v3944_v46, %v5223_v30  ;;  %v3206_v30 = vld [vmem:[%s5439_s17] sm:$0xff] }
 0xc03   : > { %3859 = vmatpush3.msra.mxu0 %v3206_v30 }
 0xc04   : > { %3106 = vrot.lane.b32.xlu0 %v3104_v16, %s4050_s16 }
 0xc76   : > { %v3107_v29 = vpop.permute.xlu0 %3106 }
 0xc77   : > { %v3109_v56 = vadd.f32 %v3107_v29, %v3086_v33 }
 0xc79   : > { %3945 = vtanh.f32 %v3109_v56 }
 0xc86   : > { %v3946_v11 = vpop.eup %3945 }
 0xc87   : > { %3113 = vrot.lane.b32.xlu1 %v3946_v11, %s4055_s20 }
 0xcf9   : > { %v3114_v27 = vpop.permute.xlu1 %3113 }
 0xcfa   : > { %v3116_v44 = vmul.f32 %v3114_v27, %v3111_v53 }
 0xcfc   : > { %v3118_v41 = vadd.f32 %v3117_v31, %v3116_v44 }
 0xcfe   : > { %3131 = vrot.lane.b32.xlu0 %v3118_v41, %s4055_s20  ;;  %s3977_s20 = scalar_lea.vmem %s3306_s26, 128 }
 0xcff   : > { %p3978_p6 = scmp.ne.s32.totalorder %s3306_s26, %s3977_s20  ;;  %p3985_p12 = scmp.lt.s32.totalorder %s3983_s19, %s3977_s20 }
 0xd01   : > { %p3979_p9 = pnand %p3978_p6, %p4196_p5  ;;  %p3986_p13 = por %p3985_p12, %p3984_p11 }
 0xd03   : > { %p3980_p10 = pneg %p3979_p9 }
 0xd05   : > { %p3987_p0 = pnand %p3986_p13, %p3980_p10 }
 0xd70   : > { %v3132_v59 = vpop.permute.xlu0 %3131 }
 0xd71   : > { %3850 = vmatmul.mubr.msk.f32.vlgmr.msra.gmra.mxu1 %vm5842_vm14, %v3132_v59 }
 0xe31   : > { %v3201_v10 = vpop.f32.mrf.mxu1 }
 0xe32   : > { %v3202_v20 = vadd.f32 %v3506_v26, %v3201_v10 }
 0xe33   : > { %v3851_v35 = vpop.f32.mrf.mxu1 }
 0xe34   : > { %v3205_v0 = vmax.f32 %v3202_v20, 0.0 }
 0xe36   : > { %3861 = vmatmul.mubr.msk.f32.vlgmr.msra.gmra.mxu0 %vm5845_vm7, %v3205_v0 }
 0xef6   : > { %v3286_v60 = vpop.f32.mrf.mxu0 }
 0xef7   : > { %v3287_v55 = vadd.f32 %v3508_v4, %v3286_v60 }
 0xef8   : > { %v3862_v13 = vpop.f32.mrf.mxu0 }
 0xef9   : > { %3290 = vst [vmem:[%s645_s29] sm:$0xff] %v3287_v55 }
 0xefa   : > { %3990 = shalt.err (!%p3987_p0)
}
 0xefb   : > { %s3991_s1 = scalar_lea.hbm %s5387_s27, 128  ;;  %s3995_s16 = scalar_lea.hbm %s5848_s23, 512 }
 0xefc   : > { %p3992_p1 = scmp.ne.s32.totalorder %s5387_s27, %s3991_s1  ;;  %p3996_p4 = scmp.lt.s32.totalorder %s5387_s27, %s5848_s23 }
 0xefd   : > { %p3997_p7 = scmp.lt.s32.totalorder %s3995_s16, %s3991_s1 }
 0xefe   : > { %p3993_p2 = pnand %p3992_p1, %p4196_p5 }
 0xeff   : > { %p3998_p8 = por %p3997_p7, %p3996_p4 }
 0xf00   : > { %p3994_p3 = pneg %p3993_p2 }
 0xf02   : > { %p3999_p6 = pnand %p3998_p8, %p3994_p3 }
 0xf04   : > { %4002 = shalt.err (!%p3999_p6)
}
 0xf05   : > { %3867 = dma.vmem_to_hbm [thread:$0]  (%p4196_p5), %s3306_s26, 128, %s5387_s27, %s3292_s18  }
 0xf06 PF: > { %s5849_s29 = sld [smem:[#allocation10_spill]] }
 0xf07   : > { %s5850_s22 = sld [smem:[#allocation8_spill]] }
 0xf08   : > { %s5851_s3 = sld [smem:[#allocation15_spill]] }
 0xf0c   : > { %p3879_p9 = scmp.ge.s32.totalorder %s5849_s29, 2 }
 0xf0d   : > { %s3317_s20 = sand.u32 1, %s5850_s22  }
 0xf0e   : > { %p5852_p10 = scmp.ne.s32.totalorder %s5851_s3, 0  ;;  %s3318_s8 = scalar_lea.sflag [#allocation4], %s3317_s20 }
 0xf10   : > { %p3874_p11 = pnand %p3879_p9, %p5852_p10 }
 0xf12   : > { %p3875_p12 = pneg %p3874_p11 }
 0xf14   : > { %4024 = dma.done.wait (%p3875_p12), %s3318_s8, 128  }
 0xf15   : > { %4026 = vsyncadd (%p3875_p12), %s3318_s8, 4294967168  ;;  %s5853_s21 = sld [smem:[#allocation12_spill]]  ;;  %s5856_s0 = smov %s4033_s30 }
 0xf16   : > { %s5854_s24 = sld [smem:[#allocation9_spill]] }
 0xf17   : > { %s5855_s20 = sld [smem:[#allocation13_spill]] }
 0xf1b   : > { %p30_p13 = scmp.ge.s32.totalorder %s5853_s21, 6  }
 0xf1c   : > { %s5857_s30 = smov %s5854_s24 }
 0xf1d   :  { %32 = sbr.rel (!%p30_p13) target bundleno = 13 (0xd), region = 145 }
 0xf22   :  { %3323 = vsyncpa [#allocation3], 1 }
 0xf23   :  { %3325 = vsyncpa [#allocation3 + $0x1], 1 }
 0xf24   :  { %3326 = vsyncpa [#allocation4], 1 }
 0xf25   :  { %3328 = vsyncpa [#allocation4 + $0x1], 1 }

</bundles_post_ra>
